<compile_context>
chip_gen: v7x
topology: tpu7x:2x2x1
jax: 0.10.0
libtpu: 0.0.40
codegen_flags: <defaults>
</compile_context>

<pallas_src>
import functools

import jax
import jax.numpy as jnp
from jax.experimental import pallas as pl
from jax.experimental.pallas import tpu as pltpu

NEG_SLOPE = 0.01      # nn.LeakyReLU default
BN_EPS = 1e-5         # nn.BatchNorm1d default
PAD_MULTIPLE = 128    # lane-dense padding; do NOT raise without measuring
NEG_INF_BIAS = -1e30  # mask value for padded logit lanes (f32-representable)


def _round_up(x, m):
    return (x + m - 1) // m * m


def _supports_bf16_vpu():
    """bf16-native VPU elementwise: v6e / v7x yes; v2-v5 no (keep f32 there)."""
    try:
        kind = jax.devices()[0].device_kind.lower()
    except Exception:
        return True
    return not any(g in kind for g in ("v2", "v3", "v4", "v5"))


def _pick_batch_tile(B, batch_tile):
    """Batch-tile heuristic (rows, multiple of 8):
       - <=64 rows: single tile (weight DMA + launch dominate anyway)
       - mid-size:  split into two tiles so a v7x megacore's 2nd TC gets work
       - large:     cap at batch_tile (default 512) to amortize per-step cost"""
    b8 = _round_up(B, 8)
    if b8 <= 64:
        return b8
    if b8 <= batch_tile:
        return _round_up(pl.cdiv(b8, 2), 8)
    return batch_tile


# --------------------------------------------------------------------------- #
# Kernel
# --------------------------------------------------------------------------- #
def _mlp_kernel(n_layers, bf16_acts, *refs):
    """Fused MLP forward on one batch tile.

    refs layout: x_ref (bf16), [W_l (bf16), b_l (f32)] * n_layers, out_ref
    Hidden layers: z = h @ W + b ; h = LeakyReLU(z)   (BN already folded in)
    Final layer:   logits = h @ W + b ; out = log_softmax(logits)  (f32)
    """
    x_ref = refs[0]
    out_ref = refs[-1]
    params = refs[1:-1]

    h = x_ref[...]                                      # (tm, F_pad) bfloat16
    for l in range(n_layers):
        w = params[2 * l][...]                          # (K_pad, N_pad) bf16
        b = params[2 * l + 1][...]                      # (1, N_pad)     f32
        z = jnp.dot(h, w, preferred_element_type=jnp.float32) + b   # f32 acc
        if l < n_layers - 1:
            if bf16_acts:
                # v6e/v7x: packed bf16 vregs halve VALU ops + live footprint
                zb = z.astype(jnp.bfloat16)
                h = jnp.where(zb >= 0, zb, NEG_SLOPE * zb)
            else:
                # v5e: f32 elementwise, single cast to bf16 for the next MXU op
                zf = jnp.where(z >= 0, z, NEG_SLOPE * z)
                h = zf.astype(jnp.bfloat16)
        else:
            # LogSoftmax in f32; padded lanes carry a -1e30 bias so exp() -> 0.
            m = jnp.max(z, axis=-1, keepdims=True)
            lse = m + jnp.log(jnp.sum(jnp.exp(z - m), axis=-1, keepdims=True))
            out_ref[...] = (z - lse).astype(out_ref.dtype)


# --------------------------------------------------------------------------- #
# Parameter construction (raw module params -> folded + padded kernel params)
# --------------------------------------------------------------------------- #
def init_raw_params(key, input_size, output_size, hidden_sizes):
    """Synthetic params matching the PyTorch module (Linear + BatchNorm1d)."""
    blocks = []
    last = input_size
    for hdim in hidden_sizes:
        key, k_w, k_b, k_g, k_be, k_m, k_v = jax.random.split(key, 7)
        scale = 1.0 / jnp.sqrt(jnp.float32(last))
        w = jax.random.uniform(k_w, (last, hdim), jnp.float32, -scale, scale)
        b = jax.random.uniform(k_b, (hdim,), jnp.float32, -scale, scale)
        gamma = 1.0 + 0.1 * jax.random.normal(k_g, (hdim,), jnp.float32)
        beta = 0.1 * jax.random.normal(k_be, (hdim,), jnp.float32)
        r_mean = 0.1 * jax.random.normal(k_m, (hdim,), jnp.float32)
        r_var = jax.random.uniform(k_v, (hdim,), jnp.float32, 0.5, 1.5)
        blocks.append((w, b, gamma, beta, r_mean, r_var))
        last = hdim
    key, k_w, k_b = jax.random.split(key, 3)
    scale = 1.0 / jnp.sqrt(jnp.float32(last))
    w_out = jax.random.uniform(k_w, (last, output_size), jnp.float32, -scale, scale)
    b_out = jax.random.uniform(k_b, (output_size,), jnp.float32, -scale, scale)
    return blocks, (w_out, b_out)


def fold_and_pad(blocks, final, pad_multiple=PAD_MULTIPLE):
    """Fold eval-mode BN of layer l into layer l+1's weight/bias, zero-pad all
    feature dims to `pad_multiple`, cast weights to bf16 (biases stay f32).
    Returns flat [W0, b0, W1, b1, ...] list for the kernel."""
    # 1) fold BN: h = leaky(z)*s + t  =>  next layer sees W' = diag(s)@W, b' = t@W + b
    folded = []
    s_prev, t_prev = None, None
    for (w, b, gamma, beta, r_mean, r_var) in blocks:
        if s_prev is None:
            w_eff, b_eff = w, b
        else:
            w_eff = w * s_prev[:, None]
            b_eff = t_prev @ w + b
        folded.append((w_eff, b_eff))
        s_prev = gamma / jnp.sqrt(r_var + BN_EPS)
        t_prev = beta - r_mean * s_prev
    w_out, b_out = final
    folded.append((w_out * s_prev[:, None], t_prev @ w_out + b_out))

    # 2) pad to lane-dense shapes
    flat = []
    n_layers = len(folded)
    for l, (w, b) in enumerate(folded):
        K, N = w.shape
        k_pad = _round_up(K, pad_multiple)
        n_pad = _round_up(N, pad_multiple)
        w_p = jnp.zeros((k_pad, n_pad), jnp.float32).at[:K, :N].set(w)
        fill = NEG_INF_BIAS if l == n_layers - 1 else 0.0   # mask padded logits
        b_p = jnp.full((1, n_pad), fill, jnp.float32).at[0, :N].set(b)
        flat += [w_p.astype(jnp.bfloat16), b_p]
    return flat


# --------------------------------------------------------------------------- #
# Wrapper
# --------------------------------------------------------------------------- #
def image_classifier_forward(x_img, kernel_params, output_size, *,
                             batch_tile=512, bf16_acts=None):
    """x_img: (B, C, H, W) float32 -> log-probs (B, output_size)."""
    if bf16_acts is None:
        bf16_acts = _supports_bf16_vpu()

    B = x_img.shape[0]
    # Cast once here: the first matmul consumes bf16 anyway -> halves input DMA.
    x = x_img.reshape(B, -1).astype(jnp.bfloat16)

    f_in_pad = kernel_params[0].shape[0]
    out_pad = kernel_params[-2].shape[1]
    n_layers = len(kernel_params) // 2

    if x.shape[1] != f_in_pad:
        x = jnp.pad(x, ((0, 0), (0, f_in_pad - x.shape[1])))

    tm = _pick_batch_tile(B, batch_tile)
    b_pad = _round_up(B, tm)
    if b_pad != B:
        x = jnp.pad(x, ((0, b_pad - B), (0, 0)))

    def _call(single_buffer_weights):
        in_specs = [pl.BlockSpec((tm, f_in_pad), lambda i: (i, 0))]
        for l in range(n_layers):
            w = kernel_params[2 * l]
            b = kernel_params[2 * l + 1]
            # constant index_map -> weights/biases stay VMEM-resident across
            # batch tiles; single-buffered since they never change.
            kw = {}
            if single_buffer_weights:
                kw = dict(pipeline_mode=pl.Buffered(1))
            in_specs.append(pl.BlockSpec(w.shape, lambda i: (0, 0), **kw))
            in_specs.append(pl.BlockSpec(b.shape, lambda i: (0, 0), **kw))
        out_specs = pl.BlockSpec((tm, out_pad), lambda i: (i, 0))

        return pl.pallas_call(
            functools.partial(_mlp_kernel, n_layers, bf16_acts),
            out_shape=jax.ShapeDtypeStruct((b_pad, out_pad), jnp.float32),
            grid=(b_pad // tm,),
            in_specs=in_specs,
            out_specs=out_specs,
            compiler_params=pltpu.CompilerParams(
                dimension_semantics=("parallel",),
                vmem_limit_bytes=32 << 20,
            ),
        )(x, *kernel_params)

    try:
        out = _call(True)
    except Exception:
        # Fallback if this JAX build rejects pl.Buffered(1) on these specs.
        out = _call(False)
    return out[:B, :output_size]


# --------------------------------------------------------------------------- #
# References
# --------------------------------------------------------------------------- #
def reference_forward(x_img, blocks, final):
    """True module semantics: f32, unfolded Linear -> LeakyReLU -> BN(eval)."""
    h = x_img.reshape(x_img.shape[0], -1).astype(jnp.float32)
    for (w, b, gamma, beta, r_mean, r_var) in blocks:
        z = h @ w + b
        z = jnp.where(z >= 0, z, NEG_SLOPE * z)
        h = (z - r_mean) / jnp.sqrt(r_var + BN_EPS) * gamma + beta
    w_out, b_out = final
    logits = h @ w_out + b_out
    return jax.nn.log_softmax(logits, axis=-1)


def folded_reference_forward(x_img, kernel_params, output_size, bf16_acts):
    """Same math path as the kernel (folded BN, padded, bf16 weights/acts)."""
    h = x_img.reshape(x_img.shape[0], -1).astype(jnp.bfloat16)
    f_in_pad = kernel_params[0].shape[0]
    if h.shape[1] != f_in_pad:
        h = jnp.pad(h, ((0, 0), (0, f_in_pad - h.shape[1])))
    n_layers = len(kernel_params) // 2
    logits = None
    for l in range(n_layers):
        w = kernel_params[2 * l]
        b = kernel_params[2 * l + 1]
        z = jnp.dot(h, w, preferred_element_type=jnp.float32) + b
        if l < n_layers - 1:
            if bf16_acts:
                zb = z.astype(jnp.bfloat16)
                h = jnp.where(zb >= 0, zb, NEG_SLOPE * zb)
            else:
                zf = jnp.where(z >= 0, z, NEG_SLOPE * z)
                h = zf.astype(jnp.bfloat16)
        else:
            logits = z
    return jax.nn.log_softmax(logits, axis=-1)[:, :output_size]


# --------------------------------------------------------------------------- #
# Demo / self-test
# --------------------------------------------------------------------------- #
if __name__ == "__main__":
    # Small, module-consistent shapes: batch=8, image (4, 16, 16) -> 1024 features.
    B, C, H, W = 8, 4, 16, 16
    input_size = C * H * W
    output_size = 10
    hidden_sizes = [500, 400, 300, 200, 100]

    key = jax.random.PRNGKey(0)
    k_x, k_p = jax.random.split(key)
    x_img = jax.random.normal(k_x, (B, C, H, W), jnp.float32)

    blocks, final = init_raw_params(k_p, input_size, output_size, hidden_sizes)
    kernel_params = fold_and_pad(blocks, final)
    bf16_acts = _supports_bf16_vpu()

    out = jax.block_until_ready(
        image_classifier_forward(x_img, kernel_params, output_size,
                                 bf16_acts=bf16_acts))
    assert out.shape == (B, output_size)

    # Tight check: kernel math vs identical folded/bf16 math in plain JAX.
    ref_folded = jax.block_until_ready(
        folded_reference_forward(x_img, kernel_params, output_size, bf16_acts))
    assert bool(jnp.allclose(out, ref_folded, rtol=1e-3, atol=1e-3)), \
        "mismatch vs folded reference"

    # Semantic check: true f32 unfolded module (loose tol covers bf16 weights
    # and bf16 inter-layer activations).
    ref_true = jax.block_until_ready(reference_forward(x_img, blocks, final))
    assert bool(jnp.allclose(out, ref_true, rtol=1e-1, atol=1e-1)), \
        "mismatch vs module reference"

    # log-softmax rows should sum (in prob space) to 1
    assert bool(jnp.allclose(jnp.sum(jnp.exp(out), axis=-1), 1.0, atol=1e-3))

    print("KERNEL_OK")
</pallas_src>

<mosaic_0001>
module attributes {stable_mosaic.version = 11 : i64} {
  func.func @_mlp_kernel(%arg0: i32, %arg1: memref<8x1024xbf16, #tpu.memory_space<vmem>>, %arg2: memref<1024x512xbf16, #tpu.memory_space<vmem>>, %arg3: memref<1x512xf32, #tpu.memory_space<vmem>>, %arg4: memref<512x512xbf16, #tpu.memory_space<vmem>>, %arg5: memref<1x512xf32, #tpu.memory_space<vmem>>, %arg6: memref<512x384xbf16, #tpu.memory_space<vmem>>, %arg7: memref<1x384xf32, #tpu.memory_space<vmem>>, %arg8: memref<384x256xbf16, #tpu.memory_space<vmem>>, %arg9: memref<1x256xf32, #tpu.memory_space<vmem>>, %arg10: memref<256x128xbf16, #tpu.memory_space<vmem>>, %arg11: memref<1x128xf32, #tpu.memory_space<vmem>>, %arg12: memref<128x128xbf16, #tpu.memory_space<vmem>>, %arg13: memref<1x128xf32, #tpu.memory_space<vmem>>, %arg14: memref<8x128xf32, #tpu.memory_space<vmem>>) attributes {dimension_semantics = [#tpu.dimension_semantics<parallel>], iteration_bounds = array<i64: 1>, scalar_prefetch = 0 : i64, scratch_operands = 0 : i64, tpu.core_type = #tpu.core_type<tc>, window_params = [{transform_indices = @transform_0, window_bounds = array<i64: 8, 1024>}, {pipeline_mode = #tpu.pipeline_mode<synchronous>, transform_indices = @transform_1, window_bounds = array<i64: 1024, 512>}, {pipeline_mode = #tpu.pipeline_mode<synchronous>, transform_indices = @transform_2, window_bounds = array<i64: 1, 512>}, {pipeline_mode = #tpu.pipeline_mode<synchronous>, transform_indices = @transform_3, window_bounds = array<i64: 512, 512>}, {pipeline_mode = #tpu.pipeline_mode<synchronous>, transform_indices = @transform_4, window_bounds = array<i64: 1, 512>}, {pipeline_mode = #tpu.pipeline_mode<synchronous>, transform_indices = @transform_5, window_bounds = array<i64: 512, 384>}, {pipeline_mode = #tpu.pipeline_mode<synchronous>, transform_indices = @transform_6, window_bounds = array<i64: 1, 384>}, {pipeline_mode = #tpu.pipeline_mode<synchronous>, transform_indices = @transform_7, window_bounds = array<i64: 384, 256>}, {pipeline_mode = #tpu.pipeline_mode<synchronous>, transform_indices = @transform_8, window_bounds = array<i64: 1, 256>}, {pipeline_mode = #tpu.pipeline_mode<synchronous>, transform_indices = @transform_9, window_bounds = array<i64: 256, 128>}, {pipeline_mode = #tpu.pipeline_mode<synchronous>, transform_indices = @transform_10, window_bounds = array<i64: 1, 128>}, {pipeline_mode = #tpu.pipeline_mode<synchronous>, transform_indices = @transform_11, window_bounds = array<i64: 128, 128>}, {pipeline_mode = #tpu.pipeline_mode<synchronous>, transform_indices = @transform_12, window_bounds = array<i64: 1, 128>}, {transform_indices = @transform_13, window_bounds = array<i64: 8, 128>}]} {
    %c0 = arith.constant 0 : index
    %c0_0 = arith.constant 0 : index
    %0 = vector.load %arg1[%c0, %c0_0] : memref<8x1024xbf16, #tpu.memory_space<vmem>>, vector<8x1024xbf16>
    %c0_1 = arith.constant 0 : index
    %c0_2 = arith.constant 0 : index
    %1 = vector.load %arg2[%c0_1, %c0_2] : memref<1024x512xbf16, #tpu.memory_space<vmem>>, vector<1024x512xbf16>
    %c0_3 = arith.constant 0 : index
    %c0_4 = arith.constant 0 : index
    %2 = vector.load %arg3[%c0_3, %c0_4] : memref<1x512xf32, #tpu.memory_space<vmem>>, vector<1x512xf32>
    %cst = arith.constant dense<0.000000e+00> : vector<8x512xf32>
    %3 = tpu.matmul %0, %1, %cst {dimension_numbers = #tpu.dot_dimension_numbers<[1], [0], [0], [1], [0, 0, 1, 1], [], []>} : vector<8x1024xbf16>, vector<1024x512xbf16>, vector<8x512xf32> -> vector<8x512xf32>
    %4 = vector.broadcast %2 : vector<1x512xf32> to vector<8x512xf32>
    %5 = arith.addf %3, %4 : vector<8x512xf32>
    %6 = arith.truncf %5 : vector<8x512xf32> to vector<8x512xbf16>
    %cst_5 = arith.constant 0.000000e+00 : bf16
    %7 = vector.broadcast %cst_5 : bf16 to vector<8x512xbf16>
    %8 = arith.cmpf oge, %6, %7 : vector<8x512xbf16>
    %cst_6 = arith.constant 1.000980e-02 : bf16
    %9 = vector.broadcast %cst_6 : bf16 to vector<8x512xbf16>
    %10 = arith.mulf %9, %6 : vector<8x512xbf16>
    %11 = arith.select %8, %6, %10 : vector<8x512xi1>, vector<8x512xbf16>
    %c0_7 = arith.constant 0 : index
    %c0_8 = arith.constant 0 : index
    %12 = vector.load %arg4[%c0_7, %c0_8] : memref<512x512xbf16, #tpu.memory_space<vmem>>, vector<512x512xbf16>
    %c0_9 = arith.constant 0 : index
    %c0_10 = arith.constant 0 : index
    %13 = vector.load %arg5[%c0_9, %c0_10] : memref<1x512xf32, #tpu.memory_space<vmem>>, vector<1x512xf32>
    %cst_11 = arith.constant dense<0.000000e+00> : vector<8x512xf32>
    %14 = tpu.matmul %11, %12, %cst_11 {dimension_numbers = #tpu.dot_dimension_numbers<[1], [0], [0], [1], [0, 0, 1, 1], [], []>} : vector<8x512xbf16>, vector<512x512xbf16>, vector<8x512xf32> -> vector<8x512xf32>
    %15 = vector.broadcast %13 : vector<1x512xf32> to vector<8x512xf32>
    %16 = arith.addf %14, %15 : vector<8x512xf32>
    %17 = arith.truncf %16 : vector<8x512xf32> to vector<8x512xbf16>
    %cst_12 = arith.constant 0.000000e+00 : bf16
    %18 = vector.broadcast %cst_12 : bf16 to vector<8x512xbf16>
    %19 = arith.cmpf oge, %17, %18 : vector<8x512xbf16>
    %cst_13 = arith.constant 1.000980e-02 : bf16
    %20 = vector.broadcast %cst_13 : bf16 to vector<8x512xbf16>
    %21 = arith.mulf %20, %17 : vector<8x512xbf16>
    %22 = arith.select %19, %17, %21 : vector<8x512xi1>, vector<8x512xbf16>
    %c0_14 = arith.constant 0 : index
    %c0_15 = arith.constant 0 : index
    %23 = vector.load %arg6[%c0_14, %c0_15] : memref<512x384xbf16, #tpu.memory_space<vmem>>, vector<512x384xbf16>
    %c0_16 = arith.constant 0 : index
    %c0_17 = arith.constant 0 : index
    %24 = vector.load %arg7[%c0_16, %c0_17] : memref<1x384xf32, #tpu.memory_space<vmem>>, vector<1x384xf32>
    %cst_18 = arith.constant dense<0.000000e+00> : vector<8x384xf32>
    %25 = tpu.matmul %22, %23, %cst_18 {dimension_numbers = #tpu.dot_dimension_numbers<[1], [0], [0], [1], [0, 0, 1, 1], [], []>} : vector<8x512xbf16>, vector<512x384xbf16>, vector<8x384xf32> -> vector<8x384xf32>
    %26 = vector.broadcast %24 : vector<1x384xf32> to vector<8x384xf32>
    %27 = arith.addf %25, %26 : vector<8x384xf32>
    %28 = arith.truncf %27 : vector<8x384xf32> to vector<8x384xbf16>
    %cst_19 = arith.constant 0.000000e+00 : bf16
    %29 = vector.broadcast %cst_19 : bf16 to vector<8x384xbf16>
    %30 = arith.cmpf oge, %28, %29 : vector<8x384xbf16>
    %cst_20 = arith.constant 1.000980e-02 : bf16
    %31 = vector.broadcast %cst_20 : bf16 to vector<8x384xbf16>
    %32 = arith.mulf %31, %28 : vector<8x384xbf16>
    %33 = arith.select %30, %28, %32 : vector<8x384xi1>, vector<8x384xbf16>
    %c0_21 = arith.constant 0 : index
    %c0_22 = arith.constant 0 : index
    %34 = vector.load %arg8[%c0_21, %c0_22] : memref<384x256xbf16, #tpu.memory_space<vmem>>, vector<384x256xbf16>
    %c0_23 = arith.constant 0 : index
    %c0_24 = arith.constant 0 : index
    %35 = vector.load %arg9[%c0_23, %c0_24] : memref<1x256xf32, #tpu.memory_space<vmem>>, vector<1x256xf32>
    %cst_25 = arith.constant dense<0.000000e+00> : vector<8x256xf32>
    %36 = tpu.matmul %33, %34, %cst_25 {dimension_numbers = #tpu.dot_dimension_numbers<[1], [0], [0], [1], [0, 0, 1, 1], [], []>} : vector<8x384xbf16>, vector<384x256xbf16>, vector<8x256xf32> -> vector<8x256xf32>
    %37 = vector.broadcast %35 : vector<1x256xf32> to vector<8x256xf32>
    %38 = arith.addf %36, %37 : vector<8x256xf32>
    %39 = arith.truncf %38 : vector<8x256xf32> to vector<8x256xbf16>
    %cst_26 = arith.constant 0.000000e+00 : bf16
    %40 = vector.broadcast %cst_26 : bf16 to vector<8x256xbf16>
    %41 = arith.cmpf oge, %39, %40 : vector<8x256xbf16>
    %cst_27 = arith.constant 1.000980e-02 : bf16
    %42 = vector.broadcast %cst_27 : bf16 to vector<8x256xbf16>
    %43 = arith.mulf %42, %39 : vector<8x256xbf16>
    %44 = arith.select %41, %39, %43 : vector<8x256xi1>, vector<8x256xbf16>
    %c0_28 = arith.constant 0 : index
    %c0_29 = arith.constant 0 : index
    %45 = vector.load %arg10[%c0_28, %c0_29] : memref<256x128xbf16, #tpu.memory_space<vmem>>, vector<256x128xbf16>
    %c0_30 = arith.constant 0 : index
    %c0_31 = arith.constant 0 : index
    %46 = vector.load %arg11[%c0_30, %c0_31] : memref<1x128xf32, #tpu.memory_space<vmem>>, vector<1x128xf32>
    %cst_32 = arith.constant dense<0.000000e+00> : vector<8x128xf32>
    %47 = tpu.matmul %44, %45, %cst_32 {dimension_numbers = #tpu.dot_dimension_numbers<[1], [0], [0], [1], [0, 0, 1, 1], [], []>} : vector<8x256xbf16>, vector<256x128xbf16>, vector<8x128xf32> -> vector<8x128xf32>
    %48 = vector.broadcast %46 : vector<1x128xf32> to vector<8x128xf32>
    %49 = arith.addf %47, %48 : vector<8x128xf32>
    %50 = arith.truncf %49 : vector<8x128xf32> to vector<8x128xbf16>
    %cst_33 = arith.constant 0.000000e+00 : bf16
    %51 = vector.broadcast %cst_33 : bf16 to vector<8x128xbf16>
    %52 = arith.cmpf oge, %50, %51 : vector<8x128xbf16>
    %cst_34 = arith.constant 1.000980e-02 : bf16
    %53 = vector.broadcast %cst_34 : bf16 to vector<8x128xbf16>
    %54 = arith.mulf %53, %50 : vector<8x128xbf16>
    %55 = arith.select %52, %50, %54 : vector<8x128xi1>, vector<8x128xbf16>
    %c0_35 = arith.constant 0 : index
    %c0_36 = arith.constant 0 : index
    %56 = vector.load %arg12[%c0_35, %c0_36] : memref<128x128xbf16, #tpu.memory_space<vmem>>, vector<128x128xbf16>
    %c0_37 = arith.constant 0 : index
    %c0_38 = arith.constant 0 : index
    %57 = vector.load %arg13[%c0_37, %c0_38] : memref<1x128xf32, #tpu.memory_space<vmem>>, vector<1x128xf32>
    %cst_39 = arith.constant dense<0.000000e+00> : vector<8x128xf32>
    %58 = tpu.matmul %55, %56, %cst_39 {dimension_numbers = #tpu.dot_dimension_numbers<[1], [0], [0], [1], [0, 0, 1, 1], [], []>} : vector<8x128xbf16>, vector<128x128xbf16>, vector<8x128xf32> -> vector<8x128xf32>
    %59 = vector.broadcast %57 : vector<1x128xf32> to vector<8x128xf32>
    %60 = arith.addf %58, %59 : vector<8x128xf32>
    %cst_40 = arith.constant dense<0xFF800000> : vector<8xf32>
    %61 = vector.multi_reduction <maximumf>, %60, %cst_40 [1] : vector<8x128xf32> to vector<8xf32>
    %62 = vector.shape_cast %61 : vector<8xf32> to vector<8x1xf32>
    %63 = vector.broadcast %62 : vector<8x1xf32> to vector<8x128xf32>
    %64 = arith.subf %60, %63 : vector<8x128xf32>
    %65 = math.exp %64 : vector<8x128xf32>
    %cst_41 = arith.constant dense<0.000000e+00> : vector<8xf32>
    %66 = vector.multi_reduction <add>, %65, %cst_41 [1] : vector<8x128xf32> to vector<8xf32>
    %67 = vector.shape_cast %66 : vector<8xf32> to vector<8x1xf32>
    %68 = math.log %67 : vector<8x1xf32>
    %69 = arith.addf %62, %68 : vector<8x1xf32>
    %70 = vector.broadcast %69 : vector<8x1xf32> to vector<8x128xf32>
    %71 = arith.subf %60, %70 : vector<8x128xf32>
    %c0_42 = arith.constant 0 : index
    %c0_43 = arith.constant 0 : index
    %72 = vector.load %arg14[%c0_42, %c0_43] : memref<8x128xf32, #tpu.memory_space<vmem>>, vector<8x128xf32>
    tpu.vector_store %arg14[%c0_42, %c0_43], %71 {strides = array<i32>} : memref<8x128xf32, #tpu.memory_space<vmem>>, vector<8x128xf32>,
    return
  }
  func.func @transform_0(%arg0: i32) -> (i32, i32) {
    %c0_i32 = arith.constant 0 : i32
    %c0_i32_0 = arith.constant 0 : i32
    return %arg0, %c0_i32 : i32, i32
  }
  func.func @transform_1(%arg0: i32) -> (i32, i32) {
    %c0_i32 = arith.constant 0 : i32
    %c0_i32_0 = arith.constant 0 : i32
    %c0_i32_1 = arith.constant 0 : i32
    return %c0_i32, %c0_i32_0 : i32, i32
  }
  func.func @transform_2(%arg0: i32) -> (i32, i32) {
    %c0_i32 = arith.constant 0 : i32
    %c0_i32_0 = arith.constant 0 : i32
    %c0_i32_1 = arith.constant 0 : i32
    return %c0_i32, %c0_i32_0 : i32, i32
  }
  func.func @transform_3(%arg0: i32) -> (i32, i32) {
    %c0_i32 = arith.constant 0 : i32
    %c0_i32_0 = arith.constant 0 : i32
    %c0_i32_1 = arith.constant 0 : i32
    return %c0_i32, %c0_i32_0 : i32, i32
  }
  func.func @transform_4(%arg0: i32) -> (i32, i32) {
    %c0_i32 = arith.constant 0 : i32
    %c0_i32_0 = arith.constant 0 : i32
    %c0_i32_1 = arith.constant 0 : i32
    return %c0_i32, %c0_i32_0 : i32, i32
  }
  func.func @transform_5(%arg0: i32) -> (i32, i32) {
    %c0_i32 = arith.constant 0 : i32
    %c0_i32_0 = arith.constant 0 : i32
    %c0_i32_1 = arith.constant 0 : i32
    return %c0_i32, %c0_i32_0 : i32, i32
  }
  func.func @transform_6(%arg0: i32) -> (i32, i32) {
    %c0_i32 = arith.constant 0 : i32
    %c0_i32_0 = arith.constant 0 : i32
    %c0_i32_1 = arith.constant 0 : i32
    return %c0_i32, %c0_i32_0 : i32, i32
  }
  func.func @transform_7(%arg0: i32) -> (i32, i32) {
    %c0_i32 = arith.constant 0 : i32
    %c0_i32_0 = arith.constant 0 : i32
    %c0_i32_1 = arith.constant 0 : i32
    return %c0_i32, %c0_i32_0 : i32, i32
  }
  func.func @transform_8(%arg0: i32) -> (i32, i32) {
    %c0_i32 = arith.constant 0 : i32
    %c0_i32_0 = arith.constant 0 : i32
    %c0_i32_1 = arith.constant 0 : i32
    return %c0_i32, %c0_i32_0 : i32, i32
  }
  func.func @transform_9(%arg0: i32) -> (i32, i32) {
    %c0_i32 = arith.constant 0 : i32
    %c0_i32_0 = arith.constant 0 : i32
    %c0_i32_1 = arith.constant 0 : i32
    return %c0_i32, %c0_i32_0 : i32, i32
  }
  func.func @transform_10(%arg0: i32) -> (i32, i32) {
    %c0_i32 = arith.constant 0 : i32
    %c0_i32_0 = arith.constant 0 : i32
    %c0_i32_1 = arith.constant 0 : i32
    return %c0_i32, %c0_i32_0 : i32, i32
  }
  func.func @transform_11(%arg0: i32) -> (i32, i32) {
    %c0_i32 = arith.constant 0 : i32
    %c0_i32_0 = arith.constant 0 : i32
    %c0_i32_1 = arith.constant 0 : i32
    return %c0_i32, %c0_i32_0 : i32, i32
  }
  func.func @transform_12(%arg0: i32) -> (i32, i32) {
    %c0_i32 = arith.constant 0 : i32
    %c0_i32_0 = arith.constant 0 : i32
    %c0_i32_1 = arith.constant 0 : i32
    return %c0_i32, %c0_i32_0 : i32, i32
  }
  func.func @transform_13(%arg0: i32) -> (i32, i32) {
    %c0_i32 = arith.constant 0 : i32
    %c0_i32_0 = arith.constant 0 : i32
    return %arg0, %c0_i32 : i32, i32
  }
}

module attributes {stable_mosaic.version = 11 : i64} {
  func.func @_mlp_kernel(%arg0: i32, %arg1: memref<8x1024xbf16, #tpu.memory_space<vmem>>, %arg2: memref<1024x512xbf16, #tpu.memory_space<vmem>>, %arg3: memref<1x512xf32, #tpu.memory_space<vmem>>, %arg4: memref<512x512xbf16, #tpu.memory_space<vmem>>, %arg5: memref<1x512xf32, #tpu.memory_space<vmem>>, %arg6: memref<512x384xbf16, #tpu.memory_space<vmem>>, %arg7: memref<1x384xf32, #tpu.memory_space<vmem>>, %arg8: memref<384x256xbf16, #tpu.memory_space<vmem>>, %arg9: memref<1x256xf32, #tpu.memory_space<vmem>>, %arg10: memref<256x128xbf16, #tpu.memory_space<vmem>>, %arg11: memref<1x128xf32, #tpu.memory_space<vmem>>, %arg12: memref<128x128xbf16, #tpu.memory_space<vmem>>, %arg13: memref<1x128xf32, #tpu.memory_space<vmem>>, %arg14: memref<8x128xf32, #tpu.memory_space<vmem>>) attributes {dimension_semantics = [#tpu.dimension_semantics<parallel>], iteration_bounds = array<i64: 1>, scalar_prefetch = 0 : i64, scratch_operands = 0 : i64, tpu.core_type = #tpu.core_type<tc>, window_params = [{transform_indices = @transform_0, window_bounds = array<i64: 8, 1024>}, {pipeline_mode = #tpu.pipeline_mode<synchronous>, transform_indices = @transform_1, window_bounds = array<i64: 1024, 512>}, {pipeline_mode = #tpu.pipeline_mode<synchronous>, transform_indices = @transform_2, window_bounds = array<i64: 1, 512>}, {pipeline_mode = #tpu.pipeline_mode<synchronous>, transform_indices = @transform_3, window_bounds = array<i64: 512, 512>}, {pipeline_mode = #tpu.pipeline_mode<synchronous>, transform_indices = @transform_4, window_bounds = array<i64: 1, 512>}, {pipeline_mode = #tpu.pipeline_mode<synchronous>, transform_indices = @transform_5, window_bounds = array<i64: 512, 384>}, {pipeline_mode = #tpu.pipeline_mode<synchronous>, transform_indices = @transform_6, window_bounds = array<i64: 1, 384>}, {pipeline_mode = #tpu.pipeline_mode<synchronous>, transform_indices = @transform_7, window_bounds = array<i64: 384, 256>}, {pipeline_mode = #tpu.pipeline_mode<synchronous>, transform_indices = @transform_8, window_bounds = array<i64: 1, 256>}, {pipeline_mode = #tpu.pipeline_mode<synchronous>, transform_indices = @transform_9, window_bounds = array<i64: 256, 128>}, {pipeline_mode = #tpu.pipeline_mode<synchronous>, transform_indices = @transform_10, window_bounds = array<i64: 1, 128>}, {pipeline_mode = #tpu.pipeline_mode<synchronous>, transform_indices = @transform_11, window_bounds = array<i64: 128, 128>}, {pipeline_mode = #tpu.pipeline_mode<synchronous>, transform_indices = @transform_12, window_bounds = array<i64: 1, 128>}, {transform_indices = @transform_13, window_bounds = array<i64: 8, 128>}]} {
    %c0 = arith.constant 0 : index
    %c0_0 = arith.constant 0 : index
    %0 = vector.load %arg1[%c0, %c0_0] : memref<8x1024xbf16, #tpu.memory_space<vmem>>, vector<8x1024xbf16>
    %c0_1 = arith.constant 0 : index
    %c0_2 = arith.constant 0 : index
    %1 = vector.load %arg2[%c0_1, %c0_2] : memref<1024x512xbf16, #tpu.memory_space<vmem>>, vector<1024x512xbf16>
    %c0_3 = arith.constant 0 : index
    %c0_4 = arith.constant 0 : index
    %2 = vector.load %arg3[%c0_3, %c0_4] : memref<1x512xf32, #tpu.memory_space<vmem>>, vector<1x512xf32>
    %cst = arith.constant dense<0.000000e+00> : vector<8x512xf32>
    %3 = tpu.matmul %0, %1, %cst {dimension_numbers = #tpu.dot_dimension_numbers<[1], [0], [0], [1], [0, 0, 1, 1], [], []>} : vector<8x1024xbf16>, vector<1024x512xbf16>, vector<8x512xf32> -> vector<8x512xf32>
    %4 = vector.broadcast %2 : vector<1x512xf32> to vector<8x512xf32>
    %5 = arith.addf %3, %4 : vector<8x512xf32>
    %6 = arith.truncf %5 : vector<8x512xf32> to vector<8x512xbf16>
    %cst_5 = arith.constant 0.000000e+00 : bf16
    %7 = vector.broadcast %cst_5 : bf16 to vector<8x512xbf16>
    %8 = arith.cmpf oge, %6, %7 : vector<8x512xbf16>
    %cst_6 = arith.constant 1.000980e-02 : bf16
    %9 = vector.broadcast %cst_6 : bf16 to vector<8x512xbf16>
    %10 = arith.mulf %9, %6 : vector<8x512xbf16>
    %11 = arith.select %8, %6, %10 : vector<8x512xi1>, vector<8x512xbf16>
    %c0_7 = arith.constant 0 : index
    %c0_8 = arith.constant 0 : index
    %12 = vector.load %arg4[%c0_7, %c0_8] : memref<512x512xbf16, #tpu.memory_space<vmem>>, vector<512x512xbf16>
    %c0_9 = arith.constant 0 : index
    %c0_10 = arith.constant 0 : index
    %13 = vector.load %arg5[%c0_9, %c0_10] : memref<1x512xf32, #tpu.memory_space<vmem>>, vector<1x512xf32>
    %cst_11 = arith.constant dense<0.000000e+00> : vector<8x512xf32>
    %14 = tpu.matmul %11, %12, %cst_11 {dimension_numbers = #tpu.dot_dimension_numbers<[1], [0], [0], [1], [0, 0, 1, 1], [], []>} : vector<8x512xbf16>, vector<512x512xbf16>, vector<8x512xf32> -> vector<8x512xf32>
    %15 = vector.broadcast %13 : vector<1x512xf32> to vector<8x512xf32>
    %16 = arith.addf %14, %15 : vector<8x512xf32>
    %17 = arith.truncf %16 : vector<8x512xf32> to vector<8x512xbf16>
    %cst_12 = arith.constant 0.000000e+00 : bf16
    %18 = vector.broadcast %cst_12 : bf16 to vector<8x512xbf16>
    %19 = arith.cmpf oge, %17, %18 : vector<8x512xbf16>
    %cst_13 = arith.constant 1.000980e-02 : bf16
    %20 = vector.broadcast %cst_13 : bf16 to vector<8x512xbf16>
    %21 = arith.mulf %20, %17 : vector<8x512xbf16>
    %22 = arith.select %19, %17, %21 : vector<8x512xi1>, vector<8x512xbf16>
    %c0_14 = arith.constant 0 : index
    %c0_15 = arith.constant 0 : index
    %23 = vector.load %arg6[%c0_14, %c0_15] : memref<512x384xbf16, #tpu.memory_space<vmem>>, vector<512x384xbf16>
    %c0_16 = arith.constant 0 : index
    %c0_17 = arith.constant 0 : index
    %24 = vector.load %arg7[%c0_16, %c0_17] : memref<1x384xf32, #tpu.memory_space<vmem>>, vector<1x384xf32>
    %cst_18 = arith.constant dense<0.000000e+00> : vector<8x384xf32>
    %25 = tpu.matmul %22, %23, %cst_18 {dimension_numbers = #tpu.dot_dimension_numbers<[1], [0], [0], [1], [0, 0, 1, 1], [], []>} : vector<8x512xbf16>, vector<512x384xbf16>, vector<8x384xf32> -> vector<8x384xf32>
    %26 = vector.broadcast %24 : vector<1x384xf32> to vector<8x384xf32>
    %27 = arith.addf %25, %26 : vector<8x384xf32>
    %28 = arith.truncf %27 : vector<8x384xf32> to vector<8x384xbf16>
    %cst_19 = arith.constant 0.000000e+00 : bf16
    %29 = vector.broadcast %cst_19 : bf16 to vector<8x384xbf16>
    %30 = arith.cmpf oge, %28, %29 : vector<8x384xbf16>
    %cst_20 = arith.constant 1.000980e-02 : bf16
    %31 = vector.broadcast %cst_20 : bf16 to vector<8x384xbf16>
    %32 = arith.mulf %31, %28 : vector<8x384xbf16>
    %33 = arith.select %30, %28, %32 : vector<8x384xi1>, vector<8x384xbf16>
    %c0_21 = arith.constant 0 : index
    %c0_22 = arith.constant 0 : index
    %34 = vector.load %arg8[%c0_21, %c0_22] : memref<384x256xbf16, #tpu.memory_space<vmem>>, vector<384x256xbf16>
    %c0_23 = arith.constant 0 : index
    %c0_24 = arith.constant 0 : index
    %35 = vector.load %arg9[%c0_23, %c0_24] : memref<1x256xf32, #tpu.memory_space<vmem>>, vector<1x256xf32>
    %cst_25 = arith.constant dense<0.000000e+00> : vector<8x256xf32>
    %36 = tpu.matmul %33, %34, %cst_25 {dimension_numbers = #tpu.dot_dimension_numbers<[1], [0], [0], [1], [0, 0, 1, 1], [], []>} : vector<8x384xbf16>, vector<384x256xbf16>, vector<8x256xf32> -> vector<8x256xf32>
    %37 = vector.broadcast %35 : vector<1x256xf32> to vector<8x256xf32>
    %38 = arith.addf %36, %37 : vector<8x256xf32>
    %39 = arith.truncf %38 : vector<8x256xf32> to vector<8x256xbf16>
    %cst_26 = arith.constant 0.000000e+00 : bf16
    %40 = vector.broadcast %cst_26 : bf16 to vector<8x256xbf16>
    %41 = arith.cmpf oge, %39, %40 : vector<8x256xbf16>
    %cst_27 = arith.constant 1.000980e-02 : bf16
    %42 = vector.broadcast %cst_27 : bf16 to vector<8x256xbf16>
    %43 = arith.mulf %42, %39 : vector<8x256xbf16>
    %44 = arith.select %41, %39, %43 : vector<8x256xi1>, vector<8x256xbf16>
    %c0_28 = arith.constant 0 : index
    %c0_29 = arith.constant 0 : index
    %45 = vector.load %arg10[%c0_28, %c0_29] : memref<256x128xbf16, #tpu.memory_space<vmem>>, vector<256x128xbf16>
    %c0_30 = arith.constant 0 : index
    %c0_31 = arith.constant 0 : index
    %46 = vector.load %arg11[%c0_30, %c0_31] : memref<1x128xf32, #tpu.memory_space<vmem>>, vector<1x128xf32>
    %cst_32 = arith.constant dense<0.000000e+00> : vector<8x128xf32>
    %47 = tpu.matmul %44, %45, %cst_32 {dimension_numbers = #tpu.dot_dimension_numbers<[1], [0], [0], [1], [0, 0, 1, 1], [], []>} : vector<8x256xbf16>, vector<256x128xbf16>, vector<8x128xf32> -> vector<8x128xf32>
    %48 = vector.broadcast %46 : vector<1x128xf32> to vector<8x128xf32>
    %49 = arith.addf %47, %48 : vector<8x128xf32>
    %50 = arith.truncf %49 : vector<8x128xf32> to vector<8x128xbf16>
    %cst_33 = arith.constant 0.000000e+00 : bf16
    %51 = vector.broadcast %cst_33 : bf16 to vector<8x128xbf16>
    %52 = arith.cmpf oge, %50, %51 : vector<8x128xbf16>
    %cst_34 = arith.constant 1.000980e-02 : bf16
    %53 = vector.broadcast %cst_34 : bf16 to vector<8x128xbf16>
    %54 = arith.mulf %53, %50 : vector<8x128xbf16>
    %55 = arith.select %52, %50, %54 : vector<8x128xi1>, vector<8x128xbf16>
    %c0_35 = arith.constant 0 : index
    %c0_36 = arith.constant 0 : index
    %56 = vector.load %arg12[%c0_35, %c0_36] : memref<128x128xbf16, #tpu.memory_space<vmem>>, vector<128x128xbf16>
    %c0_37 = arith.constant 0 : index
    %c0_38 = arith.constant 0 : index
    %57 = vector.load %arg13[%c0_37, %c0_38] : memref<1x128xf32, #tpu.memory_space<vmem>>, vector<1x128xf32>
    %cst_39 = arith.constant dense<0.000000e+00> : vector<8x128xf32>
    %58 = tpu.matmul %55, %56, %cst_39 {dimension_numbers = #tpu.dot_dimension_numbers<[1], [0], [0], [1], [0, 0, 1, 1], [], []>} : vector<8x128xbf16>, vector<128x128xbf16>, vector<8x128xf32> -> vector<8x128xf32>
    %59 = vector.broadcast %57 : vector<1x128xf32> to vector<8x128xf32>
    %60 = arith.addf %58, %59 : vector<8x128xf32>
    %cst_40 = arith.constant dense<0xFF800000> : vector<8xf32>
    %61 = vector.multi_reduction <maximumf>, %60, %cst_40 [1] : vector<8x128xf32> to vector<8xf32>
    %62 = vector.shape_cast %61 : vector<8xf32> to vector<8x1xf32>
    %63 = vector.broadcast %62 : vector<8x1xf32> to vector<8x128xf32>
    %64 = arith.subf %60, %63 : vector<8x128xf32>
    %65 = math.exp %64 : vector<8x128xf32>
    %cst_41 = arith.constant dense<0.000000e+00> : vector<8xf32>
    %66 = vector.multi_reduction <add>, %65, %cst_41 [1] : vector<8x128xf32> to vector<8xf32>
    %67 = vector.shape_cast %66 : vector<8xf32> to vector<8x1xf32>
    %68 = math.log %67 : vector<8x1xf32>
    %69 = arith.addf %62, %68 : vector<8x1xf32>
    %70 = vector.broadcast %69 : vector<8x1xf32> to vector<8x128xf32>
    %71 = arith.subf %60, %70 : vector<8x128xf32>
    %c0_42 = arith.constant 0 : index
    %c0_43 = arith.constant 0 : index
    %72 = vector.load %arg14[%c0_42, %c0_43] : memref<8x128xf32, #tpu.memory_space<vmem>>, vector<8x128xf32>
    tpu.vector_store %arg14[%c0_42, %c0_43], %71 {strides = array<i32>} : memref<8x128xf32, #tpu.memory_space<vmem>>, vector<8x128xf32>,
    return
  }
  func.func @transform_0(%arg0: i32) -> (i32, i32) {
    %c0_i32 = arith.constant 0 : i32
    %c0_i32_0 = arith.constant 0 : i32
    return %arg0, %c0_i32 : i32, i32
  }
  func.func @transform_1(%arg0: i32) -> (i32, i32) {
    %c0_i32 = arith.constant 0 : i32
    %c0_i32_0 = arith.constant 0 : i32
    %c0_i32_1 = arith.constant 0 : i32
    return %c0_i32, %c0_i32_0 : i32, i32
  }
  func.func @transform_2(%arg0: i32) -> (i32, i32) {
    %c0_i32 = arith.constant 0 : i32
    %c0_i32_0 = arith.constant 0 : i32
    %c0_i32_1 = arith.constant 0 : i32
    return %c0_i32, %c0_i32_0 : i32, i32
  }
  func.func @transform_3(%arg0: i32) -> (i32, i32) {
    %c0_i32 = arith.constant 0 : i32
    %c0_i32_0 = arith.constant 0 : i32
    %c0_i32_1 = arith.constant 0 : i32
    return %c0_i32, %c0_i32_0 : i32, i32
  }
  func.func @transform_4(%arg0: i32) -> (i32, i32) {
    %c0_i32 = arith.constant 0 : i32
    %c0_i32_0 = arith.constant 0 : i32
    %c0_i32_1 = arith.constant 0 : i32
    return %c0_i32, %c0_i32_0 : i32, i32
  }
  func.func @transform_5(%arg0: i32) -> (i32, i32) {
    %c0_i32 = arith.constant 0 : i32
    %c0_i32_0 = arith.constant 0 : i32
    %c0_i32_1 = arith.constant 0 : i32
    return %c0_i32, %c0_i32_0 : i32, i32
  }
  func.func @transform_6(%arg0: i32) -> (i32, i32) {
    %c0_i32 = arith.constant 0 : i32
    %c0_i32_0 = arith.constant 0 : i32
    %c0_i32_1 = arith.constant 0 : i32
    return %c0_i32, %c0_i32_0 : i32, i32
  }
  func.func @transform_7(%arg0: i32) -> (i32, i32) {
    %c0_i32 = arith.constant 0 : i32
    %c0_i32_0 = arith.constant 0 : i32
    %c0_i32_1 = arith.constant 0 : i32
    return %c0_i32, %c0_i32_0 : i32, i32
  }
  func.func @transform_8(%arg0: i32) -> (i32, i32) {
    %c0_i32 = arith.constant 0 : i32
    %c0_i32_0 = arith.constant 0 : i32
    %c0_i32_1 = arith.constant 0 : i32
    return %c0_i32, %c0_i32_0 : i32, i32
  }
  func.func @transform_9(%arg0: i32) -> (i32, i32) {
    %c0_i32 = arith.constant 0 : i32
    %c0_i32_0 = arith.constant 0 : i32
    %c0_i32_1 = arith.constant 0 : i32
    return %c0_i32, %c0_i32_0 : i32, i32
  }
  func.func @transform_10(%arg0: i32) -> (i32, i32) {
    %c0_i32 = arith.constant 0 : i32
    %c0_i32_0 = arith.constant 0 : i32
    %c0_i32_1 = arith.constant 0 : i32
    return %c0_i32, %c0_i32_0 : i32, i32
  }
  func.func @transform_11(%arg0: i32) -> (i32, i32) {
    %c0_i32 = arith.constant 0 : i32
    %c0_i32_0 = arith.constant 0 : i32
    %c0_i32_1 = arith.constant 0 : i32
    return %c0_i32, %c0_i32_0 : i32, i32
  }
  func.func @transform_12(%arg0: i32) -> (i32, i32) {
    %c0_i32 = arith.constant 0 : i32
    %c0_i32_0 = arith.constant 0 : i32
    %c0_i32_1 = arith.constant 0 : i32
    return %c0_i32, %c0_i32_0 : i32, i32
  }
  func.func @transform_13(%arg0: i32) -> (i32, i32) {
    %c0_i32 = arith.constant 0 : i32
    %c0_i32_0 = arith.constant 0 : i32
    return %arg0, %c0_i32 : i32, i32
  }
}

</mosaic_0001>

<bundles_post_ra>
// kernel: tpu_custom_call.1
= control target key start
LH: loop header
LB: loop body
LE: loop exit
PB: predicated region body
PF: predicated region fallthrough
CT: control target
= control target key end

     0   :  { %18 = vsyncpa [#allocation3], 0  ;;  %s6589_s0 = inlined_call_operand.hbm [shape: bf16[8,1024], index: 0, kind: input, shape index: {}]   ;;  %s6590_s1 = inlined_call_operand.hbm [shape: bf16[1024,512], index: 1, kind: input, shape index: {}]   ;;  %s6591_s2 = inlined_call_operand.vmem [shape: f32[1,512], index: 2, kind: input, shape index: {}]   ;;  %s6592_s3 = inlined_call_operand.hbm [shape: bf16[512,512], index: 3, kind: input, shape index: {}]   ;;  %s6593_s4 = inlined_call_operand.vmem [shape: f32[1,512], index: 4, kind: input, shape index: {}]   ;;  %s6594_s5 = inlined_call_operand.hbm [shape: bf16[512,384], index: 5, kind: input, shape index: {}]   ;;  %s6595_s6 = inlined_call_operand.vmem [shape: f32[1,384], index: 6, kind: input, shape index: {}]   ;;  %s6596_s7 = inlined_call_operand.hbm [shape: bf16[384,256], index: 7, kind: input, shape index: {}]   ;;  %s6597_s8 = inlined_call_operand.vmem [shape: f32[1,256], index: 8, kind: input, shape index: {}]   ;;  %s6598_s9 = inlined_call_operand.hbm [shape: bf16[256,128], index: 9, kind: input, shape index: {}]   ;;  %s6599_s10 = inlined_call_operand.vmem [shape: f32[1,128], index: 10, kind: input, shape index: {}]   ;;  %s6600_s11 = inlined_call_operand.hbm [shape: bf16[128,128], index: 11, kind: input, shape index: {}]   ;;  %s6601_s12 = inlined_call_operand.vmem [shape: f32[1,128], index: 12, kind: input, shape index: {}]   ;;  %s6602_s13 = inlined_call_operand.hbm [shape: f32[8,128], index: 13, kind: output, shape index: {}]  }
   0x1   :  { %19 = vsyncpa [#allocation6], 0 }
   0x2   :  { %20 = vsyncpa [#allocation9], 0 }
   0x3   :  { %21 = vsyncpa [#allocation12], 0 }
   0x4   :  { %22 = vsyncpa [#allocation4], 0  ;;  %s6311_s25 = smov [#allocation5]   ;;  %s6125_s29 = scalar_lea.hbm %s6590_s1, 32768 }
   0x5   :  { %s38_s26 = sshll.u32 %s6311_s25, 4  ;;  %p6126_p0 = scmp.ne.s32.totalorder %s6590_s1, %s6125_s29  ;;  %s39_s26 = int_to_ptr.vmem [resolvable:$true] %s38_s26 }
   0x6   :  { %p6129_p1 = scmp.lt.u32.totalorder %s6125_s29, %s6590_s1 }
   0x8   :  { %p6131_p2 = pnand %p6129_p1, %p6126_p0 }
   0xa   :  { %6134 = shalt.err (!%p6131_p2)
}
   0xb   :  { %s6135_s17 = scalar_lea.vmem %s39_s26, 32768  ;;  %p6140_p4 = scmp.lt.s32.totalorder %s39_s26, %s39_s26 }
   0xc   :  { %p6136_p3 = scmp.ne.s32.totalorder %s39_s26, %s6135_s17  ;;  %p6141_p5 = scmp.lt.s32.totalorder %s6135_s17, %s6135_s17 }
   0xe   :  { %p6142_p6 = por %p6141_p5, %p6140_p4 }
  0x10   :  { %p6143_p7 = pnand %p6142_p6, %p6136_p3 }
  0x12   :  { %6146 = shalt.err (!%p6143_p7)
}
  0x13   :  { %s6312_s18 = smov 256   ;;  %s6313_s19 = smov 16  }
  0x14   :  { %44 = dma.hbm_to_vmem [thread:$0]  %s6590_s1, 32768, %s39_s26, [#allocation6], %s6312_s18, %s6312_s18, %s6313_s19  }
  0x15   :  { %s6314_s22 = smov [#allocation8]   ;;  %s6147_s27 = scalar_lea.hbm %s6594_s5, 12288 }
  0x16   :  { %s66_s23 = sshll.u32 %s6314_s22, 4  ;;  %p6148_p8 = scmp.ne.s32.totalorder %s6594_s5, %s6147_s27  ;;  %s67_s23 = int_to_ptr.vmem [resolvable:$true] %s66_s23 }
  0x17   :  { %p6151_p9 = scmp.lt.u32.totalorder %s6147_s27, %s6594_s5 }
  0x19   :  { %p6153_p10 = pnand %p6151_p9, %p6148_p8 }
  0x1b   :  { %6156 = shalt.err (!%p6153_p10)
}
  0x1c   :  { %s6157_s15 = scalar_lea.vmem %s67_s23, 12288  ;;  %p6162_p12 = scmp.lt.s32.totalorder %s67_s23, %s67_s23 }
  0x1d   :  { %p6158_p11 = scmp.ne.s32.totalorder %s67_s23, %s6157_s15  ;;  %p6163_p13 = scmp.lt.s32.totalorder %s6157_s15, %s6157_s15 }
  0x1f   :  { %p6164_p0 = por %p6163_p13, %p6162_p12 }
  0x21   :  { %p6165_p1 = pnand %p6164_p0, %p6158_p11 }
  0x23   :  { %6168 = shalt.err (!%p6165_p1)
}
  0x24   :  { %s6315_s1 = smov 192   ;;  %s6316_s26 = smov 12  }
  0x25   :  { %72 = dma.hbm_to_vmem [thread:$0]  %s6594_s5, 12288, %s67_s23, [#allocation9], %s6315_s1, %s6315_s1, %s6316_s26  }
  0x26   :  { %s6317_s20 = smov [#allocation11]   ;;  %s6169_s25 = scalar_lea.hbm %s6598_s9, 2048 }
  0x27   :  { %s94_s21 = sshll.u32 %s6317_s20, 4  ;;  %p6170_p2 = scmp.ne.s32.totalorder %s6598_s9, %s6169_s25  ;;  %s95_s21 = int_to_ptr.vmem [resolvable:$true] %s94_s21 }
  0x28   :  { %p6173_p3 = scmp.lt.u32.totalorder %s6169_s25, %s6598_s9 }
  0x2a   :  { %p6175_p4 = pnand %p6173_p3, %p6170_p2 }
  0x2c   :  { %6178 = shalt.err (!%p6175_p4)
}
  0x2d   :  { %s6179_s14 = scalar_lea.vmem %s95_s21, 2048  ;;  %p6184_p6 = scmp.lt.s32.totalorder %s95_s21, %s95_s21 }
  0x2e   :  { %p6180_p5 = scmp.ne.s32.totalorder %s95_s21, %s6179_s14  ;;  %p6185_p7 = scmp.lt.s32.totalorder %s6179_s14, %s6179_s14 }
  0x30   :  { %p6186_p8 = por %p6185_p7, %p6184_p6 }
  0x32   :  { %p6187_p9 = pnand %p6186_p8, %p6180_p5 }
  0x34   :  { %6190 = shalt.err (!%p6187_p9)
}
  0x35   :  { %s6318_s5 = smov 64   ;;  %s6319_s23 = smov 4  }
  0x36   :  { %100 = dma.hbm_to_vmem [thread:$0]  %s6598_s9, 2048, %s95_s21, [#allocation12], %s6318_s5, %s6318_s5, %s6319_s23  }
  0x37   :  { %s6320_s26 = smov [#allocation2]   ;;  %s6321_s17 = smov [#allocation7]  }
  0x38   :  { %s29_s16 = sshll.u32 %s6320_s26, 4  ;;  %s52_s20 = sshll.u32 %s6321_s17, 4  ;;  %s30_s16 = int_to_ptr.vmem [resolvable:$true] %s29_s16  ;;  %s53_s20 = int_to_ptr.vmem [resolvable:$true] %s52_s20 }
  0x39   :  { %s6191_s25 = scalar_lea.hbm %s6589_s0, 512 }
  0x3a   :  { %p6192_p10 = scmp.ne.s32.totalorder %s6589_s0, %s6191_s25  ;;  %p6195_p11 = scmp.lt.u32.totalorder %s6191_s25, %s6589_s0 }
  0x3c   :  { %p6197_p12 = pnand %p6195_p11, %p6192_p10 }
  0x3e   :  { %6200 = shalt.err (!%p6197_p12)
}
  0x3f   :  { %s6201_s9 = scalar_lea.vmem %s30_s16, 512  ;;  %p6206_p0 = scmp.lt.s32.totalorder %s30_s16, %s30_s16 }
  0x40   :  { %p6202_p13 = scmp.ne.s32.totalorder %s30_s16, %s6201_s9  ;;  %p6207_p1 = scmp.lt.s32.totalorder %s6201_s9, %s6201_s9 }
  0x42   :  { %p6208_p2 = por %p6207_p1, %p6206_p0 }
  0x44   :  { %p6209_p3 = pnand %p6208_p2, %p6202_p13 }
  0x46   :  { %6212 = shalt.err (!%p6209_p3)
}
  0x47   :  { %32 = dma.hbm_to_vmem [thread:$0]  %s6589_s0, 512, %s30_s16, [#allocation3]  }
  0x48   :  { %s6213_s26 = scalar_lea.hbm %s6592_s3, 16384 }
  0x49   :  { %p6214_p4 = scmp.ne.s32.totalorder %s6592_s3, %s6213_s26  ;;  %p6217_p5 = scmp.lt.u32.totalorder %s6213_s26, %s6592_s3 }
  0x4b   :  { %p6219_p6 = pnand %p6217_p5, %p6214_p4 }
  0x4d   :  { %6222 = shalt.err (!%p6219_p6)
}
  0x4e   :  { %s6223_s27 = scalar_lea.vmem %s53_s20, 16384  ;;  %p6228_p8 = scmp.lt.s32.totalorder %s53_s20, %s53_s20 }
  0x4f   :  { %p6224_p7 = scmp.ne.s32.totalorder %s53_s20, %s6223_s27  ;;  %p6229_p9 = scmp.lt.s32.totalorder %s6223_s27, %s6223_s27 }
  0x51   :  { %p6230_p10 = por %p6229_p9, %p6228_p8 }
  0x53   :  { %p6231_p11 = pnand %p6230_p10, %p6224_p7 }
  0x55   :  { %6234 = shalt.err (!%p6231_p11)
}
  0x56   :  { %58 = dma.hbm_to_vmem [thread:$0]  %s6592_s3, 16384, %s53_s20, [#allocation6], %s6312_s18, %s6312_s18, %s6313_s19  }
  0x57   :  { %s6322_s28 = smov [#allocation10]   ;;  %s6235_s21 = scalar_lea.hbm %s6596_s7, 6144 }
  0x58   :  { %s80_s29 = sshll.u32 %s6322_s28, 4  ;;  %p6236_p12 = scmp.ne.s32.totalorder %s6596_s7, %s6235_s21  ;;  %s81_s29 = int_to_ptr.vmem [resolvable:$true] %s80_s29 }
  0x59   :  { %p6239_p13 = scmp.lt.u32.totalorder %s6235_s21, %s6596_s7 }
  0x5b   :  { %p6241_p0 = pnand %p6239_p13, %p6236_p12 }
  0x5d   :  { %6244 = shalt.err (!%p6241_p0)
}
  0x5e   :  { %s6245_s17 = scalar_lea.vmem %s81_s29, 6144  ;;  %p6250_p2 = scmp.lt.s32.totalorder %s81_s29, %s81_s29 }
  0x5f   :  { %p6246_p1 = scmp.ne.s32.totalorder %s81_s29, %s6245_s17  ;;  %p6251_p3 = scmp.lt.s32.totalorder %s6245_s17, %s6245_s17 }
  0x61   :  { %p6252_p4 = por %p6251_p3, %p6250_p2 }
  0x63   :  { %p6253_p5 = pnand %p6252_p4, %p6246_p1 }
  0x65   :  { %6256 = shalt.err (!%p6253_p5)
}
  0x66   :  { %s6323_s3 = smov 128   ;;  %s6324_s18 = smov 8  }
  0x67   :  { %86 = dma.hbm_to_vmem [thread:$0]  %s6596_s7, 6144, %s81_s29, [#allocation9], %s6323_s3, %s6323_s3, %s6324_s18  }
  0x68   :  { %s6325_s22 = smov [#allocation13]   ;;  %s6257_s0 = scalar_lea.hbm %s6600_s11, 1024 }
  0x69   :  { %s108_s24 = sshll.u32 %s6325_s22, 4  ;;  %p6258_p6 = scmp.ne.s32.totalorder %s6600_s11, %s6257_s0  ;;  %s109_s24 = int_to_ptr.vmem [resolvable:$true] %s108_s24 }
  0x6a   :  { %p6261_p7 = scmp.lt.u32.totalorder %s6257_s0, %s6600_s11 }
  0x6c   :  { %p6263_p8 = pnand %p6261_p7, %p6258_p6 }
  0x6e   :  { %6266 = shalt.err (!%p6263_p8)
}
  0x6f   :  { %s6267_s21 = scalar_lea.vmem %s109_s24, 1024  ;;  %p6272_p10 = scmp.lt.s32.totalorder %s109_s24, %s109_s24 }
  0x70   :  { %p6268_p9 = scmp.ne.s32.totalorder %s109_s24, %s6267_s21  ;;  %p6273_p11 = scmp.lt.s32.totalorder %s6267_s21, %s6267_s21 }
  0x72   :  { %p6274_p12 = por %p6273_p11, %p6272_p10 }
  0x74   :  { %p6275_p13 = pnand %p6274_p12, %p6268_p9 }
  0x76   :  { %6278 = shalt.err (!%p6275_p13)
}
  0x77   :  { %114 = dma.hbm_to_vmem [thread:$0]  %s6600_s11, 1024, %s109_s24, [#allocation12], %s6318_s5, %s6318_s5, %s6319_s23  }
  0x78   :  { %6301 = dma.done.wait [#allocation3], 512  }
  0x79   :  { %6302 = vsyncadd [#allocation3], 4294966784 }
  0x7a   :  { %6303 = dma.done.wait [#allocation6], 49152  }
  0x7b   :  { %6304 = vsyncadd [#allocation6], 4294918144 }
  0x7c   :  { %6305 = dma.done.wait [#allocation9], 18432  }
  0x7d   :  { %6306 = vsyncadd [#allocation9], 4294948864 }
  0x7e   :  { %6307 = dma.done.wait [#allocation12], 3072  }
  0x7f   :  { %6308 = vsyncadd [#allocation12], 4294964224  ;;  %v5313_v0 = vld [vmem:[#allocation5 + $0x4] ss:$16 sps:$4 sm:$0xff]   ;;  %v5315_v1 = vld [vmem:[#allocation5 + $0xc] ss:$16 sps:$4 sm:$0xff]  }
  0x80   :  { %1730 = vmatprep.subr.bf16.mxu0 %v5313_v0  ;;  %v5317_v2 = vld [vmem:[#allocation5] ss:$16 sps:$4 sm:$0xff]   ;;  %v5318_v3 = vld [vmem:[#allocation5 + $0x8] ss:$16 sps:$4 sm:$0xff]   ;;  %1894 = vmatprep.subr.bf16.mxu1 %v5315_v1  ;;  %v5319_v4 = vld [vmem:[#allocation5 + $0x24] ss:$16 sps:$4 sm:$0xff]  }
  0x81   :  { %1731 = vmatpush1.bf16.msra.mxu0 %v5317_v2  ;;  %1895 = vmatpush1.bf16.msra.mxu1 %v5318_v3  ;;  %v5321_v5 = vld [vmem:[#allocation5 + $0x2c] ss:$16 sps:$4 sm:$0xff]   ;;  %v5323_v6 = vld [vmem:[#allocation5 + $0x20] ss:$16 sps:$4 sm:$0xff]   ;;  %v5324_v7 = vld [vmem:[#allocation5 + $0x28] ss:$16 sps:$4 sm:$0xff]  }
  0x82   :  { %1732 = vmatprep.subr.bf16.mxu0 %v5319_v4  ;;  %1896 = vmatprep.subr.bf16.mxu1 %v5321_v5  ;;  %v5325_v8 = vld [vmem:[#allocation5 + $0x44] ss:$16 sps:$4 sm:$0xff]   ;;  %v5327_v9 = vld [vmem:[#allocation5 + $0x4c] ss:$16 sps:$4 sm:$0xff]   ;;  %v5329_v10 = vld [vmem:[#allocation5 + $0x40] ss:$16 sps:$4 sm:$0xff]  }
  0x83   :  { %v5330_v11 = vld [vmem:[#allocation5 + $0x48] ss:$16 sps:$4 sm:$0xff]   ;;  %v5331_v12 = vld [vmem:[#allocation5 + $0x64] ss:$16 sps:$4 sm:$0xff]   ;;  %v5333_v13 = vld [vmem:[#allocation5 + $0x6c] ss:$16 sps:$4 sm:$0xff]  }
  0x84   :  { %v5335_v14 = vld [vmem:[#allocation5 + $0x60] ss:$16 sps:$4 sm:$0xff]   ;;  %v5336_v15 = vld [vmem:[#allocation5 + $0x68] ss:$16 sps:$4 sm:$0xff]   ;;  %v5337_v16 = vld [vmem:[#allocation5 + $0x84] ss:$16 sps:$4 sm:$0xff]  }
  0x85   :  { %1733 = vmatpush1.bf16.msra.mxu0 %v5323_v6  ;;  %1897 = vmatpush1.bf16.msra.mxu1 %v5324_v7  ;;  %v5339_v17 = vld [vmem:[#allocation5 + $0x8c] ss:$16 sps:$4 sm:$0xff]   ;;  %v5341_v18 = vld [vmem:[#allocation5 + $0x80] ss:$16 sps:$4 sm:$0xff]   ;;  %v5342_v19 = vld [vmem:[#allocation5 + $0x88] ss:$16 sps:$4 sm:$0xff]  }
  0x86   :  { %1734 = vmatprep.subr.bf16.mxu0 %v5325_v8  ;;  %1898 = vmatprep.subr.bf16.mxu1 %v5327_v9  ;;  %v5343_v20 = vld [vmem:[#allocation5 + $0xa4] ss:$16 sps:$4 sm:$0xff]   ;;  %v5345_v21 = vld [vmem:[#allocation5 + $0xac] ss:$16 sps:$4 sm:$0xff]   ;;  %v5347_v22 = vld [vmem:[#allocation5 + $0xa0] ss:$16 sps:$4 sm:$0xff]  }
  0x87   :  { %v5348_v23 = vld [vmem:[#allocation5 + $0xa8] ss:$16 sps:$4 sm:$0xff]   ;;  %v5349_v24 = vld [vmem:[#allocation5 + $0xc4] ss:$16 sps:$4 sm:$0xff]   ;;  %v5351_v25 = vld [vmem:[#allocation5 + $0xcc] ss:$16 sps:$4 sm:$0xff]  }
  0x88   :  { %v5353_v26 = vld [vmem:[#allocation5 + $0xc0] ss:$16 sps:$4 sm:$0xff]   ;;  %v5354_v27 = vld [vmem:[#allocation5 + $0xc8] ss:$16 sps:$4 sm:$0xff]   ;;  %v5355_v28 = vld [vmem:[#allocation5 + $0xe4] ss:$16 sps:$4 sm:$0xff]  }
  0x89   :  { %1735 = vmatpush1.bf16.msra.mxu0 %v5329_v10  ;;  %1899 = vmatpush1.bf16.msra.mxu1 %v5330_v11  ;;  %v5357_v29 = vld [vmem:[#allocation5 + $0xec] ss:$16 sps:$4 sm:$0xff]   ;;  %v5359_v30 = vld [vmem:[#allocation5 + $0xe0] ss:$16 sps:$4 sm:$0xff]   ;;  %v5360_v31 = vld [vmem:[#allocation5 + $0xe8] ss:$16 sps:$4 sm:$0xff]  }
  0x8a   :  { %1736 = vmatprep.subr.bf16.mxu0 %v5331_v12  ;;  %1900 = vmatprep.subr.bf16.mxu1 %v5333_v13  ;;  %v5361_v32 = vld [vmem:[#allocation5 + $0x104] ss:$16 sps:$4 sm:$0xff]   ;;  %v5363_v33 = vld [vmem:[#allocation5 + $0x10c] ss:$16 sps:$4 sm:$0xff]   ;;  %v5365_v34 = vld [vmem:[#allocation5 + $0x100] ss:$16 sps:$4 sm:$0xff]  }
  0x8b   :  { %v5366_v35 = vld [vmem:[#allocation5 + $0x108] ss:$16 sps:$4 sm:$0xff]   ;;  %v5367_v36 = vld [vmem:[#allocation5 + $0x124] ss:$16 sps:$4 sm:$0xff]   ;;  %v5369_v37 = vld [vmem:[#allocation5 + $0x12c] ss:$16 sps:$4 sm:$0xff]  }
  0x8c   :  { %v5371_v38 = vld [vmem:[#allocation5 + $0x120] ss:$16 sps:$4 sm:$0xff]   ;;  %v5372_v39 = vld [vmem:[#allocation5 + $0x128] ss:$16 sps:$4 sm:$0xff]   ;;  %v5373_v40 = vld [vmem:[#allocation5 + $0x144] ss:$16 sps:$4 sm:$0xff]  }
  0x8d   :  { %1737 = vmatpush1.bf16.msra.mxu0 %v5335_v14  ;;  %1901 = vmatpush1.bf16.msra.mxu1 %v5336_v15  ;;  %v5375_v41 = vld [vmem:[#allocation5 + $0x14c] ss:$16 sps:$4 sm:$0xff]   ;;  %v5377_v42 = vld [vmem:[#allocation5 + $0x140] ss:$16 sps:$4 sm:$0xff]   ;;  %v5378_v43 = vld [vmem:[#allocation5 + $0x148] ss:$16 sps:$4 sm:$0xff]  }
  0x8e   :  { %1738 = vmatprep.subr.bf16.mxu0 %v5337_v16  ;;  %1902 = vmatprep.subr.bf16.mxu1 %v5339_v17  ;;  %v5379_v44 = vld [vmem:[#allocation5 + $0x164] ss:$16 sps:$4 sm:$0xff]   ;;  %v5381_v45 = vld [vmem:[#allocation5 + $0x16c] ss:$16 sps:$4 sm:$0xff]   ;;  %v5383_v47 = vld [vmem:[#allocation5 + $0x160] ss:$16 sps:$4 sm:$0xff]  }
  0x8f   :  { %v140_v46 = vld [vmem:[#allocation2] sm:$0xff]  ;;  %v5384_v49 = vld [vmem:[#allocation5 + $0x168] ss:$16 sps:$4 sm:$0xff]   ;;  %v5387_v51 = vld [vmem:[#allocation5 + $0x18c] ss:$16 sps:$4 sm:$0xff]   ;;  %vm6328_vm13 = vmmov 0  }
  0x90   :  { %v4586_v48 = vcombine.high %v140_v46, %v140_v46  ;;  %v5385_v50 = vld [vmem:[#allocation5 + $0x184] ss:$16 sps:$4 sm:$0xff]   ;;  %v5389_v52 = vld [vmem:[#allocation5 + $0x180] ss:$16 sps:$4 sm:$0xff]   ;;  %v5390_v53 = vld [vmem:[#allocation5 + $0x188] ss:$16 sps:$4 sm:$0xff]   ;;  %v4585_v4 = vcombine.low %v140_v46, %v140_v46 }
  0x91   :  { %1739 = vmatpush1.bf16.msra.mxu0 %v5341_v18  ;;  %1903 = vmatpush1.bf16.msra.mxu1 %v5342_v19  ;;  %v5391_v54 = vld [vmem:[#allocation5 + $0x1a4] ss:$16 sps:$4 sm:$0xff]   ;;  %v5393_v55 = vld [vmem:[#allocation5 + $0x1ac] ss:$16 sps:$4 sm:$0xff]   ;;  %v5395_v56 = vld [vmem:[#allocation5 + $0x1a0] ss:$16 sps:$4 sm:$0xff]  }
  0x92   :  { %1740 = vmatprep.subr.bf16.mxu0 %v5343_v20  ;;  %1904 = vmatprep.subr.bf16.mxu1 %v5345_v21  ;;  %v5396_v57 = vld [vmem:[#allocation5 + $0x1a8] ss:$16 sps:$4 sm:$0xff]   ;;  %v5397_v58 = vld [vmem:[#allocation5 + $0x1c4] ss:$16 sps:$4 sm:$0xff]   ;;  %v5399_v59 = vld [vmem:[#allocation5 + $0x1cc] ss:$16 sps:$4 sm:$0xff]  }
  0x93   :  { %1762 = vmatprep.mubr.bf16.mxu0 %v4586_v48  ;;  %1926 = vmatprep.mubr.bf16.mxu1 %v4586_v48  ;;  %v5401_v60 = vld [vmem:[#allocation5 + $0x1c0] ss:$16 sps:$4 sm:$0xff]   ;;  %v5402_v61 = vld [vmem:[#allocation5 + $0x1c8] ss:$16 sps:$4 sm:$0xff]   ;;  %v5403_v62 = vld [vmem:[#allocation5 + $0x1e4] ss:$16 sps:$4 sm:$0xff]  }
  0x94   :  { %v5405_v63 = vld [vmem:[#allocation5 + $0x1ec] ss:$16 sps:$4 sm:$0xff]   ;;  %v5407_v0 = vld [vmem:[#allocation5 + $0x1e0] ss:$16 sps:$4 sm:$0xff]   ;;  %v5408_v1 = vld [vmem:[#allocation5 + $0x1e8] ss:$16 sps:$4 sm:$0xff]  }
  0x95   :  { %1741 = vmatpush1.bf16.msra.mxu0 %v5347_v22  ;;  %1905 = vmatpush1.bf16.msra.mxu1 %v5348_v23  ;;  %v5413_v2 = vld [vmem:[#allocation5 + $0x204] ss:$16 sps:$4 sm:$0xff]   ;;  %v5416_v3 = vld [vmem:[#allocation5 + $0x20c] ss:$16 sps:$4 sm:$0xff]   ;;  %v5411_v5 = vld [vmem:[#allocation5 + $0x200] ss:$16 sps:$4 sm:$0xff]  }
  0x96   :  { %1742 = vmatprep.subr.bf16.mxu0 %v5349_v24  ;;  %1906 = vmatprep.subr.bf16.mxu1 %v5351_v25  ;;  %v5414_v6 = vld [vmem:[#allocation5 + $0x208] ss:$16 sps:$4 sm:$0xff]   ;;  %v5419_v7 = vld [vmem:[#allocation5 + $0x224] ss:$16 sps:$4 sm:$0xff]   ;;  %v5422_v8 = vld [vmem:[#allocation5 + $0x22c] ss:$16 sps:$4 sm:$0xff]  }
  0x97   :  { %v5417_v9 = vld [vmem:[#allocation5 + $0x220] ss:$16 sps:$4 sm:$0xff]   ;;  %v5420_v10 = vld [vmem:[#allocation5 + $0x228] ss:$16 sps:$4 sm:$0xff]   ;;  %v5425_v11 = vld [vmem:[#allocation5 + $0x244] ss:$16 sps:$4 sm:$0xff]  }
  0x98   :  { %v5428_v12 = vld [vmem:[#allocation5 + $0x24c] ss:$16 sps:$4 sm:$0xff]   ;;  %v5423_v13 = vld [vmem:[#allocation5 + $0x240] ss:$16 sps:$4 sm:$0xff]   ;;  %v5426_v14 = vld [vmem:[#allocation5 + $0x248] ss:$16 sps:$4 sm:$0xff]  }
  0x99   :  { %1743 = vmatpush1.bf16.msra.mxu0 %v5353_v26  ;;  %1907 = vmatpush1.bf16.msra.mxu1 %v5354_v27  ;;  %v5431_v15 = vld [vmem:[#allocation5 + $0x264] ss:$16 sps:$4 sm:$0xff]   ;;  %v5434_v16 = vld [vmem:[#allocation5 + $0x26c] ss:$16 sps:$4 sm:$0xff]   ;;  %v5429_v17 = vld [vmem:[#allocation5 + $0x260] ss:$16 sps:$4 sm:$0xff]  }
  0x9a   :  { %1744 = vmatprep.subr.bf16.mxu0 %v5355_v28  ;;  %1908 = vmatprep.subr.bf16.mxu1 %v5357_v29  ;;  %v5432_v18 = vld [vmem:[#allocation5 + $0x268] ss:$16 sps:$4 sm:$0xff]   ;;  %v5437_v19 = vld [vmem:[#allocation5 + $0x284] ss:$16 sps:$4 sm:$0xff]   ;;  %v5440_v20 = vld [vmem:[#allocation5 + $0x28c] ss:$16 sps:$4 sm:$0xff]  }
  0x9b   :  { %v5435_v21 = vld [vmem:[#allocation5 + $0x280] ss:$16 sps:$4 sm:$0xff]   ;;  %v5438_v22 = vld [vmem:[#allocation5 + $0x288] ss:$16 sps:$4 sm:$0xff]   ;;  %v5443_v23 = vld [vmem:[#allocation5 + $0x2a4] ss:$16 sps:$4 sm:$0xff]  }
  0x9c   :  { %v5446_v24 = vld [vmem:[#allocation5 + $0x2ac] ss:$16 sps:$4 sm:$0xff]   ;;  %v5441_v25 = vld [vmem:[#allocation5 + $0x2a0] ss:$16 sps:$4 sm:$0xff]   ;;  %v5444_v26 = vld [vmem:[#allocation5 + $0x2a8] ss:$16 sps:$4 sm:$0xff]  }
  0x9d   :  { %1745 = vmatpush1.bf16.msra.mxu0 %v5359_v30  ;;  %1909 = vmatpush1.bf16.msra.mxu1 %v5360_v31  ;;  %v5449_v27 = vld [vmem:[#allocation5 + $0x2c4] ss:$16 sps:$4 sm:$0xff]   ;;  %v5452_v28 = vld [vmem:[#allocation5 + $0x2cc] ss:$16 sps:$4 sm:$0xff]   ;;  %v5447_v31 = vld [vmem:[#allocation5 + $0x2c0] ss:$16 sps:$4 sm:$0xff]  }
  0x9e   :  { %1746 = vmatprep.subr.bf16.mxu0 %v5361_v32  ;;  %1910 = vmatprep.subr.bf16.mxu1 %v5363_v33  ;;  %v6496_v29 = vld [vmem:[#allocation2 + $0x8] sm:$0xff]  ;;  %v5455_v33 = vld [vmem:[#allocation5 + $0x2e4] ss:$16 sps:$4 sm:$0xff]  }
  0x9f   :  { %v4588_v30 = vcombine.high %v6496_v29, %v6496_v29  ;;  %v5450_v32 = vld [vmem:[#allocation5 + $0x2c8] ss:$16 sps:$4 sm:$0xff]   ;;  %v5476_v46 = vld [vmem:[#allocation5 + $0x34c] ss:$16 sps:$4 sm:$0xff]  }
  0xa0   :  { %v5474_v48 = vld [vmem:[#allocation5 + $0x348] ss:$16 sps:$4 sm:$0xff]  }
  0xa1   :  { %1747 = vmatpush1.bf16.msra.mxu0 %v5365_v34  ;;  %1911 = vmatpush1.bf16.msra.mxu1 %v5366_v35  ;;  %v5458_v34 = vld [vmem:[#allocation5 + $0x2ec] ss:$16 sps:$4 sm:$0xff]   ;;  %v5453_v35 = vld [vmem:[#allocation5 + $0x2e0] ss:$16 sps:$4 sm:$0xff]  }
  0xa2   :  { %1748 = vmatprep.subr.bf16.mxu0 %v5367_v36  ;;  %1912 = vmatprep.subr.bf16.mxu1 %v5369_v37  ;;  %v5456_v36 = vld [vmem:[#allocation5 + $0x2e8] ss:$16 sps:$4 sm:$0xff]   ;;  %v5461_v37 = vld [vmem:[#allocation5 + $0x304] ss:$16 sps:$4 sm:$0xff]  }
  0xa5   :  { %1749 = vmatpush1.bf16.msra.mxu0 %v5371_v38  ;;  %1913 = vmatpush1.bf16.msra.mxu1 %v5372_v39  ;;  %v5464_v38 = vld [vmem:[#allocation5 + $0x30c] ss:$16 sps:$4 sm:$0xff]   ;;  %v5459_v39 = vld [vmem:[#allocation5 + $0x300] ss:$16 sps:$4 sm:$0xff]  }
  0xa6   :  { %1750 = vmatprep.subr.bf16.mxu0 %v5373_v40  ;;  %1914 = vmatprep.subr.bf16.mxu1 %v5375_v41  ;;  %v5462_v40 = vld [vmem:[#allocation5 + $0x308] ss:$16 sps:$4 sm:$0xff]   ;;  %v5467_v41 = vld [vmem:[#allocation5 + $0x324] ss:$16 sps:$4 sm:$0xff]  }
  0xa9   :  { %1751 = vmatpush1.bf16.msra.mxu0 %v5377_v42  ;;  %1915 = vmatpush1.bf16.msra.mxu1 %v5378_v43  ;;  %v5470_v42 = vld [vmem:[#allocation5 + $0x32c] ss:$16 sps:$4 sm:$0xff]   ;;  %v5465_v43 = vld [vmem:[#allocation5 + $0x320] ss:$16 sps:$4 sm:$0xff]  }
  0xaa   :  { %1752 = vmatprep.subr.bf16.mxu0 %v5379_v44  ;;  %1916 = vmatprep.subr.bf16.mxu1 %v5381_v45  ;;  %v5468_v44 = vld [vmem:[#allocation5 + $0x328] ss:$16 sps:$4 sm:$0xff]   ;;  %v5473_v45 = vld [vmem:[#allocation5 + $0x344] ss:$16 sps:$4 sm:$0xff]  }
  0xad   :  { %1753 = vmatpush1.bf16.msra.mxu0 %v5383_v47  ;;  %1917 = vmatpush1.bf16.msra.mxu1 %v5384_v49  ;;  %v5471_v47 = vld [vmem:[#allocation5 + $0x340] ss:$16 sps:$4 sm:$0xff]   ;;  %v5479_v49 = vld [vmem:[#allocation5 + $0x364] ss:$16 sps:$4 sm:$0xff]  }
  0xae   :  { %1754 = vmatprep.subr.bf16.mxu0 %v5385_v50  ;;  %1918 = vmatprep.subr.bf16.mxu1 %v5387_v51  ;;  %v5482_v50 = vld [vmem:[#allocation5 + $0x36c] ss:$16 sps:$4 sm:$0xff]   ;;  %v5477_v51 = vld [vmem:[#allocation5 + $0x360] ss:$16 sps:$4 sm:$0xff]  }
  0xb1   :  { %1755 = vmatpush1.bf16.msra.mxu0 %v5389_v52  ;;  %1919 = vmatpush1.bf16.msra.mxu1 %v5390_v53  ;;  %v5480_v52 = vld [vmem:[#allocation5 + $0x368] ss:$16 sps:$4 sm:$0xff]   ;;  %v5485_v53 = vld [vmem:[#allocation5 + $0x384] ss:$16 sps:$4 sm:$0xff]  }
  0xb2   :  { %1756 = vmatprep.subr.bf16.mxu0 %v5391_v54  ;;  %1920 = vmatprep.subr.bf16.mxu1 %v5393_v55  ;;  %v5488_v54 = vld [vmem:[#allocation5 + $0x38c] ss:$16 sps:$4 sm:$0xff]   ;;  %v5483_v55 = vld [vmem:[#allocation5 + $0x380] ss:$16 sps:$4 sm:$0xff]  }
  0xb5   :  { %1757 = vmatpush1.bf16.msra.mxu0 %v5395_v56  ;;  %1921 = vmatpush1.bf16.msra.mxu1 %v5396_v57  ;;  %v5486_v56 = vld [vmem:[#allocation5 + $0x388] ss:$16 sps:$4 sm:$0xff]   ;;  %v5491_v57 = vld [vmem:[#allocation5 + $0x3a4] ss:$16 sps:$4 sm:$0xff]  }
  0xb6   :  { %1758 = vmatprep.subr.bf16.mxu0 %v5397_v58  ;;  %1922 = vmatprep.subr.bf16.mxu1 %v5399_v59  ;;  %v5494_v58 = vld [vmem:[#allocation5 + $0x3ac] ss:$16 sps:$4 sm:$0xff]   ;;  %v5489_v59 = vld [vmem:[#allocation5 + $0x3a0] ss:$16 sps:$4 sm:$0xff]  }
  0xb9   :  { %1759 = vmatpush1.bf16.msra.mxu0 %v5401_v60  ;;  %1923 = vmatpush1.bf16.msra.mxu1 %v5402_v61  ;;  %v5492_v60 = vld [vmem:[#allocation5 + $0x3a8] ss:$16 sps:$4 sm:$0xff]   ;;  %v5497_v61 = vld [vmem:[#allocation5 + $0x3c4] ss:$16 sps:$4 sm:$0xff]  }
  0xba   :  { %1760 = vmatprep.subr.bf16.mxu0 %v5403_v62  ;;  %1924 = vmatprep.subr.bf16.mxu1 %v5405_v63  ;;  %v5500_v62 = vld [vmem:[#allocation5 + $0x3cc] ss:$16 sps:$4 sm:$0xff]   ;;  %v5495_v63 = vld [vmem:[#allocation5 + $0x3c0] ss:$16 sps:$4 sm:$0xff]  }
  0xbd   :  { %1761 = vmatpush1.bf16.msra.mxu0 %v5407_v0  ;;  %1925 = vmatpush1.bf16.msra.mxu1 %v5408_v1  ;;  %v5498_v0 = vld [vmem:[#allocation5 + $0x3c8] ss:$16 sps:$4 sm:$0xff]   ;;  %v5503_v1 = vld [vmem:[#allocation5 + $0x3e4] ss:$16 sps:$4 sm:$0xff]  }
  0xbe   :  { %1771 = vmatprep.subr.bf16.mxu0 %v5413_v2  ;;  %1935 = vmatprep.subr.bf16.mxu1 %v5416_v3  ;;  %v5506_v2 = vld [vmem:[#allocation5 + $0x3ec] ss:$16 sps:$4 sm:$0xff]   ;;  %v5501_v3 = vld [vmem:[#allocation5 + $0x3e0] ss:$16 sps:$4 sm:$0xff]  }
  0xc0   :  { %1763 = vmatmul.mubr.bf16.vlgmr.msra.gmra.mrb[0].mxu0 %v4585_v4  ;;  %1927 = vmatmul.mubr.bf16.vlgmr.msra.gmra.mrb[0].mxu1 %v4585_v4  ;;  %v5504_v4 = vld [vmem:[#allocation5 + $0x3e8] ss:$16 sps:$4 sm:$0xff]  }
  0xc1   :  { %1772 = vmatpush1.bf16.msra.mxu0 %v5411_v5  ;;  %1936 = vmatpush1.bf16.msra.mxu1 %v5414_v6  ;;  %v5511_v5 = vld [vmem:[#allocation5 + $0x404] ss:$16 sps:$4 sm:$0xff]   ;;  %v5514_v6 = vld [vmem:[#allocation5 + $0x40c] ss:$16 sps:$4 sm:$0xff]  }
  0xc2   :  { %1773 = vmatprep.subr.bf16.mxu0 %v5419_v7  ;;  %1937 = vmatprep.subr.bf16.mxu1 %v5422_v8  ;;  %v4587_v7 = vcombine.low %v6496_v29, %v6496_v29  ;;  %v5509_v8 = vld [vmem:[#allocation5 + $0x400] ss:$16 sps:$4 sm:$0xff]   ;;  %v5544_v29 = vld [vmem:[#allocation5 + $0x4ac] ss:$16 sps:$4 sm:$0xff]  }
  0xc3   :  { %1803 = vmatprep.mubr.bf16.mxu0 %v4588_v30  ;;  %1967 = vmatprep.mubr.bf16.mxu1 %v4588_v30  ;;  %v5539_v30 = vld [vmem:[#allocation5 + $0x4a0] ss:$16 sps:$4 sm:$0xff]  }
  0xc5   :  { %1774 = vmatpush1.bf16.msra.mxu0 %v5417_v9  ;;  %1938 = vmatpush1.bf16.msra.mxu1 %v5420_v10  ;;  %v5512_v9 = vld [vmem:[#allocation5 + $0x408] ss:$16 sps:$4 sm:$0xff]   ;;  %v5517_v10 = vld [vmem:[#allocation5 + $0x424] ss:$16 sps:$4 sm:$0xff]  }
  0xc6   :  { %1775 = vmatprep.subr.bf16.mxu0 %v5425_v11  ;;  %1939 = vmatprep.subr.bf16.mxu1 %v5428_v12  ;;  %v6502_v11 = vld [vmem:[#allocation2 + $0x10] sm:$0xff]  ;;  %v5520_v12 = vld [vmem:[#allocation5 + $0x42c] ss:$16 sps:$4 sm:$0xff]  }
  0xc9   :  { %1776 = vmatpush1.bf16.msra.mxu0 %v5423_v13  ;;  %1940 = vmatpush1.bf16.msra.mxu1 %v5426_v14  ;;  %v4590_v13 = vcombine.high %v6502_v11, %v6502_v11  ;;  %v5515_v14 = vld [vmem:[#allocation5 + $0x420] ss:$16 sps:$4 sm:$0xff]  }
  0xca   :  { %1777 = vmatprep.subr.bf16.mxu0 %v5431_v15  ;;  %1941 = vmatprep.subr.bf16.mxu1 %v5434_v16  ;;  %v5518_v15 = vld [vmem:[#allocation5 + $0x428] ss:$16 sps:$4 sm:$0xff]   ;;  %v5523_v16 = vld [vmem:[#allocation5 + $0x444] ss:$16 sps:$4 sm:$0xff]  }
  0xcd   :  { %1778 = vmatpush1.bf16.msra.mxu0 %v5429_v17  ;;  %1942 = vmatpush1.bf16.msra.mxu1 %v5432_v18  ;;  %v5526_v17 = vld [vmem:[#allocation5 + $0x44c] ss:$16 sps:$4 sm:$0xff]   ;;  %v5521_v18 = vld [vmem:[#allocation5 + $0x440] ss:$16 sps:$4 sm:$0xff]  }
  0xce   :  { %1779 = vmatprep.subr.bf16.mxu0 %v5437_v19  ;;  %1943 = vmatprep.subr.bf16.mxu1 %v5440_v20  ;;  %v5524_v19 = vld [vmem:[#allocation5 + $0x448] ss:$16 sps:$4 sm:$0xff]   ;;  %v5529_v20 = vld [vmem:[#allocation5 + $0x464] ss:$16 sps:$4 sm:$0xff]  }
  0xd1   :  { %1780 = vmatpush1.bf16.msra.mxu0 %v5435_v21  ;;  %1944 = vmatpush1.bf16.msra.mxu1 %v5438_v22  ;;  %v5532_v21 = vld [vmem:[#allocation5 + $0x46c] ss:$16 sps:$4 sm:$0xff]   ;;  %v5527_v22 = vld [vmem:[#allocation5 + $0x460] ss:$16 sps:$4 sm:$0xff]  }
  0xd2   :  { %1781 = vmatprep.subr.bf16.mxu0 %v5443_v23  ;;  %1945 = vmatprep.subr.bf16.mxu1 %v5446_v24  ;;  %v5530_v23 = vld [vmem:[#allocation5 + $0x468] ss:$16 sps:$4 sm:$0xff]   ;;  %v5535_v24 = vld [vmem:[#allocation5 + $0x484] ss:$16 sps:$4 sm:$0xff]  }
  0xd5   :  { %1782 = vmatpush1.bf16.msra.mxu0 %v5441_v25  ;;  %1946 = vmatpush1.bf16.msra.mxu1 %v5444_v26  ;;  %v5538_v25 = vld [vmem:[#allocation5 + $0x48c] ss:$16 sps:$4 sm:$0xff]   ;;  %v5533_v26 = vld [vmem:[#allocation5 + $0x480] ss:$16 sps:$4 sm:$0xff]  }
  0xd6   :  { %1783 = vmatprep.subr.bf16.mxu0 %v5449_v27  ;;  %1947 = vmatprep.subr.bf16.mxu1 %v5452_v28  ;;  %v5536_v27 = vld [vmem:[#allocation5 + $0x488] ss:$16 sps:$4 sm:$0xff]   ;;  %v5541_v28 = vld [vmem:[#allocation5 + $0x4a4] ss:$16 sps:$4 sm:$0xff]  }
  0xd9   :  { %1784 = vmatpush1.bf16.msra.mxu0 %v5447_v31  ;;  %1948 = vmatpush1.bf16.msra.mxu1 %v5450_v32  ;;  %v5542_v31 = vld [vmem:[#allocation5 + $0x4a8] ss:$16 sps:$4 sm:$0xff]   ;;  %v5547_v32 = vld [vmem:[#allocation5 + $0x4c4] ss:$16 sps:$4 sm:$0xff]  }
  0xda   :  { %1785 = vmatprep.subr.bf16.mxu0 %v5455_v33  ;;  %1949 = vmatprep.subr.bf16.mxu1 %v5458_v34  ;;  %v5550_v33 = vld [vmem:[#allocation5 + $0x4cc] ss:$16 sps:$4 sm:$0xff]   ;;  %v5545_v34 = vld [vmem:[#allocation5 + $0x4c0] ss:$16 sps:$4 sm:$0xff]  }
  0xdd   :  { %1786 = vmatpush1.bf16.msra.mxu0 %v5453_v35  ;;  %1950 = vmatpush1.bf16.msra.mxu1 %v5456_v36  ;;  %v5548_v35 = vld [vmem:[#allocation5 + $0x4c8] ss:$16 sps:$4 sm:$0xff]   ;;  %v5553_v36 = vld [vmem:[#allocation5 + $0x4e4] ss:$16 sps:$4 sm:$0xff]  }
  0xde   :  { %1787 = vmatprep.subr.bf16.mxu0 %v5461_v37  ;;  %1951 = vmatprep.subr.bf16.mxu1 %v5464_v38  ;;  %v5556_v37 = vld [vmem:[#allocation5 + $0x4ec] ss:$16 sps:$4 sm:$0xff]   ;;  %v5551_v38 = vld [vmem:[#allocation5 + $0x4e0] ss:$16 sps:$4 sm:$0xff]  }
  0xe1   :  { %1788 = vmatpush1.bf16.msra.mxu0 %v5459_v39  ;;  %1952 = vmatpush1.bf16.msra.mxu1 %v5462_v40  ;;  %v5554_v39 = vld [vmem:[#allocation5 + $0x4e8] ss:$16 sps:$4 sm:$0xff]   ;;  %v5559_v40 = vld [vmem:[#allocation5 + $0x504] ss:$16 sps:$4 sm:$0xff]  }
  0xe2   :  { %1789 = vmatprep.subr.bf16.mxu0 %v5467_v41  ;;  %1953 = vmatprep.subr.bf16.mxu1 %v5470_v42  ;;  %v5562_v41 = vld [vmem:[#allocation5 + $0x50c] ss:$16 sps:$4 sm:$0xff]   ;;  %v5557_v42 = vld [vmem:[#allocation5 + $0x500] ss:$16 sps:$4 sm:$0xff]  }
  0xe5   :  { %1790 = vmatpush1.bf16.msra.mxu0 %v5465_v43  ;;  %1954 = vmatpush1.bf16.msra.mxu1 %v5468_v44  ;;  %v5560_v43 = vld [vmem:[#allocation5 + $0x508] ss:$16 sps:$4 sm:$0xff]   ;;  %v5565_v44 = vld [vmem:[#allocation5 + $0x524] ss:$16 sps:$4 sm:$0xff]  }
  0xe6   :  { %1791 = vmatprep.subr.bf16.mxu0 %v5473_v45  ;;  %1955 = vmatprep.subr.bf16.mxu1 %v5476_v46  ;;  %v5568_v45 = vld [vmem:[#allocation5 + $0x52c] ss:$16 sps:$4 sm:$0xff]   ;;  %v5563_v46 = vld [vmem:[#allocation5 + $0x520] ss:$16 sps:$4 sm:$0xff]  }
  0xe9   :  { %1792 = vmatpush1.bf16.msra.mxu0 %v5471_v47  ;;  %1956 = vmatpush1.bf16.msra.mxu1 %v5474_v48  ;;  %v5566_v47 = vld [vmem:[#allocation5 + $0x528] ss:$16 sps:$4 sm:$0xff]   ;;  %v5571_v48 = vld [vmem:[#allocation5 + $0x544] ss:$16 sps:$4 sm:$0xff]  }
  0xea   :  { %1793 = vmatprep.subr.bf16.mxu0 %v5479_v49  ;;  %1957 = vmatprep.subr.bf16.mxu1 %v5482_v50  ;;  %v5574_v49 = vld [vmem:[#allocation5 + $0x54c] ss:$16 sps:$4 sm:$0xff]   ;;  %v5569_v50 = vld [vmem:[#allocation5 + $0x540] ss:$16 sps:$4 sm:$0xff]  }
  0xed   :  { %1794 = vmatpush1.bf16.msra.mxu0 %v5477_v51  ;;  %1958 = vmatpush1.bf16.msra.mxu1 %v5480_v52  ;;  %v5572_v51 = vld [vmem:[#allocation5 + $0x548] ss:$16 sps:$4 sm:$0xff]   ;;  %v5577_v52 = vld [vmem:[#allocation5 + $0x564] ss:$16 sps:$4 sm:$0xff]  }
  0xee   :  { %1795 = vmatprep.subr.bf16.mxu0 %v5485_v53  ;;  %1959 = vmatprep.subr.bf16.mxu1 %v5488_v54  ;;  %v5580_v53 = vld [vmem:[#allocation5 + $0x56c] ss:$16 sps:$4 sm:$0xff]   ;;  %v5575_v54 = vld [vmem:[#allocation5 + $0x560] ss:$16 sps:$4 sm:$0xff]  }
  0xf1   :  { %1796 = vmatpush1.bf16.msra.mxu0 %v5483_v55  ;;  %1960 = vmatpush1.bf16.msra.mxu1 %v5486_v56  ;;  %v5578_v55 = vld [vmem:[#allocation5 + $0x568] ss:$16 sps:$4 sm:$0xff]   ;;  %v5583_v56 = vld [vmem:[#allocation5 + $0x584] ss:$16 sps:$4 sm:$0xff]  }
  0xf2   :  { %1797 = vmatprep.subr.bf16.mxu0 %v5491_v57  ;;  %1961 = vmatprep.subr.bf16.mxu1 %v5494_v58  ;;  %v5586_v57 = vld [vmem:[#allocation5 + $0x58c] ss:$16 sps:$4 sm:$0xff]   ;;  %v5581_v58 = vld [vmem:[#allocation5 + $0x580] ss:$16 sps:$4 sm:$0xff]  }
  0xf5   :  { %1798 = vmatpush1.bf16.msra.mxu0 %v5489_v59  ;;  %1962 = vmatpush1.bf16.msra.mxu1 %v5492_v60  ;;  %v5584_v59 = vld [vmem:[#allocation5 + $0x588] ss:$16 sps:$4 sm:$0xff]   ;;  %v5589_v60 = vld [vmem:[#allocation5 + $0x5a4] ss:$16 sps:$4 sm:$0xff]  }
  0xf6   :  { %1799 = vmatprep.subr.bf16.mxu0 %v5497_v61  ;;  %1963 = vmatprep.subr.bf16.mxu1 %v5500_v62  ;;  %v5592_v61 = vld [vmem:[#allocation5 + $0x5ac] ss:$16 sps:$4 sm:$0xff]   ;;  %v5587_v62 = vld [vmem:[#allocation5 + $0x5a0] ss:$16 sps:$4 sm:$0xff]  }
  0xf9   :  { %1800 = vmatpush1.bf16.msra.mxu0 %v5495_v63  ;;  %1964 = vmatpush1.bf16.msra.mxu1 %v5498_v0  ;;  %v5590_v63 = vld [vmem:[#allocation5 + $0x5a8] ss:$16 sps:$4 sm:$0xff]   ;;  %v5595_v0 = vld [vmem:[#allocation5 + $0x5c4] ss:$16 sps:$4 sm:$0xff]  }
  0xfa   :  { %1801 = vmatprep.subr.bf16.mxu0 %v5503_v1  ;;  %1965 = vmatprep.subr.bf16.mxu1 %v5506_v2  ;;  %v5598_v1 = vld [vmem:[#allocation5 + $0x5cc] ss:$16 sps:$4 sm:$0xff]   ;;  %v5593_v2 = vld [vmem:[#allocation5 + $0x5c0] ss:$16 sps:$4 sm:$0xff]  }
  0xfd   :  { %1802 = vmatpush1.bf16.msra.mxu0 %v5501_v3  ;;  %1966 = vmatpush1.bf16.msra.mxu1 %v5504_v4  ;;  %v5596_v3 = vld [vmem:[#allocation5 + $0x5c8] ss:$16 sps:$4 sm:$0xff]   ;;  %v5601_v4 = vld [vmem:[#allocation5 + $0x5e4] ss:$16 sps:$4 sm:$0xff]  }
  0xfe   :  { %1812 = vmatprep.subr.bf16.mxu0 %v5511_v5  ;;  %1976 = vmatprep.subr.bf16.mxu1 %v5514_v6  ;;  %v5604_v5 = vld [vmem:[#allocation5 + $0x5ec] ss:$16 sps:$4 sm:$0xff]   ;;  %v5599_v6 = vld [vmem:[#allocation5 + $0x5e0] ss:$16 sps:$4 sm:$0xff]  }
 0x100   :  { %1804 = vmatmul.mubr.bf16.vlgmr.msra.gmra.mrb[0].mxu0 %v4587_v7  ;;  %1968 = vmatmul.mubr.bf16.vlgmr.msra.gmra.mrb[0].mxu1 %v4587_v7  ;;  %v5602_v7 = vld [vmem:[#allocation5 + $0x5e8] ss:$16 sps:$4 sm:$0xff]  }
 0x101   :  { %1813 = vmatpush1.bf16.msra.mxu0 %v5509_v8  ;;  %1977 = vmatpush1.bf16.msra.mxu1 %v5512_v9  ;;  %v5609_v8 = vld [vmem:[#allocation5 + $0x604] ss:$16 sps:$4 sm:$0xff]   ;;  %v5612_v9 = vld [vmem:[#allocation5 + $0x60c] ss:$16 sps:$4 sm:$0xff]  }
 0x102   :  { %1814 = vmatprep.subr.bf16.mxu0 %v5517_v10  ;;  %1978 = vmatprep.subr.bf16.mxu1 %v5520_v12  ;;  %v5607_v10 = vld [vmem:[#allocation5 + $0x600] ss:$16 sps:$4 sm:$0xff]   ;;  %v4589_v12 = vcombine.low %v6502_v11, %v6502_v11  ;;  %v5624_v11 = vld [vmem:[#allocation5 + $0x64c] ss:$16 sps:$4 sm:$0xff]  }
 0x103   :  { %1844 = vmatprep.mubr.bf16.mxu0 %v4590_v13  ;;  %2008 = vmatprep.mubr.bf16.mxu1 %v4590_v13  ;;  %v5610_v13 = vld [vmem:[#allocation5 + $0x608] ss:$16 sps:$4 sm:$0xff]  }
 0x105   :  { %1815 = vmatpush1.bf16.msra.mxu0 %v5515_v14  ;;  %1979 = vmatpush1.bf16.msra.mxu1 %v5518_v15  ;;  %v6508_v14 = vld [vmem:[#allocation2 + $0x18] sm:$0xff]  ;;  %v5615_v15 = vld [vmem:[#allocation5 + $0x624] ss:$16 sps:$4 sm:$0xff]  }
 0x106   :  { %1816 = vmatprep.subr.bf16.mxu0 %v5523_v16  ;;  %1980 = vmatprep.subr.bf16.mxu1 %v5526_v17  ;;  %v5618_v16 = vld [vmem:[#allocation5 + $0x62c] ss:$16 sps:$4 sm:$0xff]   ;;  %v4592_v17 = vcombine.high %v6508_v14, %v6508_v14 }
 0x109   :  { %1817 = vmatpush1.bf16.msra.mxu0 %v5521_v18  ;;  %1981 = vmatpush1.bf16.msra.mxu1 %v5524_v19  ;;  %v5613_v18 = vld [vmem:[#allocation5 + $0x620] ss:$16 sps:$4 sm:$0xff]   ;;  %v5616_v19 = vld [vmem:[#allocation5 + $0x628] ss:$16 sps:$4 sm:$0xff]  }
 0x10a   :  { %1818 = vmatprep.subr.bf16.mxu0 %v5529_v20  ;;  %1982 = vmatprep.subr.bf16.mxu1 %v5532_v21  ;;  %v5621_v20 = vld [vmem:[#allocation5 + $0x644] ss:$16 sps:$4 sm:$0xff]   ;;  %v5619_v21 = vld [vmem:[#allocation5 + $0x640] ss:$16 sps:$4 sm:$0xff]  }
 0x10d   :  { %1819 = vmatpush1.bf16.msra.mxu0 %v5527_v22  ;;  %1983 = vmatpush1.bf16.msra.mxu1 %v5530_v23  ;;  %v5622_v22 = vld [vmem:[#allocation5 + $0x648] ss:$16 sps:$4 sm:$0xff]   ;;  %v5627_v23 = vld [vmem:[#allocation5 + $0x664] ss:$16 sps:$4 sm:$0xff]  }
 0x10e   :  { %1820 = vmatprep.subr.bf16.mxu0 %v5535_v24  ;;  %1984 = vmatprep.subr.bf16.mxu1 %v5538_v25  ;;  %v5630_v24 = vld [vmem:[#allocation5 + $0x66c] ss:$16 sps:$4 sm:$0xff]   ;;  %v5625_v25 = vld [vmem:[#allocation5 + $0x660] ss:$16 sps:$4 sm:$0xff]  }
 0x111   :  { %1821 = vmatpush1.bf16.msra.mxu0 %v5533_v26  ;;  %1985 = vmatpush1.bf16.msra.mxu1 %v5536_v27  ;;  %v5628_v26 = vld [vmem:[#allocation5 + $0x668] ss:$16 sps:$4 sm:$0xff]   ;;  %v5633_v27 = vld [vmem:[#allocation5 + $0x684] ss:$16 sps:$4 sm:$0xff]  }
 0x112   :  { %1822 = vmatprep.subr.bf16.mxu0 %v5541_v28  ;;  %1986 = vmatprep.subr.bf16.mxu1 %v5544_v29  ;;  %v5636_v28 = vld [vmem:[#allocation5 + $0x68c] ss:$16 sps:$4 sm:$0xff]   ;;  %v5631_v29 = vld [vmem:[#allocation5 + $0x680] ss:$16 sps:$4 sm:$0xff]  }
 0x115   :  { %1823 = vmatpush1.bf16.msra.mxu0 %v5539_v30  ;;  %1987 = vmatpush1.bf16.msra.mxu1 %v5542_v31  ;;  %v5634_v30 = vld [vmem:[#allocation5 + $0x688] ss:$16 sps:$4 sm:$0xff]   ;;  %v5639_v31 = vld [vmem:[#allocation5 + $0x6a4] ss:$16 sps:$4 sm:$0xff]  }
 0x116   :  { %1824 = vmatprep.subr.bf16.mxu0 %v5547_v32  ;;  %1988 = vmatprep.subr.bf16.mxu1 %v5550_v33  ;;  %v5642_v32 = vld [vmem:[#allocation5 + $0x6ac] ss:$16 sps:$4 sm:$0xff]   ;;  %v5637_v33 = vld [vmem:[#allocation5 + $0x6a0] ss:$16 sps:$4 sm:$0xff]  }
 0x119   :  { %1825 = vmatpush1.bf16.msra.mxu0 %v5545_v34  ;;  %1989 = vmatpush1.bf16.msra.mxu1 %v5548_v35  ;;  %v5640_v34 = vld [vmem:[#allocation5 + $0x6a8] ss:$16 sps:$4 sm:$0xff]   ;;  %v5645_v35 = vld [vmem:[#allocation5 + $0x6c4] ss:$16 sps:$4 sm:$0xff]  }
 0x11a   :  { %1826 = vmatprep.subr.bf16.mxu0 %v5553_v36  ;;  %1990 = vmatprep.subr.bf16.mxu1 %v5556_v37  ;;  %v5648_v36 = vld [vmem:[#allocation5 + $0x6cc] ss:$16 sps:$4 sm:$0xff]   ;;  %v5643_v37 = vld [vmem:[#allocation5 + $0x6c0] ss:$16 sps:$4 sm:$0xff]  }
 0x11d   :  { %1827 = vmatpush1.bf16.msra.mxu0 %v5551_v38  ;;  %1991 = vmatpush1.bf16.msra.mxu1 %v5554_v39  ;;  %v5646_v38 = vld [vmem:[#allocation5 + $0x6c8] ss:$16 sps:$4 sm:$0xff]   ;;  %v5651_v39 = vld [vmem:[#allocation5 + $0x6e4] ss:$16 sps:$4 sm:$0xff]  }
 0x11e   :  { %1828 = vmatprep.subr.bf16.mxu0 %v5559_v40  ;;  %1992 = vmatprep.subr.bf16.mxu1 %v5562_v41  ;;  %v5654_v40 = vld [vmem:[#allocation5 + $0x6ec] ss:$16 sps:$4 sm:$0xff]   ;;  %v5649_v41 = vld [vmem:[#allocation5 + $0x6e0] ss:$16 sps:$4 sm:$0xff]  }
 0x121   :  { %1829 = vmatpush1.bf16.msra.mxu0 %v5557_v42  ;;  %1993 = vmatpush1.bf16.msra.mxu1 %v5560_v43  ;;  %v5652_v42 = vld [vmem:[#allocation5 + $0x6e8] ss:$16 sps:$4 sm:$0xff]   ;;  %v5657_v43 = vld [vmem:[#allocation5 + $0x704] ss:$16 sps:$4 sm:$0xff]  }
 0x122   :  { %1830 = vmatprep.subr.bf16.mxu0 %v5565_v44  ;;  %1994 = vmatprep.subr.bf16.mxu1 %v5568_v45  ;;  %v5660_v44 = vld [vmem:[#allocation5 + $0x70c] ss:$16 sps:$4 sm:$0xff]   ;;  %v5655_v45 = vld [vmem:[#allocation5 + $0x700] ss:$16 sps:$4 sm:$0xff]  }
 0x125   :  { %1831 = vmatpush1.bf16.msra.mxu0 %v5563_v46  ;;  %1995 = vmatpush1.bf16.msra.mxu1 %v5566_v47  ;;  %v5658_v46 = vld [vmem:[#allocation5 + $0x708] ss:$16 sps:$4 sm:$0xff]   ;;  %v5663_v47 = vld [vmem:[#allocation5 + $0x724] ss:$16 sps:$4 sm:$0xff]  }
 0x126   :  { %1832 = vmatprep.subr.bf16.mxu0 %v5571_v48  ;;  %1996 = vmatprep.subr.bf16.mxu1 %v5574_v49  ;;  %v5666_v48 = vld [vmem:[#allocation5 + $0x72c] ss:$16 sps:$4 sm:$0xff]   ;;  %v5661_v49 = vld [vmem:[#allocation5 + $0x720] ss:$16 sps:$4 sm:$0xff]  }
 0x129   :  { %1833 = vmatpush1.bf16.msra.mxu0 %v5569_v50  ;;  %1997 = vmatpush1.bf16.msra.mxu1 %v5572_v51  ;;  %v5664_v50 = vld [vmem:[#allocation5 + $0x728] ss:$16 sps:$4 sm:$0xff]   ;;  %v5669_v51 = vld [vmem:[#allocation5 + $0x744] ss:$16 sps:$4 sm:$0xff]  }
 0x12a   :  { %1834 = vmatprep.subr.bf16.mxu0 %v5577_v52  ;;  %1998 = vmatprep.subr.bf16.mxu1 %v5580_v53  ;;  %v5672_v52 = vld [vmem:[#allocation5 + $0x74c] ss:$16 sps:$4 sm:$0xff]   ;;  %v5667_v53 = vld [vmem:[#allocation5 + $0x740] ss:$16 sps:$4 sm:$0xff]  }
 0x12d   :  { %1835 = vmatpush1.bf16.msra.mxu0 %v5575_v54  ;;  %1999 = vmatpush1.bf16.msra.mxu1 %v5578_v55  ;;  %v5670_v54 = vld [vmem:[#allocation5 + $0x748] ss:$16 sps:$4 sm:$0xff]   ;;  %v5675_v55 = vld [vmem:[#allocation5 + $0x764] ss:$16 sps:$4 sm:$0xff]  }
 0x12e   :  { %1836 = vmatprep.subr.bf16.mxu0 %v5583_v56  ;;  %2000 = vmatprep.subr.bf16.mxu1 %v5586_v57  ;;  %v5678_v56 = vld [vmem:[#allocation5 + $0x76c] ss:$16 sps:$4 sm:$0xff]   ;;  %v5673_v57 = vld [vmem:[#allocation5 + $0x760] ss:$16 sps:$4 sm:$0xff]  }
 0x131   :  { %1837 = vmatpush1.bf16.msra.mxu0 %v5581_v58  ;;  %2001 = vmatpush1.bf16.msra.mxu1 %v5584_v59  ;;  %v5676_v58 = vld [vmem:[#allocation5 + $0x768] ss:$16 sps:$4 sm:$0xff]   ;;  %v5681_v59 = vld [vmem:[#allocation5 + $0x784] ss:$16 sps:$4 sm:$0xff]  }
 0x132   :  { %1838 = vmatprep.subr.bf16.mxu0 %v5589_v60  ;;  %2002 = vmatprep.subr.bf16.mxu1 %v5592_v61  ;;  %v5684_v60 = vld [vmem:[#allocation5 + $0x78c] ss:$16 sps:$4 sm:$0xff]   ;;  %v5679_v61 = vld [vmem:[#allocation5 + $0x780] ss:$16 sps:$4 sm:$0xff]  }
 0x135   :  { %1839 = vmatpush1.bf16.msra.mxu0 %v5587_v62  ;;  %2003 = vmatpush1.bf16.msra.mxu1 %v5590_v63  ;;  %v5682_v62 = vld [vmem:[#allocation5 + $0x788] ss:$16 sps:$4 sm:$0xff]   ;;  %v5687_v63 = vld [vmem:[#allocation5 + $0x7a4] ss:$16 sps:$4 sm:$0xff]  }
 0x136   :  { %1840 = vmatprep.subr.bf16.mxu0 %v5595_v0  ;;  %2004 = vmatprep.subr.bf16.mxu1 %v5598_v1  ;;  %v5690_v0 = vld [vmem:[#allocation5 + $0x7ac] ss:$16 sps:$4 sm:$0xff]   ;;  %v5685_v1 = vld [vmem:[#allocation5 + $0x7a0] ss:$16 sps:$4 sm:$0xff]  }
 0x139   :  { %1841 = vmatpush1.bf16.msra.mxu0 %v5593_v2  ;;  %2005 = vmatpush1.bf16.msra.mxu1 %v5596_v3  ;;  %v5688_v2 = vld [vmem:[#allocation5 + $0x7a8] ss:$16 sps:$4 sm:$0xff]   ;;  %v5693_v3 = vld [vmem:[#allocation5 + $0x7c4] ss:$16 sps:$4 sm:$0xff]  }
 0x13a   :  { %1842 = vmatprep.subr.bf16.mxu0 %v5601_v4  ;;  %2006 = vmatprep.subr.bf16.mxu1 %v5604_v5  ;;  %v5696_v4 = vld [vmem:[#allocation5 + $0x7cc] ss:$16 sps:$4 sm:$0xff]   ;;  %v5691_v5 = vld [vmem:[#allocation5 + $0x7c0] ss:$16 sps:$4 sm:$0xff]  }
 0x13d   :  { %1843 = vmatpush1.bf16.msra.mxu0 %v5599_v6  ;;  %2007 = vmatpush1.bf16.msra.mxu1 %v5602_v7  ;;  %v5694_v6 = vld [vmem:[#allocation5 + $0x7c8] ss:$16 sps:$4 sm:$0xff]   ;;  %v5699_v7 = vld [vmem:[#allocation5 + $0x7e4] ss:$16 sps:$4 sm:$0xff]  }
 0x13e   :  { %1853 = vmatprep.subr.bf16.mxu0 %v5609_v8  ;;  %2017 = vmatprep.subr.bf16.mxu1 %v5612_v9  ;;  %v5702_v8 = vld [vmem:[#allocation5 + $0x7ec] ss:$16 sps:$4 sm:$0xff]   ;;  %v5697_v9 = vld [vmem:[#allocation5 + $0x7e0] ss:$16 sps:$4 sm:$0xff]  }
 0x140   :  { %1845 = vmatmul.mubr.bf16.vlgmr.msra.gmra.mrb[0].mxu0 %v4589_v12  ;;  %2009 = vmatmul.mubr.bf16.vlgmr.msra.gmra.mrb[0].mxu1 %v4589_v12  ;;  %v5707_v12 = vld [vmem:[#allocation7 + $0x4] ss:$16 sps:$4 sm:$0xff]  }
 0x141   :  { %1854 = vmatpush1.bf16.msra.mxu0 %v5607_v10  ;;  %2018 = vmatpush1.bf16.msra.mxu1 %v5610_v13  ;;  %v5700_v10 = vld [vmem:[#allocation5 + $0x7e8] ss:$16 sps:$4 sm:$0xff]   ;;  %v5710_v13 = vld [vmem:[#allocation7 + $0xc] ss:$16 sps:$4 sm:$0xff]  }
 0x142   :  { %1855 = vmatprep.subr.bf16.mxu0 %v5615_v15  ;;  %2019 = vmatprep.subr.bf16.mxu1 %v5618_v16  ;;  %v5705_v15 = vld [vmem:[#allocation7] ss:$16 sps:$4 sm:$0xff]   ;;  %v5708_v16 = vld [vmem:[#allocation7 + $0x8] ss:$16 sps:$4 sm:$0xff]  }
 0x143   :  { %1885 = vmatprep.mubr.bf16.mxu0 %v4592_v17  ;;  %2049 = vmatprep.mubr.bf16.mxu1 %v4592_v17  ;;  %v4591_v17 = vcombine.low %v6508_v14, %v6508_v14  ;;  %v5728_v14 = vld [vmem:[#allocation7 + $0x6c] ss:$16 sps:$4 sm:$0xff]  }
 0x145   :  { %1856 = vmatpush1.bf16.msra.mxu0 %v5613_v18  ;;  %2020 = vmatpush1.bf16.msra.mxu1 %v5616_v19  ;;  %v5713_v18 = vld [vmem:[#allocation7 + $0x24] ss:$16 sps:$4 sm:$0xff]   ;;  %v5716_v19 = vld [vmem:[#allocation7 + $0x2c] ss:$16 sps:$4 sm:$0xff]  }
 0x146   :  { %1857 = vmatprep.subr.bf16.mxu0 %v5621_v20  ;;  %2021 = vmatprep.subr.bf16.mxu1 %v5624_v11  ;;  %v5711_v20 = vld [vmem:[#allocation7 + $0x20] ss:$16 sps:$4 sm:$0xff]   ;;  %v5714_v11 = vld [vmem:[#allocation7 + $0x28] ss:$16 sps:$4 sm:$0xff]  }
 0x149   :  { %1858 = vmatpush1.bf16.msra.mxu0 %v5619_v21  ;;  %2022 = vmatpush1.bf16.msra.mxu1 %v5622_v22  ;;  %v5719_v21 = vld [vmem:[#allocation7 + $0x44] ss:$16 sps:$4 sm:$0xff]   ;;  %v5722_v22 = vld [vmem:[#allocation7 + $0x4c] ss:$16 sps:$4 sm:$0xff]  }
 0x14a   :  { %1859 = vmatprep.subr.bf16.mxu0 %v5627_v23  ;;  %2023 = vmatprep.subr.bf16.mxu1 %v5630_v24  ;;  %v5717_v23 = vld [vmem:[#allocation7 + $0x40] ss:$16 sps:$4 sm:$0xff]   ;;  %v5720_v24 = vld [vmem:[#allocation7 + $0x48] ss:$16 sps:$4 sm:$0xff]  }
 0x14d   :  { %1860 = vmatpush1.bf16.msra.mxu0 %v5625_v25  ;;  %2024 = vmatpush1.bf16.msra.mxu1 %v5628_v26  ;;  %v5725_v25 = vld [vmem:[#allocation7 + $0x64] ss:$16 sps:$4 sm:$0xff]   ;;  %v5723_v26 = vld [vmem:[#allocation7 + $0x60] ss:$16 sps:$4 sm:$0xff]  }
 0x14e   :  { %1861 = vmatprep.subr.bf16.mxu0 %v5633_v27  ;;  %2025 = vmatprep.subr.bf16.mxu1 %v5636_v28  ;;  %v5726_v27 = vld [vmem:[#allocation7 + $0x68] ss:$16 sps:$4 sm:$0xff]   ;;  %v5731_v28 = vld [vmem:[#allocation7 + $0x84] ss:$16 sps:$4 sm:$0xff]  }
 0x151   :  { %1862 = vmatpush1.bf16.msra.mxu0 %v5631_v29  ;;  %2026 = vmatpush1.bf16.msra.mxu1 %v5634_v30  ;;  %v5734_v29 = vld [vmem:[#allocation7 + $0x8c] ss:$16 sps:$4 sm:$0xff]   ;;  %v5729_v30 = vld [vmem:[#allocation7 + $0x80] ss:$16 sps:$4 sm:$0xff]  }
 0x152   :  { %1863 = vmatprep.subr.bf16.mxu0 %v5639_v31  ;;  %2027 = vmatprep.subr.bf16.mxu1 %v5642_v32  ;;  %v5732_v31 = vld [vmem:[#allocation7 + $0x88] ss:$16 sps:$4 sm:$0xff]   ;;  %v5737_v32 = vld [vmem:[#allocation7 + $0xa4] ss:$16 sps:$4 sm:$0xff]  }
 0x155   :  { %1864 = vmatpush1.bf16.msra.mxu0 %v5637_v33  ;;  %2028 = vmatpush1.bf16.msra.mxu1 %v5640_v34  ;;  %v5740_v33 = vld [vmem:[#allocation7 + $0xac] ss:$16 sps:$4 sm:$0xff]   ;;  %v5735_v34 = vld [vmem:[#allocation7 + $0xa0] ss:$16 sps:$4 sm:$0xff]  }
 0x156   :  { %1865 = vmatprep.subr.bf16.mxu0 %v5645_v35  ;;  %2029 = vmatprep.subr.bf16.mxu1 %v5648_v36  ;;  %v5738_v35 = vld [vmem:[#allocation7 + $0xa8] ss:$16 sps:$4 sm:$0xff]   ;;  %v5743_v36 = vld [vmem:[#allocation7 + $0xc4] ss:$16 sps:$4 sm:$0xff]  }
 0x159   :  { %1866 = vmatpush1.bf16.msra.mxu0 %v5643_v37  ;;  %2030 = vmatpush1.bf16.msra.mxu1 %v5646_v38  ;;  %v5746_v37 = vld [vmem:[#allocation7 + $0xcc] ss:$16 sps:$4 sm:$0xff]   ;;  %v5741_v38 = vld [vmem:[#allocation7 + $0xc0] ss:$16 sps:$4 sm:$0xff]  }
 0x15a   :  { %1867 = vmatprep.subr.bf16.mxu0 %v5651_v39  ;;  %2031 = vmatprep.subr.bf16.mxu1 %v5654_v40  ;;  %v5744_v39 = vld [vmem:[#allocation7 + $0xc8] ss:$16 sps:$4 sm:$0xff]   ;;  %v5749_v40 = vld [vmem:[#allocation7 + $0xe4] ss:$16 sps:$4 sm:$0xff]  }
 0x15d   :  { %1868 = vmatpush1.bf16.msra.mxu0 %v5649_v41  ;;  %2032 = vmatpush1.bf16.msra.mxu1 %v5652_v42  ;;  %v5752_v41 = vld [vmem:[#allocation7 + $0xec] ss:$16 sps:$4 sm:$0xff]   ;;  %v5747_v42 = vld [vmem:[#allocation7 + $0xe0] ss:$16 sps:$4 sm:$0xff]  }
 0x15e   :  { %1869 = vmatprep.subr.bf16.mxu0 %v5657_v43  ;;  %2033 = vmatprep.subr.bf16.mxu1 %v5660_v44  ;;  %v5750_v43 = vld [vmem:[#allocation7 + $0xe8] ss:$16 sps:$4 sm:$0xff]   ;;  %v5755_v44 = vld [vmem:[#allocation7 + $0x104] ss:$16 sps:$4 sm:$0xff]  }
 0x161   :  { %1870 = vmatpush1.bf16.msra.mxu0 %v5655_v45  ;;  %2034 = vmatpush1.bf16.msra.mxu1 %v5658_v46  ;;  %v5758_v45 = vld [vmem:[#allocation7 + $0x10c] ss:$16 sps:$4 sm:$0xff]   ;;  %v5753_v46 = vld [vmem:[#allocation7 + $0x100] ss:$16 sps:$4 sm:$0xff]  }
 0x162   :  { %1871 = vmatprep.subr.bf16.mxu0 %v5663_v47  ;;  %2035 = vmatprep.subr.bf16.mxu1 %v5666_v48  ;;  %v5756_v47 = vld [vmem:[#allocation7 + $0x108] ss:$16 sps:$4 sm:$0xff]   ;;  %v5761_v48 = vld [vmem:[#allocation7 + $0x124] ss:$16 sps:$4 sm:$0xff]  }
 0x165   :  { %1872 = vmatpush1.bf16.msra.mxu0 %v5661_v49  ;;  %2036 = vmatpush1.bf16.msra.mxu1 %v5664_v50  ;;  %v5764_v49 = vld [vmem:[#allocation7 + $0x12c] ss:$16 sps:$4 sm:$0xff]   ;;  %v5759_v50 = vld [vmem:[#allocation7 + $0x120] ss:$16 sps:$4 sm:$0xff]  }
 0x166   :  { %1873 = vmatprep.subr.bf16.mxu0 %v5669_v51  ;;  %2037 = vmatprep.subr.bf16.mxu1 %v5672_v52  ;;  %v5762_v51 = vld [vmem:[#allocation7 + $0x128] ss:$16 sps:$4 sm:$0xff]   ;;  %v5767_v52 = vld [vmem:[#allocation7 + $0x144] ss:$16 sps:$4 sm:$0xff]  }
 0x169   :  { %1874 = vmatpush1.bf16.msra.mxu0 %v5667_v53  ;;  %2038 = vmatpush1.bf16.msra.mxu1 %v5670_v54  ;;  %v5770_v53 = vld [vmem:[#allocation7 + $0x14c] ss:$16 sps:$4 sm:$0xff]   ;;  %v5765_v54 = vld [vmem:[#allocation7 + $0x140] ss:$16 sps:$4 sm:$0xff]  }
 0x16a   :  { %1875 = vmatprep.subr.bf16.mxu0 %v5675_v55  ;;  %2039 = vmatprep.subr.bf16.mxu1 %v5678_v56  ;;  %v5768_v55 = vld [vmem:[#allocation7 + $0x148] ss:$16 sps:$4 sm:$0xff]   ;;  %v5773_v56 = vld [vmem:[#allocation7 + $0x164] ss:$16 sps:$4 sm:$0xff]  }
 0x16d   :  { %1876 = vmatpush1.bf16.msra.mxu0 %v5673_v57  ;;  %2040 = vmatpush1.bf16.msra.mxu1 %v5676_v58  ;;  %v5776_v57 = vld [vmem:[#allocation7 + $0x16c] ss:$16 sps:$4 sm:$0xff]   ;;  %v5771_v58 = vld [vmem:[#allocation7 + $0x160] ss:$16 sps:$4 sm:$0xff]  }
 0x16e   :  { %1877 = vmatprep.subr.bf16.mxu0 %v5681_v59  ;;  %2041 = vmatprep.subr.bf16.mxu1 %v5684_v60  ;;  %v5774_v59 = vld [vmem:[#allocation7 + $0x168] ss:$16 sps:$4 sm:$0xff]   ;;  %v5779_v60 = vld [vmem:[#allocation7 + $0x184] ss:$16 sps:$4 sm:$0xff]  }
 0x171   :  { %1878 = vmatpush1.bf16.msra.mxu0 %v5679_v61  ;;  %2042 = vmatpush1.bf16.msra.mxu1 %v5682_v62  ;;  %v5782_v61 = vld [vmem:[#allocation7 + $0x18c] ss:$16 sps:$4 sm:$0xff]   ;;  %v5777_v62 = vld [vmem:[#allocation7 + $0x180] ss:$16 sps:$4 sm:$0xff]  }
 0x172   :  { %1879 = vmatprep.subr.bf16.mxu0 %v5687_v63  ;;  %2043 = vmatprep.subr.bf16.mxu1 %v5690_v0  ;;  %v5780_v63 = vld [vmem:[#allocation7 + $0x188] ss:$16 sps:$4 sm:$0xff]   ;;  %v5785_v0 = vld [vmem:[#allocation7 + $0x1a4] ss:$16 sps:$4 sm:$0xff]  }
 0x175   :  { %1880 = vmatpush1.bf16.msra.mxu0 %v5685_v1  ;;  %2044 = vmatpush1.bf16.msra.mxu1 %v5688_v2  ;;  %v5788_v1 = vld [vmem:[#allocation7 + $0x1ac] ss:$16 sps:$4 sm:$0xff]   ;;  %v5783_v2 = vld [vmem:[#allocation7 + $0x1a0] ss:$16 sps:$4 sm:$0xff]  }
 0x176   :  { %1881 = vmatprep.subr.bf16.mxu0 %v5693_v3  ;;  %2045 = vmatprep.subr.bf16.mxu1 %v5696_v4  ;;  %v5786_v3 = vld [vmem:[#allocation7 + $0x1a8] ss:$16 sps:$4 sm:$0xff]   ;;  %v5791_v4 = vld [vmem:[#allocation7 + $0x1c4] ss:$16 sps:$4 sm:$0xff]  }
 0x179   :  { %1882 = vmatpush1.bf16.msra.mxu0 %v5691_v5  ;;  %2046 = vmatpush1.bf16.msra.mxu1 %v5694_v6  ;;  %v5794_v5 = vld [vmem:[#allocation7 + $0x1cc] ss:$16 sps:$4 sm:$0xff]   ;;  %v5789_v6 = vld [vmem:[#allocation7 + $0x1c0] ss:$16 sps:$4 sm:$0xff]  }
 0x17a   :  { %1883 = vmatprep.subr.bf16.mxu0 %v5699_v7  ;;  %2047 = vmatprep.subr.bf16.mxu1 %v5702_v8  ;;  %v5792_v7 = vld [vmem:[#allocation7 + $0x1c8] ss:$16 sps:$4 sm:$0xff]   ;;  %v5797_v8 = vld [vmem:[#allocation7 + $0x1e4] ss:$16 sps:$4 sm:$0xff]  }
 0x17d   :  { %1884 = vmatpush1.bf16.msra.mxu0 %v5697_v9  ;;  %2048 = vmatpush1.bf16.msra.mxu1 %v5700_v10  ;;  %v5800_v9 = vld [vmem:[#allocation7 + $0x1ec] ss:$16 sps:$4 sm:$0xff]   ;;  %v5795_v10 = vld [vmem:[#allocation7 + $0x1e0] ss:$16 sps:$4 sm:$0xff]  }
 0x17e   :  { %2864 = vmatprep.subr.bf16.mxu0 %v5707_v12  ;;  %2946 = vmatprep.subr.bf16.mxu1 %v5710_v13  ;;  %v5798_v12 = vld [vmem:[#allocation7 + $0x1e8] ss:$16 sps:$4 sm:$0xff]   ;;  %v5803_v13 = vld [vmem:[#allocation7 + $0x204] ss:$16 sps:$4 sm:$0xff]  }
 0x180   :  { %1886 = vmatmul.mubr.bf16.vlgmr.msra.gmra.mrb[0].mxu0 %v4591_v17  ;;  %2050 = vmatmul.mubr.bf16.vlgmr.msra.gmra.mrb[0].mxu1 %v4591_v17 }
 0x181   :  { %2865 = vmatpush1.bf16.msra.mxu0 %v5705_v15  ;;  %2947 = vmatpush1.bf16.msra.mxu1 %v5708_v16  ;;  %v5806_v15 = vld [vmem:[#allocation7 + $0x20c] ss:$16 sps:$4 sm:$0xff]   ;;  %v402_v16 = vlaneseq }
 0x182   :  { %2866 = vmatprep.subr.bf16.mxu0 %v5713_v18  ;;  %2948 = vmatprep.subr.bf16.mxu1 %v5716_v19  ;;  %v6522_v19 = vld [vmem:[%s6591_s2] sm:$0xf] }
 0x183   :  { %v6514_v17 = vshrl.u32 %v402_v16, 7  ;;  %v5860_v16 = vld [vmem:[#allocation7 + $0x32c] ss:$16 sps:$4 sm:$0xff]  }
 0x185   :  { %2867 = vmatpush1.bf16.msra.mxu0 %v5711_v20  ;;  %2949 = vmatpush1.bf16.msra.mxu1 %v5714_v11  ;;  %v6517_v18 = vsub.s32 0, %v6514_v17  ;;  %v6525_v20 = vsub.s32 1, %v6514_v17  ;;  %v416_v11 = vsub.s32 3, %v6514_v17 }
 0x186   :  { %2868 = vmatprep.subr.bf16.mxu0 %v5719_v21  ;;  %2950 = vmatprep.subr.bf16.mxu1 %v5722_v22 }
 0x187   :  { %v405_v21 = vrot.slane %v6522_v19, %v6517_v18  ;;  %v409_v22 = vrot.slane %v6522_v19, %v6525_v20 }
 0x189   :  { %2869 = vmatpush1.bf16.msra.mxu0 %v5717_v23  ;;  %2951 = vmatpush1.bf16.msra.mxu1 %v5720_v24  ;;  %v417_v23 = vrot.slane %v6522_v19, %v416_v11 }
 0x18a   :  { %2870 = vmatprep.subr.bf16.mxu0 %v5725_v25  ;;  %2952 = vmatprep.subr.bf16.mxu1 %v5728_v14 }
 0x18d   :  { %2871 = vmatpush1.bf16.msra.mxu0 %v5723_v26  ;;  %2953 = vmatpush1.bf16.msra.mxu1 %v5726_v27 }
 0x18e   :  { %2872 = vmatprep.subr.bf16.mxu0 %v5731_v28  ;;  %2954 = vmatprep.subr.bf16.mxu1 %v5734_v29 }
 0x191   :  { %2873 = vmatpush1.bf16.msra.mxu0 %v5729_v30  ;;  %2955 = vmatpush1.bf16.msra.mxu1 %v5732_v31 }
 0x192   :  { %2874 = vmatprep.subr.bf16.mxu0 %v5737_v32  ;;  %2956 = vmatprep.subr.bf16.mxu1 %v5740_v33 }
 0x195   :  { %2875 = vmatpush1.bf16.msra.mxu0 %v5735_v34  ;;  %2957 = vmatpush1.bf16.msra.mxu1 %v5738_v35 }
 0x196   :  { %2876 = vmatprep.subr.bf16.mxu0 %v5743_v36  ;;  %2958 = vmatprep.subr.bf16.mxu1 %v5746_v37 }
 0x199   :  { %2877 = vmatpush1.bf16.msra.mxu0 %v5741_v38  ;;  %2959 = vmatpush1.bf16.msra.mxu1 %v5744_v39 }
 0x19a   :  { %2878 = vmatprep.subr.bf16.mxu0 %v5749_v40  ;;  %2960 = vmatprep.subr.bf16.mxu1 %v5752_v41  ;;  %v5801_v40 = vld [vmem:[#allocation7 + $0x200] ss:$16 sps:$4 sm:$0xff]   ;;  %v5804_v41 = vld [vmem:[#allocation7 + $0x208] ss:$16 sps:$4 sm:$0xff]  }
 0x19d   :  { %2879 = vmatpush1.bf16.msra.mxu0 %v5747_v42  ;;  %2961 = vmatpush1.bf16.msra.mxu1 %v5750_v43 }
 0x19e   :  { %2880 = vmatprep.subr.bf16.mxu0 %v5755_v44  ;;  %2962 = vmatprep.subr.bf16.mxu1 %v5758_v45  ;;  %v5809_v44 = vld [vmem:[#allocation7 + $0x224] ss:$16 sps:$4 sm:$0xff]   ;;  %v5812_v45 = vld [vmem:[#allocation7 + $0x22c] ss:$16 sps:$4 sm:$0xff]  }
 0x1a1   :  { %2881 = vmatpush1.bf16.msra.mxu0 %v5753_v46  ;;  %2963 = vmatpush1.bf16.msra.mxu1 %v5756_v47  ;;  %v5807_v47 = vld [vmem:[#allocation7 + $0x220] ss:$16 sps:$4 sm:$0xff]  }
 0x1a2   :  { %2882 = vmatprep.subr.bf16.mxu0 %v5761_v48  ;;  %2964 = vmatprep.subr.bf16.mxu1 %v5764_v49  ;;  %v5810_v48 = vld [vmem:[#allocation7 + $0x228] ss:$16 sps:$4 sm:$0xff]   ;;  %v5815_v49 = vld [vmem:[#allocation7 + $0x244] ss:$16 sps:$4 sm:$0xff]  }
 0x1a5   :  { %2883 = vmatpush1.bf16.msra.mxu0 %v5759_v50  ;;  %2965 = vmatpush1.bf16.msra.mxu1 %v5762_v51  ;;  %v5818_v50 = vld [vmem:[#allocation7 + $0x24c] ss:$16 sps:$4 sm:$0xff]   ;;  %v5813_v51 = vld [vmem:[#allocation7 + $0x240] ss:$16 sps:$4 sm:$0xff]  }
 0x1a6   :  { %2884 = vmatprep.subr.bf16.mxu0 %v5767_v52  ;;  %2966 = vmatprep.subr.bf16.mxu1 %v5770_v53  ;;  %v5816_v52 = vld [vmem:[#allocation7 + $0x248] ss:$16 sps:$4 sm:$0xff]   ;;  %v5821_v53 = vld [vmem:[#allocation7 + $0x264] ss:$16 sps:$4 sm:$0xff]  }
 0x1a9   :  { %2885 = vmatpush1.bf16.msra.mxu0 %v5765_v54  ;;  %2967 = vmatpush1.bf16.msra.mxu1 %v5768_v55  ;;  %v5824_v54 = vld [vmem:[#allocation7 + $0x26c] ss:$16 sps:$4 sm:$0xff]   ;;  %v5819_v55 = vld [vmem:[#allocation7 + $0x260] ss:$16 sps:$4 sm:$0xff]  }
 0x1aa   :  { %2886 = vmatprep.subr.bf16.mxu0 %v5773_v56  ;;  %2968 = vmatprep.subr.bf16.mxu1 %v5776_v57  ;;  %v5822_v56 = vld [vmem:[#allocation7 + $0x268] ss:$16 sps:$4 sm:$0xff]   ;;  %v5827_v57 = vld [vmem:[#allocation7 + $0x284] ss:$16 sps:$4 sm:$0xff]  }
 0x1ad   :  { %2887 = vmatpush1.bf16.msra.mxu0 %v5771_v58  ;;  %2969 = vmatpush1.bf16.msra.mxu1 %v5774_v59  ;;  %v5830_v58 = vld [vmem:[#allocation7 + $0x28c] ss:$16 sps:$4 sm:$0xff]   ;;  %v5825_v59 = vld [vmem:[#allocation7 + $0x280] ss:$16 sps:$4 sm:$0xff]  }
 0x1ae   :  { %2888 = vmatprep.subr.bf16.mxu0 %v5779_v60  ;;  %2970 = vmatprep.subr.bf16.mxu1 %v5782_v61  ;;  %v5828_v60 = vld [vmem:[#allocation7 + $0x288] ss:$16 sps:$4 sm:$0xff]   ;;  %v5833_v61 = vld [vmem:[#allocation7 + $0x2a4] ss:$16 sps:$4 sm:$0xff]  }
 0x1b1   :  { %2889 = vmatpush1.bf16.msra.mxu0 %v5777_v62  ;;  %2971 = vmatpush1.bf16.msra.mxu1 %v5780_v63  ;;  %v5836_v62 = vld [vmem:[#allocation7 + $0x2ac] ss:$16 sps:$4 sm:$0xff]   ;;  %v5831_v63 = vld [vmem:[#allocation7 + $0x2a0] ss:$16 sps:$4 sm:$0xff]  }
 0x1b2   :  { %2890 = vmatprep.subr.bf16.mxu0 %v5785_v0  ;;  %2972 = vmatprep.subr.bf16.mxu1 %v5788_v1  ;;  %v5834_v0 = vld [vmem:[#allocation7 + $0x2a8] ss:$16 sps:$4 sm:$0xff]   ;;  %v5839_v1 = vld [vmem:[#allocation7 + $0x2c4] ss:$16 sps:$4 sm:$0xff]  }
 0x1b5   :  { %2891 = vmatpush1.bf16.msra.mxu0 %v5783_v2  ;;  %2973 = vmatpush1.bf16.msra.mxu1 %v5786_v3  ;;  %v5842_v2 = vld [vmem:[#allocation7 + $0x2cc] ss:$16 sps:$4 sm:$0xff]   ;;  %v5837_v3 = vld [vmem:[#allocation7 + $0x2c0] ss:$16 sps:$4 sm:$0xff]  }
 0x1b6   :  { %2892 = vmatprep.subr.bf16.mxu0 %v5791_v4  ;;  %2974 = vmatprep.subr.bf16.mxu1 %v5794_v5  ;;  %v5840_v4 = vld [vmem:[#allocation7 + $0x2c8] ss:$16 sps:$4 sm:$0xff]   ;;  %v5845_v5 = vld [vmem:[#allocation7 + $0x2e4] ss:$16 sps:$4 sm:$0xff]  }
 0x1b9   :  { %2893 = vmatpush1.bf16.msra.mxu0 %v5789_v6  ;;  %2975 = vmatpush1.bf16.msra.mxu1 %v5792_v7  ;;  %v5848_v6 = vld [vmem:[#allocation7 + $0x2ec] ss:$16 sps:$4 sm:$0xff]   ;;  %v5843_v7 = vld [vmem:[#allocation7 + $0x2e0] ss:$16 sps:$4 sm:$0xff]  }
 0x1ba   :  { %2894 = vmatprep.subr.bf16.mxu0 %v5797_v8  ;;  %2976 = vmatprep.subr.bf16.mxu1 %v5800_v9  ;;  %v5846_v8 = vld [vmem:[#allocation7 + $0x2e8] ss:$16 sps:$4 sm:$0xff]   ;;  %v5851_v9 = vld [vmem:[#allocation7 + $0x304] ss:$16 sps:$4 sm:$0xff]  }
 0x1bd   :  { %2895 = vmatpush1.bf16.msra.mxu0 %v5795_v10  ;;  %2977 = vmatpush1.bf16.msra.mxu1 %v5798_v12  ;;  %v5854_v10 = vld [vmem:[#allocation7 + $0x30c] ss:$16 sps:$4 sm:$0xff]   ;;  %v5849_v12 = vld [vmem:[#allocation7 + $0x300] ss:$16 sps:$4 sm:$0xff]  }
 0x1be   :  { %2905 = vmatprep.subr.bf16.mxu0 %v5803_v13  ;;  %2987 = vmatprep.subr.bf16.mxu1 %v5806_v15  ;;  %v5852_v13 = vld [vmem:[#allocation7 + $0x308] ss:$16 sps:$4 sm:$0xff]   ;;  %v5857_v15 = vld [vmem:[#allocation7 + $0x324] ss:$16 sps:$4 sm:$0xff]  }
 0x253   :  { %v1887_v24 = vpop.f32.mrb[0].mxu0  ;;  %v6535_v25 = vpop.f32.mrb[0].mxu1 }
 0x254   :  { %v5242_v14 = vadd.f32 %v1887_v24, %v405_v21  ;;  %v1889_v26 = vpop.f32.mrb[1].mxu0  ;;  %v2053_v27 = vpop.f32.mrb[1].mxu1  ;;  %v5855_v21 = vld [vmem:[#allocation7 + $0x320] ss:$16 sps:$4 sm:$0xff]   ;;  %v5866_v24 = vld [vmem:[#allocation7 + $0x34c] ss:$16 sps:$4 sm:$0xff]  }
 0x255   :  { %v5243_v28 = vadd.f32 %v1889_v26, %v409_v22  ;;  %v5245_v29 = vadd.f32 %v2053_v27, %v417_v23  ;;  %v1891_v30 = vpop.f32.mrb[2].mxu0  ;;  %v2055_v31 = vpop.f32.mrb[2].mxu1  ;;  %v5858_v22 = vld [vmem:[#allocation7 + $0x328] ss:$16 sps:$4 sm:$0xff]   ;;  %v5863_v23 = vld [vmem:[#allocation7 + $0x344] ss:$16 sps:$4 sm:$0xff]  }
 0x256   :  { %v2058_v32 = vpack.c.bf16 %v5242_v14, %v5242_v14  ;;  %v1892_v33 = vpop.f32.mrb[3].mxu0  ;;  %v2056_v34 = vpop.f32.mrb[3].mxu1  ;;  %v5861_v14 = vld [vmem:[#allocation7 + $0x340] ss:$16 sps:$4 sm:$0xff]   ;;  %v5864_v26 = vld [vmem:[#allocation7 + $0x348] ss:$16 sps:$4 sm:$0xff]  }
 0x257   :  { %v2059_v35 = vpack.c.bf16 %v5243_v28, %v5243_v28  ;;  %v2061_v36 = vpack.c.bf16 %v5245_v29, %v5245_v29  ;;  %v5869_v27 = vld [vmem:[#allocation7 + $0x364] ss:$16 sps:$4 sm:$0xff]   ;;  %v5872_v28 = vld [vmem:[#allocation7 + $0x36c] ss:$16 sps:$4 sm:$0xff]   ;;  %v5867_v29 = vld [vmem:[#allocation7 + $0x360] ss:$16 sps:$4 sm:$0xff]  }
 0x258   :  { %v2066_v37 = vmul.bf16 1009007652, %v2058_v32  ;;  %vm2062_vm0 = vcmp.ge.bf16.partialorder %v2058_v32, 0  ;;  %v5870_v30 = vld [vmem:[#allocation7 + $0x368] ss:$16 sps:$4 sm:$0xff]   ;;  %v6538_v33 = vsub.s32 2, %v6514_v17 }
 0x259   :  { %v2067_v38 = vmul.bf16 1009007652, %v2059_v35  ;;  %vm2063_vm1 = vcmp.ge.bf16.partialorder %v2059_v35, 0  ;;  %v2069_v39 = vmul.bf16 1009007652, %v2061_v36  ;;  %vm2065_vm2 = vcmp.ge.bf16.partialorder %v2061_v36, 0 }
 0x25a   :  { %v2070_v43 = vsel %vm2062_vm0, %v2058_v32, %v2066_v37  ;;  %v5875_v31 = vld [vmem:[#allocation7 + $0x384] ss:$16 sps:$4 sm:$0xff]   ;;  %v5878_v32 = vld [vmem:[#allocation7 + $0x38c] ss:$16 sps:$4 sm:$0xff]   ;;  %v5873_v34 = vld [vmem:[#allocation7 + $0x380] ss:$16 sps:$4 sm:$0xff]  }
 0x25b   :  { %v2071_v42 = vsel %vm2063_vm1, %v2059_v35, %v2067_v38  ;;  %v2073_v46 = vsel %vm2065_vm2, %v2061_v36, %v2069_v39  ;;  %v5876_v35 = vld [vmem:[#allocation7 + $0x388] ss:$16 sps:$4 sm:$0xff]   ;;  %v5881_v36 = vld [vmem:[#allocation7 + $0x3a4] ss:$16 sps:$4 sm:$0xff]   ;;  %v5884_v37 = vld [vmem:[#allocation7 + $0x3ac] ss:$16 sps:$4 sm:$0xff]   ;;  %v413_v38 = vrot.slane %v6522_v19, %v6538_v33 }
 0x25c   :  { %2896 = vmatprep.mubr.bf16.mxu0 %v2071_v42  ;;  %2978 = vmatprep.mubr.bf16.mxu1 %v2071_v42  ;;  %v5879_v39 = vld [vmem:[#allocation7 + $0x3a0] ss:$16 sps:$4 sm:$0xff]   ;;  %v5890_v42 = vld [vmem:[#allocation7 + $0x3cc] ss:$16 sps:$4 sm:$0xff]  }
 0x25d   :  { %2897 = vmatmul.mubr.bf16.vlgmr.msra.gmra.mrb[4].mxu0 %v2070_v43  ;;  %2979 = vmatmul.mubr.bf16.vlgmr.msra.gmra.mrb[4].mxu1 %v2070_v43  ;;  %v5244_v43 = vadd.f32 %v6535_v25, %v413_v38  ;;  %v5891_v19 = vld [vmem:[#allocation7 + $0x3e0] ss:$16 sps:$4 sm:$0xff]   ;;  %v5958_v38 = vld [vmem:[#allocation8 + $0x16c] ss:$12 sps:$4 sm:$0xff]  }
 0x25e   :  { %2906 = vmatpush1.bf16.msra.mxu0 %v5801_v40  ;;  %2988 = vmatpush1.bf16.msra.mxu1 %v5804_v41  ;;  %v5882_v40 = vld [vmem:[#allocation7 + $0x3a8] ss:$16 sps:$4 sm:$0xff]   ;;  %v5887_v41 = vld [vmem:[#allocation7 + $0x3c4] ss:$16 sps:$4 sm:$0xff]   ;;  %v5897_v25 = vld [vmem:[#allocation8] ss:$12 sps:$4 sm:$0xff]  }
 0x25f   :  { %2937 = vmatprep.mubr.bf16.mxu0 %v2073_v46  ;;  %3019 = vmatprep.mubr.bf16.mxu1 %v2073_v46  ;;  %v5893_v46 = vld [vmem:[#allocation7 + $0x3e4] ss:$16 sps:$4 sm:$0xff]  }
 0x260   :  { %2907 = vmatprep.subr.bf16.mxu0 %v5809_v44  ;;  %2989 = vmatprep.subr.bf16.mxu1 %v5812_v45  ;;  %v5885_v44 = vld [vmem:[#allocation7 + $0x3c0] ss:$16 sps:$4 sm:$0xff]   ;;  %v5888_v45 = vld [vmem:[#allocation7 + $0x3c8] ss:$16 sps:$4 sm:$0xff]  }
 0x262   :  { %2908 = vmatpush1.bf16.msra.mxu0 %v5807_v47  ;;  %2990 = vmatpush1.bf16.msra.mxu1 %v5810_v48  ;;  %v5896_v47 = vld [vmem:[#allocation7 + $0x3ec] ss:$16 sps:$4 sm:$0xff]   ;;  %v2060_v48 = vpack.c.bf16 %v5244_v43, %v5244_v43  ;;  %v5964_v43 = vld [vmem:[#allocation8 + $0x248] ss:$12 sps:$4 sm:$0xff]  }
 0x263   :  { %2909 = vmatprep.subr.bf16.mxu0 %v5815_v49  ;;  %2991 = vmatprep.subr.bf16.mxu1 %v5818_v50  ;;  %v5894_v49 = vld [vmem:[#allocation7 + $0x3e8] ss:$16 sps:$4 sm:$0xff]   ;;  %v5899_v50 = vld [vmem:[#allocation8 + $0x4] ss:$12 sps:$4 sm:$0xff]  }
 0x264   :  { %vm2064_vm3 = vcmp.ge.bf16.partialorder %v2060_v48, 0 }
 0x266   :  { %2910 = vmatpush1.bf16.msra.mxu0 %v5813_v51  ;;  %2992 = vmatpush1.bf16.msra.mxu1 %v5816_v52  ;;  %v5924_v51 = vld [vmem:[#allocation8 + $0xc8] ss:$12 sps:$4 sm:$0xff]   ;;  %v2068_v52 = vmul.bf16 1009007652, %v2060_v48 }
 0x267   :  { %2911 = vmatprep.subr.bf16.mxu0 %v5821_v53  ;;  %2993 = vmatprep.subr.bf16.mxu1 %v5824_v54  ;;  %v5925_v53 = vld [vmem:[#allocation8 + $0x8] ss:$12 sps:$4 sm:$0xff]  }
 0x268   :  { %v5902_v54 = vld [vmem:[#allocation8 + $0x1c] ss:$12 sps:$4 sm:$0xff]  }
 0x26a   :  { %2912 = vmatpush1.bf16.msra.mxu0 %v5819_v55  ;;  %2994 = vmatpush1.bf16.msra.mxu1 %v5822_v56  ;;  %v5929_v55 = vld [vmem:[#allocation8 + $0xe0] ss:$12 sps:$4 sm:$0xff]   ;;  %v2072_v56 = vsel %vm2064_vm3, %v2060_v48, %v2068_v52 }
 0x26b   :  { %2913 = vmatprep.subr.bf16.mxu0 %v5827_v57  ;;  %2995 = vmatprep.subr.bf16.mxu1 %v5830_v58  ;;  %v5900_v57 = vld [vmem:[#allocation8 + $0x18] ss:$12 sps:$4 sm:$0xff]   ;;  %v5930_v58 = vld [vmem:[#allocation8 + $0x20] ss:$12 sps:$4 sm:$0xff]  }
 0x26e   :  { %2914 = vmatpush1.bf16.msra.mxu0 %v5825_v59  ;;  %2996 = vmatpush1.bf16.msra.mxu1 %v5828_v60  ;;  %v5905_v59 = vld [vmem:[#allocation8 + $0x34] ss:$12 sps:$4 sm:$0xff]   ;;  %v5934_v60 = vld [vmem:[#allocation8 + $0xf8] ss:$12 sps:$4 sm:$0xff]  }
 0x26f   :  { %2915 = vmatprep.subr.bf16.mxu0 %v5833_v61  ;;  %2997 = vmatprep.subr.bf16.mxu1 %v5836_v62  ;;  %v5903_v61 = vld [vmem:[#allocation8 + $0x30] ss:$12 sps:$4 sm:$0xff]   ;;  %v5935_v62 = vld [vmem:[#allocation8 + $0x38] ss:$12 sps:$4 sm:$0xff]  }
 0x272   :  { %2916 = vmatpush1.bf16.msra.mxu0 %v5831_v63  ;;  %2998 = vmatpush1.bf16.msra.mxu1 %v5834_v0  ;;  %v5908_v63 = vld [vmem:[#allocation8 + $0x4c] ss:$12 sps:$4 sm:$0xff]   ;;  %v5939_v0 = vld [vmem:[#allocation8 + $0x110] ss:$12 sps:$4 sm:$0xff]  }
 0x273   :  { %2917 = vmatprep.subr.bf16.mxu0 %v5839_v1  ;;  %2999 = vmatprep.subr.bf16.mxu1 %v5842_v2  ;;  %v5906_v1 = vld [vmem:[#allocation8 + $0x48] ss:$12 sps:$4 sm:$0xff]   ;;  %v5940_v2 = vld [vmem:[#allocation8 + $0x50] ss:$12 sps:$4 sm:$0xff]  }
 0x276   :  { %2918 = vmatpush1.bf16.msra.mxu0 %v5837_v3  ;;  %3000 = vmatpush1.bf16.msra.mxu1 %v5840_v4  ;;  %v5911_v3 = vld [vmem:[#allocation8 + $0x64] ss:$12 sps:$4 sm:$0xff]   ;;  %v5944_v4 = vld [vmem:[#allocation8 + $0x128] ss:$12 sps:$4 sm:$0xff]  }
 0x277   :  { %2919 = vmatprep.subr.bf16.mxu0 %v5845_v5  ;;  %3001 = vmatprep.subr.bf16.mxu1 %v5848_v6  ;;  %v5909_v5 = vld [vmem:[#allocation8 + $0x60] ss:$12 sps:$4 sm:$0xff]   ;;  %v5945_v6 = vld [vmem:[#allocation8 + $0x68] ss:$12 sps:$4 sm:$0xff]  }
 0x27a   :  { %2920 = vmatpush1.bf16.msra.mxu0 %v5843_v7  ;;  %3002 = vmatpush1.bf16.msra.mxu1 %v5846_v8  ;;  %v5914_v7 = vld [vmem:[#allocation8 + $0x7c] ss:$12 sps:$4 sm:$0xff]   ;;  %v5949_v8 = vld [vmem:[#allocation8 + $0x140] ss:$12 sps:$4 sm:$0xff]  }
 0x27b   :  { %2921 = vmatprep.subr.bf16.mxu0 %v5851_v9  ;;  %3003 = vmatprep.subr.bf16.mxu1 %v5854_v10  ;;  %v5912_v9 = vld [vmem:[#allocation8 + $0x78] ss:$12 sps:$4 sm:$0xff]   ;;  %v5950_v10 = vld [vmem:[#allocation8 + $0x80] ss:$12 sps:$4 sm:$0xff]  }
 0x27e   :  { %2922 = vmatpush1.bf16.msra.mxu0 %v5849_v12  ;;  %3004 = vmatpush1.bf16.msra.mxu1 %v5852_v13  ;;  %v5917_v12 = vld [vmem:[#allocation8 + $0x94] ss:$12 sps:$4 sm:$0xff]   ;;  %v5915_v13 = vld [vmem:[#allocation8 + $0x90] ss:$12 sps:$4 sm:$0xff]  }
 0x27f   :  { %2923 = vmatprep.subr.bf16.mxu0 %v5857_v15  ;;  %3005 = vmatprep.subr.bf16.mxu1 %v5860_v16  ;;  %v5920_v15 = vld [vmem:[#allocation8 + $0xac] ss:$12 sps:$4 sm:$0xff]   ;;  %v5918_v16 = vld [vmem:[#allocation8 + $0xa8] ss:$12 sps:$4 sm:$0xff]  }
 0x282   :  { %2924 = vmatpush1.bf16.msra.mxu0 %v5855_v21  ;;  %3006 = vmatpush1.bf16.msra.mxu1 %v5858_v22  ;;  %v5923_v21 = vld [vmem:[#allocation8 + $0xc4] ss:$12 sps:$4 sm:$0xff]   ;;  %v5921_v22 = vld [vmem:[#allocation8 + $0xc0] ss:$12 sps:$4 sm:$0xff]  }
 0x283   :  { %2925 = vmatprep.subr.bf16.mxu0 %v5863_v23  ;;  %3007 = vmatprep.subr.bf16.mxu1 %v5866_v24  ;;  %v5928_v23 = vld [vmem:[#allocation8 + $0xdc] ss:$12 sps:$4 sm:$0xff]   ;;  %v5926_v24 = vld [vmem:[#allocation8 + $0xd8] ss:$12 sps:$4 sm:$0xff]  }
 0x286   :  { %2926 = vmatpush1.bf16.msra.mxu0 %v5861_v14  ;;  %3008 = vmatpush1.bf16.msra.mxu1 %v5864_v26  ;;  %v5933_v14 = vld [vmem:[#allocation8 + $0xf4] ss:$12 sps:$4 sm:$0xff]   ;;  %v5931_v26 = vld [vmem:[#allocation8 + $0xf0] ss:$12 sps:$4 sm:$0xff]  }
 0x287   :  { %2927 = vmatprep.subr.bf16.mxu0 %v5869_v27  ;;  %3009 = vmatprep.subr.bf16.mxu1 %v5872_v28  ;;  %v5938_v27 = vld [vmem:[#allocation8 + $0x10c] ss:$12 sps:$4 sm:$0xff]   ;;  %v5936_v28 = vld [vmem:[#allocation8 + $0x108] ss:$12 sps:$4 sm:$0xff]  }
 0x28a   :  { %2928 = vmatpush1.bf16.msra.mxu0 %v5867_v29  ;;  %3010 = vmatpush1.bf16.msra.mxu1 %v5870_v30  ;;  %v5943_v29 = vld [vmem:[#allocation8 + $0x124] ss:$12 sps:$4 sm:$0xff]   ;;  %v5941_v30 = vld [vmem:[#allocation8 + $0x120] ss:$12 sps:$4 sm:$0xff]  }
 0x28b   :  { %2929 = vmatprep.subr.bf16.mxu0 %v5875_v31  ;;  %3011 = vmatprep.subr.bf16.mxu1 %v5878_v32  ;;  %v5948_v31 = vld [vmem:[#allocation8 + $0x13c] ss:$12 sps:$4 sm:$0xff]   ;;  %v5946_v32 = vld [vmem:[#allocation8 + $0x138] ss:$12 sps:$4 sm:$0xff]  }
 0x28e   :  { %2930 = vmatpush1.bf16.msra.mxu0 %v5873_v34  ;;  %3012 = vmatpush1.bf16.msra.mxu1 %v5876_v35  ;;  %v5953_v34 = vld [vmem:[#allocation8 + $0x154] ss:$12 sps:$4 sm:$0xff]   ;;  %v5954_v35 = vld [vmem:[#allocation8 + $0x158] ss:$12 sps:$4 sm:$0xff]  }
 0x28f   :  { %2931 = vmatprep.subr.bf16.mxu0 %v5881_v36  ;;  %3013 = vmatprep.subr.bf16.mxu1 %v5884_v37  ;;  %v5951_v36 = vld [vmem:[#allocation8 + $0x150] ss:$12 sps:$4 sm:$0xff]   ;;  %v5955_v37 = vld [vmem:[#allocation8 + $0x98] ss:$12 sps:$4 sm:$0xff]  }
 0x292   :  { %2932 = vmatpush1.bf16.msra.mxu0 %v5879_v39  ;;  %3014 = vmatpush1.bf16.msra.mxu1 %v5882_v40  ;;  %v5959_v39 = vld [vmem:[#allocation8 + $0x170] ss:$12 sps:$4 sm:$0xff]   ;;  %v5956_v40 = vld [vmem:[#allocation8 + $0x168] ss:$12 sps:$4 sm:$0xff]  }
 0x293   :  { %2933 = vmatprep.subr.bf16.mxu0 %v5887_v41  ;;  %3015 = vmatprep.subr.bf16.mxu1 %v5890_v42  ;;  %v5960_v41 = vld [vmem:[#allocation8 + $0xb0] ss:$12 sps:$4 sm:$0xff]  }
 0x294   :  { %v5963_v42 = vld [vmem:[#allocation8 + $0x184] ss:$12 sps:$4 sm:$0xff]  }
 0x296   :  { %2934 = vmatpush1.bf16.msra.mxu0 %v5885_v44  ;;  %3016 = vmatpush1.bf16.msra.mxu1 %v5888_v45  ;;  %v6546_v44 = vld [vmem:[%s6593_s4] sm:$0xf] }
 0x297   :  { %2935 = vmatprep.subr.bf16.mxu0 %v5893_v46  ;;  %3017 = vmatprep.subr.bf16.mxu1 %v5896_v47  ;;  %v2207_v45 = vrot.slane %v6546_v44, %v6517_v18  ;;  %v2211_v46 = vrot.slane %v6546_v44, %v6525_v20  ;;  %v2219_v47 = vrot.slane %v6546_v44, %v416_v11 }
 0x29a   :  { %2936 = vmatpush1.bf16.msra.mxu0 %v5891_v19  ;;  %3018 = vmatpush1.bf16.msra.mxu1 %v5894_v49 }
 0x29b   :  { %3701 = vmatprep.subr.bf16.mxu0 %v5899_v50  ;;  %5147 = vmatprep.subr.bf16.mxu1 %v5924_v51 }
 0x29d   :  { %2938 = vmatmul.mubr.bf16.vlgmr.msra.gmra.mrb[4].mxu0 %v2072_v56  ;;  %3020 = vmatmul.mubr.bf16.vlgmr.msra.gmra.mrb[4].mxu1 %v2072_v56 }
 0x29e   :  { %3702 = vmatpush1.bf16.msra.mxu0 %v5897_v25  ;;  %5148 = vmatpush3.bf16.msra.mxu1 %v5925_v53 }
 0x29f   :  { %3703 = vmatprep.subr.bf16.mxu0 %v5902_v54  ;;  %5149 = vmatprep.subr.bf16.mxu1 %v5929_v55 }
 0x2a2   :  { %3704 = vmatpush1.bf16.msra.mxu0 %v5900_v57  ;;  %5150 = vmatpush3.bf16.msra.mxu1 %v5930_v58 }
 0x2a3   :  { %3705 = vmatprep.subr.bf16.mxu0 %v5905_v59  ;;  %5151 = vmatprep.subr.bf16.mxu1 %v5934_v60 }
 0x2a6   :  { %3706 = vmatpush1.bf16.msra.mxu0 %v5903_v61  ;;  %5152 = vmatpush3.bf16.msra.mxu1 %v5935_v62  ;;  %v5961_v61 = vld [vmem:[#allocation8 + $0x180] ss:$12 sps:$4 sm:$0xff]   ;;  %v5965_v62 = vld [vmem:[#allocation8 + $0x188] ss:$12 sps:$4 sm:$0xff]  }
 0x2a7   :  { %3707 = vmatprep.subr.bf16.mxu0 %v5908_v63  ;;  %5153 = vmatprep.subr.bf16.mxu1 %v5939_v0 }
 0x2aa   :  { %3708 = vmatpush1.bf16.msra.mxu0 %v5906_v1  ;;  %5154 = vmatpush3.bf16.msra.mxu1 %v5940_v2  ;;  %v5968_v1 = vld [vmem:[#allocation8 + $0x19c] ss:$12 sps:$4 sm:$0xff]   ;;  %v5969_v2 = vld [vmem:[#allocation8 + $0x260] ss:$12 sps:$4 sm:$0xff]  }
 0x2ab   :  { %3709 = vmatprep.subr.bf16.mxu0 %v5911_v3  ;;  %5155 = vmatprep.subr.bf16.mxu1 %v5944_v4  ;;  %v5966_v4 = vld [vmem:[#allocation8 + $0x198] ss:$12 sps:$4 sm:$0xff]  }
 0x2ae   :  { %3710 = vmatpush1.bf16.msra.mxu0 %v5909_v5  ;;  %5156 = vmatpush3.bf16.msra.mxu1 %v5945_v6  ;;  %v5970_v5 = vld [vmem:[#allocation8 + $0x1a0] ss:$12 sps:$4 sm:$0xff]  }
 0x2af   :  { %3711 = vmatprep.subr.bf16.mxu0 %v5914_v7  ;;  %5157 = vmatprep.subr.bf16.mxu1 %v5949_v8  ;;  %v5973_v6 = vld [vmem:[#allocation8 + $0x1b4] ss:$12 sps:$4 sm:$0xff]   ;;  %v5974_v7 = vld [vmem:[#allocation8 + $0x278] ss:$12 sps:$4 sm:$0xff]   ;;  %v5971_v8 = vld [vmem:[#allocation8 + $0x1b0] ss:$12 sps:$4 sm:$0xff]  }
 0x2b2   :  { %3712 = vmatpush1.bf16.msra.mxu0 %v5912_v9  ;;  %5158 = vmatpush3.bf16.msra.mxu1 %v5950_v10  ;;  %v5975_v9 = vld [vmem:[#allocation8 + $0x1b8] ss:$12 sps:$4 sm:$0xff]  }
 0x2b3   :  { %3713 = vmatprep.subr.bf16.mxu0 %v5917_v12  ;;  %5159 = vmatprep.subr.bf16.mxu1 %v5954_v35  ;;  %v5978_v10 = vld [vmem:[#allocation8 + $0x1cc] ss:$12 sps:$4 sm:$0xff]   ;;  %v5979_v12 = vld [vmem:[#allocation8 + $0x290] ss:$12 sps:$4 sm:$0xff]  }
 0x2b4   :  { %v5998_v35 = vld [vmem:[#allocation8 + $0x22c] ss:$12 sps:$4 sm:$0xff]  }
 0x2b6   :  { %3714 = vmatpush1.bf16.msra.mxu0 %v5915_v13  ;;  %5160 = vmatpush3.bf16.msra.mxu1 %v5955_v37  ;;  %v5976_v13 = vld [vmem:[#allocation8 + $0x1c8] ss:$12 sps:$4 sm:$0xff]  }
 0x2b7   :  { %3715 = vmatprep.subr.bf16.mxu0 %v5920_v15  ;;  %5161 = vmatprep.subr.bf16.mxu1 %v5959_v39  ;;  %v5980_v15 = vld [vmem:[#allocation8 + $0x1d0] ss:$12 sps:$4 sm:$0xff]  }
 0x2b8   :  { %v6000_v39 = vld [vmem:[#allocation8 + $0x230] ss:$12 sps:$4 sm:$0xff]  }
 0x2ba   :  { %3716 = vmatpush1.bf16.msra.mxu0 %v5918_v16  ;;  %5162 = vmatpush3.bf16.msra.mxu1 %v5960_v41  ;;  %v5983_v16 = vld [vmem:[#allocation8 + $0x1e4] ss:$12 sps:$4 sm:$0xff]  }
 0x2bb   :  { %3717 = vmatprep.subr.bf16.mxu0 %v5923_v21  ;;  %5169 = vmatprep.subr.bf16.mxu1 %v5964_v43  ;;  %v5984_v21 = vld [vmem:[#allocation8 + $0x2a8] ss:$12 sps:$4 sm:$0xff]  }
 0x2bc   :  { %v6006_v43 = vld [vmem:[#allocation8 + $0x25c] ss:$12 sps:$4 sm:$0xff]  }
 0x2be   :  { %3718 = vmatpush1.bf16.msra.mxu0 %v5921_v22  ;;  %v5981_v22 = vld [vmem:[#allocation8 + $0x1e0] ss:$12 sps:$4 sm:$0xff]  }
 0x2bf   :  { %3719 = vmatprep.subr.bf16.mxu0 %v5928_v23  ;;  %v5985_v23 = vld [vmem:[#allocation8 + $0x1e8] ss:$12 sps:$4 sm:$0xff]  }
 0x2c2   :  { %3720 = vmatpush1.bf16.msra.mxu0 %v5926_v24  ;;  %v5988_v24 = vld [vmem:[#allocation8 + $0x1fc] ss:$12 sps:$4 sm:$0xff]  }
 0x2c3   :  { %3721 = vmatprep.subr.bf16.mxu0 %v5933_v14  ;;  %v5989_v14 = vld [vmem:[#allocation8 + $0x2c0] ss:$12 sps:$4 sm:$0xff]  }
 0x2c6   :  { %3722 = vmatpush1.bf16.msra.mxu0 %v5931_v26  ;;  %v2215_v26 = vrot.slane %v6546_v44, %v6538_v33 }
 0x2c7   :  { %3723 = vmatprep.subr.bf16.mxu0 %v5938_v27  ;;  %v5986_v27 = vld [vmem:[#allocation8 + $0x1f8] ss:$12 sps:$4 sm:$0xff]  }
 0x2ca   :  { %3724 = vmatpush1.bf16.msra.mxu0 %v5936_v28  ;;  %v5990_v28 = vld [vmem:[#allocation8 + $0x200] ss:$12 sps:$4 sm:$0xff]  }
 0x2cb   :  { %3725 = vmatprep.subr.bf16.mxu0 %v5943_v29  ;;  %v5993_v29 = vld [vmem:[#allocation8 + $0x214] ss:$12 sps:$4 sm:$0xff]  }
 0x2ce   :  { %3726 = vmatpush1.bf16.msra.mxu0 %v5941_v30  ;;  %v5994_v30 = vld [vmem:[#allocation8 + $0x2d8] ss:$12 sps:$4 sm:$0xff]  }
 0x2cf   :  { %3727 = vmatprep.subr.bf16.mxu0 %v5948_v31 }
 0x2d2   :  { %3728 = vmatpush1.bf16.msra.mxu0 %v5946_v32  ;;  %v5991_v32 = vld [vmem:[#allocation8 + $0x210] ss:$12 sps:$4 sm:$0xff]  }
 0x2d3   :  { %3729 = vmatprep.subr.bf16.mxu0 %v5953_v34  ;;  %v5995_v34 = vld [vmem:[#allocation8 + $0x218] ss:$12 sps:$4 sm:$0xff]  }
 0x2d6   :  { %3730 = vmatpush1.bf16.msra.mxu0 %v5951_v36  ;;  %v5999_v36 = vld [vmem:[#allocation8 + $0x2f0] ss:$12 sps:$4 sm:$0xff]  }
 0x2d7   :  { %3731 = vmatprep.subr.bf16.mxu0 %v5958_v38  ;;  %v5996_v38 = vld [vmem:[#allocation8 + $0x228] ss:$12 sps:$4 sm:$0xff]  }
 0x2da   :  { %3732 = vmatpush1.bf16.msra.mxu0 %v5956_v40  ;;  %v6003_v40 = vld [vmem:[#allocation8 + $0x244] ss:$12 sps:$4 sm:$0xff]  }
 0x2db   :  { %3742 = vmatprep.subr.bf16.mxu0 %v5963_v42  ;;  %v6001_v42 = vld [vmem:[#allocation8 + $0x240] ss:$12 sps:$4 sm:$0xff]  }
 0x370   :  { %v2939_v48 = vpop.f32.mrb[4].mxu0  ;;  %v6555_v19 = vpop.f32.mrb[4].mxu1 }
 0x371   :  { %v5246_v49 = vadd.f32 %v2939_v48, %v2207_v45  ;;  %v2941_v50 = vpop.f32.mrb[5].mxu0  ;;  %v3023_v51 = vpop.f32.mrb[5].mxu1  ;;  %v5248_v31 = vadd.f32 %v6555_v19, %v2215_v26  ;;  %v6004_v45 = vld [vmem:[#allocation8 + $0x258] ss:$12 sps:$4 sm:$0xff]   ;;  %v6010_v19 = vld [vmem:[#allocation8 + $0x288] ss:$12 sps:$4 sm:$0xff]  }
 0x372   :  { %v5247_v52 = vadd.f32 %v2941_v50, %v2211_v46  ;;  %v5249_v25 = vadd.f32 %v3023_v51, %v2219_v47  ;;  %v2943_v53 = vpop.f32.mrb[6].mxu0  ;;  %v3025_v54 = vpop.f32.mrb[6].mxu1  ;;  %v6009_v46 = vld [vmem:[#allocation8 + $0x274] ss:$12 sps:$4 sm:$0xff]   ;;  %v6007_v47 = vld [vmem:[#allocation8 + $0x270] ss:$12 sps:$4 sm:$0xff]  }
 0x373   :  { %v3028_v55 = vpack.c.bf16 %v5246_v49, %v5246_v49  ;;  %v2944_v56 = vpop.f32.mrb[7].mxu0  ;;  %v3026_v57 = vpop.f32.mrb[7].mxu1  ;;  %v3030_v37 = vpack.c.bf16 %v5248_v31, %v5248_v31  ;;  %v6012_v48 = vld [vmem:[#allocation8 + $0x28c] ss:$12 sps:$4 sm:$0xff]   ;;  %v6015_v49 = vld [vmem:[#allocation8 + $0x2a4] ss:$12 sps:$4 sm:$0xff]  }
 0x374   :  { %v3029_v58 = vpack.c.bf16 %v5247_v52, %v5247_v52  ;;  %v3031_v59 = vpack.c.bf16 %v5249_v25, %v5249_v25  ;;  %v6013_v50 = vld [vmem:[#allocation8 + $0x2a0] ss:$12 sps:$4 sm:$0xff]   ;;  %v6018_v51 = vld [vmem:[#allocation8 + $0x2bc] ss:$12 sps:$4 sm:$0xff]   ;;  %v6016_v52 = vld [vmem:[#allocation8 + $0x2b8] ss:$12 sps:$4 sm:$0xff]  }
 0x375   :  { %v3036_v60 = vmul.bf16 1009007652, %v3028_v55  ;;  %vm3032_vm4 = vcmp.ge.bf16.partialorder %v3028_v55, 0  ;;  %v3038_v41 = vmul.bf16 1009007652, %v3030_v37  ;;  %vm3034_vm7 = vcmp.ge.bf16.partialorder %v3030_v37, 0 }
 0x376   :  { %v3037_v17 = vmul.bf16 1009007652, %v3029_v58  ;;  %vm3033_vm5 = vcmp.ge.bf16.partialorder %v3029_v58, 0  ;;  %v3039_v11 = vmul.bf16 1009007652, %v3031_v59  ;;  %vm3035_vm6 = vcmp.ge.bf16.partialorder %v3031_v59, 0 }
 0x377   :  { %v3040_v0 = vsel %vm3032_vm4, %v3028_v55, %v3036_v60  ;;  %v3042_v44 = vsel %vm3034_vm7, %v3030_v37, %v3038_v41  ;;  %v6021_v25 = vld [vmem:[#allocation8 + $0x2d4] ss:$12 sps:$4 sm:$0xff]   ;;  %v6019_v53 = vld [vmem:[#allocation8 + $0x2d0] ss:$12 sps:$4 sm:$0xff]   ;;  %v6024_v54 = vld [vmem:[#allocation8 + $0x2ec] ss:$12 sps:$4 sm:$0xff]  }
 0x378   :  { %v3041_v63 = vsel %vm3033_vm5, %v3029_v58, %v3037_v17  ;;  %v3043_v3 = vsel %vm3035_vm6, %v3031_v59, %v3039_v11  ;;  %v6022_v55 = vld [vmem:[#allocation8 + $0x2e8] ss:$12 sps:$4 sm:$0xff]   ;;  %v6027_v57 = vld [vmem:[#allocation10 + $0x4] ss:$8 sps:$4 sm:$0xff]   ;;  %v6028_v59 = vld [vmem:[#allocation10 + $0x10] ss:$8 sps:$4 sm:$0xff]  }
 0x379   :  { %3733 = vmatprep.mubr.bf16.mxu0 %v3041_v63  ;;  %3815 = vmatprep.mubr.bf16.mxu1 %v3041_v63  ;;  %v6025_v56 = vld [vmem:[#allocation10] ss:$8 sps:$4 sm:$0xff]   ;;  %v6030_v58 = vld [vmem:[#allocation10 + $0x14] ss:$8 sps:$4 sm:$0xff]   ;;  %v6033_v60 = vld [vmem:[#allocation10 + $0x24] ss:$8 sps:$4 sm:$0xff]  }
 0x37a   :  { %3734 = vmatmul.mubr.bf16.vlgmr.msra.gmra.mrb[8].mxu0 %v3040_v0  ;;  %3816 = vmatmul.mubr.bf16.vlgmr.msra.gmra.mrb[8].mxu1 %v3040_v0  ;;  %v6031_v17 = vld [vmem:[#allocation10 + $0x20] ss:$8 sps:$4 sm:$0xff]   ;;  %v6036_v11 = vld [vmem:[#allocation10 + $0x34] ss:$8 sps:$4 sm:$0xff]  }
 0x37b   :  { %3743 = vmatpush1.bf16.msra.mxu0 %v5961_v61  ;;  %5170 = vmatpush3.bf16.msra.mxu1 %v5965_v62  ;;  %v6034_v61 = vld [vmem:[#allocation10 + $0x30] ss:$8 sps:$4 sm:$0xff]   ;;  %v6039_v62 = vld [vmem:[#allocation10 + $0x44] ss:$8 sps:$4 sm:$0xff]   ;;  %v6037_v63 = vld [vmem:[#allocation10 + $0x40] ss:$8 sps:$4 sm:$0xff]  }
 0x37c   :  { %3774 = vmatprep.mubr.bf16.mxu0 %v3043_v3  ;;  %3855 = vmatprep.mubr.bf16.mxu1 %v3043_v3  ;;  %v6042_v0 = vld [vmem:[#allocation10 + $0x54] ss:$8 sps:$4 sm:$0xff]   ;;  %v6043_v3 = vld [vmem:[#allocation10 + $0x60] ss:$8 sps:$4 sm:$0xff]  }
 0x37d   :  { %3744 = vmatprep.subr.bf16.mxu0 %v5968_v1  ;;  %5171 = vmatprep.subr.bf16.mxu1 %v5969_v2  ;;  %v6040_v1 = vld [vmem:[#allocation10 + $0x50] ss:$8 sps:$4 sm:$0xff]   ;;  %v6045_v2 = vld [vmem:[#allocation10 + $0x64] ss:$8 sps:$4 sm:$0xff]   ;;  %v6072_v26 = vld [vmem:[#allocation10 + $0xf4] ss:$8 sps:$4 sm:$0xff]  }
 0x37e   :  { %v6099_v31 = vld [vmem:[#allocation11 + $0x48] sm:$0xff]   ;;  %v6104_v37 = vld [vmem:[#allocation11 + $0x18] sm:$0xff]  }
 0x37f   :  { %3745 = vmatpush1.bf16.msra.mxu0 %v5966_v4  ;;  %5172 = vmatpush3.bf16.msra.mxu1 %v5970_v5  ;;  %v6048_v4 = vld [vmem:[#allocation10 + $0x74] ss:$8 sps:$4 sm:$0xff]   ;;  %v6046_v5 = vld [vmem:[#allocation10 + $0x70] ss:$8 sps:$4 sm:$0xff]   ;;  %v6108_v41 = vld [vmem:[#allocation11 + $0x28] sm:$0xff]  }
 0x380   :  { %3746 = vmatprep.subr.bf16.mxu0 %v5973_v6  ;;  %5173 = vmatprep.subr.bf16.mxu1 %v5974_v7  ;;  %v6051_v6 = vld [vmem:[#allocation10 + $0x84] ss:$8 sps:$4 sm:$0xff]   ;;  %v6049_v7 = vld [vmem:[#allocation10 + $0x80] ss:$8 sps:$4 sm:$0xff]  }
 0x383   :  { %3747 = vmatpush1.bf16.msra.mxu0 %v5971_v8  ;;  %5174 = vmatpush3.bf16.msra.mxu1 %v5975_v9  ;;  %v6054_v8 = vld [vmem:[#allocation10 + $0x94] ss:$8 sps:$4 sm:$0xff]   ;;  %v6052_v9 = vld [vmem:[#allocation10 + $0x90] ss:$8 sps:$4 sm:$0xff]  }
 0x384   :  { %3748 = vmatprep.subr.bf16.mxu0 %v5978_v10  ;;  %5175 = vmatprep.subr.bf16.mxu1 %v5979_v12  ;;  %v6057_v10 = vld [vmem:[#allocation10 + $0xa4] ss:$8 sps:$4 sm:$0xff]   ;;  %v6055_v12 = vld [vmem:[#allocation10 + $0xa0] ss:$8 sps:$4 sm:$0xff]  }
 0x387   :  { %3749 = vmatpush1.bf16.msra.mxu0 %v5976_v13  ;;  %5176 = vmatpush3.bf16.msra.mxu1 %v5980_v15  ;;  %v6060_v13 = vld [vmem:[#allocation10 + $0xb4] ss:$8 sps:$4 sm:$0xff]   ;;  %v6058_v15 = vld [vmem:[#allocation10 + $0xb0] ss:$8 sps:$4 sm:$0xff]  }
 0x388   :  { %3750 = vmatprep.subr.bf16.mxu0 %v5983_v16  ;;  %5177 = vmatprep.subr.bf16.mxu1 %v5984_v21  ;;  %v6063_v16 = vld [vmem:[#allocation10 + $0xc4] ss:$8 sps:$4 sm:$0xff]   ;;  %v6061_v21 = vld [vmem:[#allocation10 + $0xc0] ss:$8 sps:$4 sm:$0xff]  }
 0x38b   :  { %3751 = vmatpush1.bf16.msra.mxu0 %v5981_v22  ;;  %5178 = vmatpush3.bf16.msra.mxu1 %v5985_v23  ;;  %v6066_v22 = vld [vmem:[#allocation10 + $0xd4] ss:$8 sps:$4 sm:$0xff]   ;;  %v6064_v23 = vld [vmem:[#allocation10 + $0xd0] ss:$8 sps:$4 sm:$0xff]  }
 0x38c   :  { %3752 = vmatprep.subr.bf16.mxu0 %v5988_v24  ;;  %5179 = vmatprep.subr.bf16.mxu1 %v5989_v14  ;;  %v6069_v24 = vld [vmem:[#allocation10 + $0xe4] ss:$8 sps:$4 sm:$0xff]   ;;  %v6067_v14 = vld [vmem:[#allocation10 + $0xe0] ss:$8 sps:$4 sm:$0xff]  }
 0x38f   :  { %3753 = vmatpush1.bf16.msra.mxu0 %v5986_v27  ;;  %5180 = vmatpush3.bf16.msra.mxu1 %v5990_v28  ;;  %v6070_v27 = vld [vmem:[#allocation10 + $0xf0] ss:$8 sps:$4 sm:$0xff]   ;;  %v6075_v28 = vld [vmem:[#allocation10 + $0x104] ss:$8 sps:$4 sm:$0xff]  }
 0x390   :  { %3754 = vmatprep.subr.bf16.mxu0 %v5993_v29  ;;  %5181 = vmatprep.subr.bf16.mxu1 %v5994_v30  ;;  %v6097_v29 = vld [vmem:[#allocation11 + $0x40] sm:$0xff]  }
 0x391   :  { %v6098_v30 = vld [vmem:[#allocation11] sm:$0xff]  }
 0x393   :  { %3755 = vmatpush1.bf16.msra.mxu0 %v5991_v32  ;;  %5182 = vmatpush3.bf16.msra.mxu1 %v5995_v34  ;;  %v6100_v32 = vld [vmem:[#allocation11 + $0x8] sm:$0xff]   ;;  %v6101_v34 = vld [vmem:[#allocation11 + $0x50] sm:$0xff]  }
 0x394   :  { %3756 = vmatprep.subr.bf16.mxu0 %v5998_v35  ;;  %5183 = vmatprep.subr.bf16.mxu1 %v5999_v36  ;;  %v6102_v35 = vld [vmem:[#allocation11 + $0x10] sm:$0xff]   ;;  %v6103_v36 = vld [vmem:[#allocation11 + $0x58] sm:$0xff]  }
 0x397   :  { %3757 = vmatpush1.bf16.msra.mxu0 %v5996_v38  ;;  %5184 = vmatpush3.bf16.msra.mxu1 %v6000_v39  ;;  %v6105_v38 = vld [vmem:[#allocation11 + $0x60] sm:$0xff]  }
 0x398   :  { %3758 = vmatprep.subr.bf16.mxu0 %v6003_v40  ;;  %4175 = vmatprep.subr.bf16.mxu1 %v6027_v57  ;;  %v6106_v39 = vld [vmem:[#allocation11 + $0x20] sm:$0xff]   ;;  %v6107_v40 = vld [vmem:[#allocation11 + $0x68] sm:$0xff]  }
 0x39a   :  { %3856 = vmatmul.mubr.bf16.vlgmr.msra.gmra.mrb[12].mxu1 %v3042_v44 }
 0x39b   :  { %3759 = vmatpush1.bf16.msra.mxu0 %v6001_v42  ;;  %4176 = vmatpush1.bf16.msra.mxu1 %v6025_v56 }
 0x39c   :  { %3760 = vmatprep.subr.bf16.mxu0 %v6006_v43  ;;  %4177 = vmatprep.subr.bf16.mxu1 %v6030_v58 }
 0x39f   :  { %3761 = vmatpush1.bf16.msra.mxu0 %v6004_v45  ;;  %4178 = vmatpush1.bf16.msra.mxu1 %v6028_v59 }
 0x3a0   :  { %3762 = vmatprep.subr.bf16.mxu0 %v6009_v46  ;;  %4179 = vmatprep.subr.bf16.mxu1 %v6033_v60 }
 0x3a3   :  { %3763 = vmatpush1.bf16.msra.mxu0 %v6007_v47  ;;  %4180 = vmatpush1.bf16.msra.mxu1 %v6031_v17  ;;  %v3172_v47 = vld [vmem:[%s6595_s6] sm:$0x7] }
 0x3a4   :  { %3764 = vmatprep.subr.bf16.mxu0 %v6012_v48  ;;  %4181 = vmatprep.subr.bf16.mxu1 %v6036_v11  ;;  %v3185_v48 = vrot.slane %v3172_v47, %v6538_v33 }
 0x3a7   :  { %3765 = vmatpush1.bf16.msra.mxu0 %v6010_v19  ;;  %4182 = vmatpush1.bf16.msra.mxu1 %v6034_v61 }
 0x3a8   :  { %3766 = vmatprep.subr.bf16.mxu0 %v6015_v49  ;;  %4183 = vmatprep.subr.bf16.mxu1 %v6039_v62 }
 0x3ab   :  { %3767 = vmatpush1.bf16.msra.mxu0 %v6013_v50  ;;  %4184 = vmatpush1.bf16.msra.mxu1 %v6037_v63  ;;  %v6073_v63 = vld [vmem:[#allocation10 + $0x100] ss:$8 sps:$4 sm:$0xff]  }
 0x3ac   :  { %3768 = vmatprep.subr.bf16.mxu0 %v6018_v51  ;;  %4185 = vmatprep.subr.bf16.mxu1 %v6042_v0 }
 0x3af   :  { %3769 = vmatpush1.bf16.msra.mxu0 %v6016_v52  ;;  %4186 = vmatpush1.bf16.msra.mxu1 %v6040_v1  ;;  %v6078_v1 = vld [vmem:[#allocation10 + $0x114] ss:$8 sps:$4 sm:$0xff]  }
 0x3b0   :  { %3770 = vmatprep.subr.bf16.mxu0 %v6021_v25  ;;  %4187 = vmatprep.subr.bf16.mxu1 %v6045_v2 }
 0x3b3   :  { %3771 = vmatpush1.bf16.msra.mxu0 %v6019_v53  ;;  %4188 = vmatpush1.bf16.msra.mxu1 %v6043_v3  ;;  %v6076_v3 = vld [vmem:[#allocation10 + $0x110] ss:$8 sps:$4 sm:$0xff]  }
 0x3b4   :  { %3772 = vmatprep.subr.bf16.mxu0 %v6024_v54  ;;  %4189 = vmatprep.subr.bf16.mxu1 %v6048_v4  ;;  %v3177_v54 = vrot.slane %v3172_v47, %v6517_v18  ;;  %v6326_v4 = vmov 0  }
 0x3b7   :  { %3773 = vmatpush1.bf16.msra.mxu0 %v6022_v55  ;;  %4190 = vmatpush1.bf16.msra.mxu1 %v6046_v5  ;;  %v3181_v55 = vrot.slane %v3172_v47, %v6525_v20  ;;  %v6081_v5 = vld [vmem:[#allocation10 + $0x124] ss:$8 sps:$4 sm:$0xff]  }
 0x3b8   :  { %4191 = vmatprep.subr.bf16.mxu1 %v6051_v6  ;;  %5191 = vmatprep.subr.bf16.mxu0 %v6097_v29  ;;  %v6079_v6 = vld [vmem:[#allocation10 + $0x120] ss:$8 sps:$4 sm:$0xff]   ;;  %v6112_v29 = vld [vmem:[#allocation11 + $0x38] sm:$0xff]  }
 0x3ba   :  { %3775 = vmatmul.mubr.bf16.vlgmr.msra.gmra.mrb[8].mxu0 %v3042_v44 }
 0x3bb   :  { %4192 = vmatpush1.bf16.msra.mxu1 %v6049_v7  ;;  %5192 = vmatpush3.bf16.msra.mxu0 %v6098_v30  ;;  %v6084_v7 = vld [vmem:[#allocation10 + $0x134] ss:$8 sps:$4 sm:$0xff]   ;;  %v6327_v30 = vmov 0.0  }
 0x3bc   :  { %4193 = vmatprep.subr.bf16.mxu1 %v6054_v8  ;;  %5193 = vmatprep.subr.bf16.mxu0 %v6099_v31  ;;  %v6082_v8 = vld [vmem:[#allocation10 + $0x130] ss:$8 sps:$4 sm:$0xff]   ;;  %v3923_v31 = vld [vmem:[%s6597_s8] sm:$0x3] }
 0x3bf   :  { %4194 = vmatpush1.bf16.msra.mxu1 %v6052_v9  ;;  %5194 = vmatpush3.bf16.msra.mxu0 %v6100_v32  ;;  %v6087_v9 = vld [vmem:[#allocation10 + $0x144] ss:$8 sps:$4 sm:$0xff]   ;;  %v3928_v32 = vrot.slane %v3923_v31, %v6517_v18 }
 0x3c0   :  { %4195 = vmatprep.subr.bf16.mxu1 %v6057_v10  ;;  %5195 = vmatprep.subr.bf16.mxu0 %v6101_v34  ;;  %v6085_v10 = vld [vmem:[#allocation10 + $0x140] ss:$8 sps:$4 sm:$0xff]   ;;  %v3932_v34 = vrot.slane %v3923_v31, %v6525_v20  ;;  %v6115_v20 = vld [vmem:[#allocation13 + $0x10] sm:$0xff]  }
 0x3c1   :  { %v6114_v18 = vld [vmem:[#allocation13 + $0x8] sm:$0xff]  }
 0x3c3   :  { %4196 = vmatpush1.bf16.msra.mxu1 %v6055_v12  ;;  %5196 = vmatpush3.bf16.msra.mxu0 %v6102_v35  ;;  %v6090_v12 = vld [vmem:[#allocation10 + $0x154] ss:$8 sps:$4 sm:$0xff]  }
 0x3c4   :  { %4197 = vmatprep.subr.bf16.mxu1 %v6060_v13  ;;  %5197 = vmatprep.subr.bf16.mxu0 %v6103_v36  ;;  %v6088_v13 = vld [vmem:[#allocation10 + $0x150] ss:$8 sps:$4 sm:$0xff]  }
 0x3c7   :  { %4198 = vmatpush1.bf16.msra.mxu1 %v6058_v15  ;;  %5198 = vmatpush3.bf16.msra.mxu0 %v6104_v37  ;;  %v6093_v15 = vld [vmem:[#allocation10 + $0x164] ss:$8 sps:$4 sm:$0xff]  }
 0x3c8   :  { %4199 = vmatprep.subr.bf16.mxu1 %v6063_v16  ;;  %5199 = vmatprep.subr.bf16.mxu0 %v6105_v38  ;;  %v6091_v16 = vld [vmem:[#allocation10 + $0x160] ss:$8 sps:$4 sm:$0xff]  }
 0x3cb   :  { %4200 = vmatpush1.bf16.msra.mxu1 %v6061_v21  ;;  %5200 = vmatpush3.bf16.msra.mxu0 %v6106_v39  ;;  %v6096_v21 = vld [vmem:[#allocation10 + $0x174] ss:$8 sps:$4 sm:$0xff]  }
 0x3cc   :  { %4201 = vmatprep.subr.bf16.mxu1 %v6066_v22  ;;  %5201 = vmatprep.subr.bf16.mxu0 %v6107_v40 }
 0x3cf   :  { %4202 = vmatpush1.bf16.msra.mxu1 %v6064_v23  ;;  %5202 = vmatpush3.bf16.msra.mxu0 %v6108_v41  ;;  %v6094_v23 = vld [vmem:[#allocation10 + $0x170] ss:$8 sps:$4 sm:$0xff]  }
 0x3d0   :  { %4203 = vmatprep.subr.bf16.mxu1 %v6069_v24 }
 0x3d3   :  { %4204 = vmatpush1.bf16.msra.mxu1 %v6067_v14 }
 0x3d4   :  { %4205 = vmatprep.subr.bf16.mxu1 %v6072_v26  ;;  %v6109_v26 = vld [vmem:[#allocation11 + $0x70] sm:$0xff]  }
 0x3d5   :  { %5203 = vmatprep.subr.bf16.mxu0 %v6109_v26 }
 0x3d7   :  { %4206 = vmatpush1.bf16.msra.mxu1 %v6070_v27  ;;  %v6110_v27 = vld [vmem:[#allocation11 + $0x30] sm:$0xff]  }
 0x3d8   :  { %4216 = vmatprep.subr.bf16.mxu1 %v6075_v28  ;;  %5204 = vmatpush3.bf16.msra.mxu0 %v6110_v27  ;;  %v6111_v28 = vld [vmem:[#allocation11 + $0x78] sm:$0xff]  }
 0x3d9   :  { %5205 = vmatprep.subr.bf16.mxu0 %v6111_v28 }
 0x3dc   :  { %5206 = vmatpush3.bf16.msra.mxu0 %v6112_v29 }
 0x3dd   :  { %5222 = vmatprep.subr.bf16.mxu0 %v6327_v30 }
 0x44d   :  { %v5163_v42 = vpop.f32.mrb[8].mxu1 }
 0x44e   :  { %v5164_v43 = vpop.f32.mrb[9].mxu1 }
 0x44f   :  { %v5165_v44 = vadd.f32 %v5164_v43, %v5163_v42  ;;  %v5166_v45 = vpop.f32.mrb[10].mxu1 }
 0x450   :  { %v5167_v46 = vpop.f32.mrb[11].mxu1  ;;  %v6113_v45 = vld [vmem:[#allocation13] sm:$0xff]  }
 0x451   :  { %v3818_v50 = vadd.f32 %v5165_v44, %v3185_v48  ;;  %v6116_v48 = vld [vmem:[#allocation13 + $0x18] sm:$0xff]  }
 0x46d   :  { %v5185_v19 = vpop.f32.mrb[12].mxu1 }
 0x46e   :  { %v5186_v49 = vpop.f32.mrb[13].mxu1 }
 0x46f   :  { %v5187_v51 = vadd.f32 %v5186_v49, %v5185_v19  ;;  %v5188_v52 = vpop.f32.mrb[14].mxu1  ;;  %v6117_v19 = vld [vmem:[#allocation13 + $0x20] sm:$0xff]   ;;  %v6118_v49 = vld [vmem:[#allocation13 + $0x28] sm:$0xff]  }
 0x470   :  { %v5189_v25 = vpop.f32.mrb[15].mxu1 }
 0x471   :  { %v3858_v53 = vadd.f32 %v5187_v51, %v3818_v50  ;;  %v6119_v50 = vld [vmem:[#allocation13 + $0x30] sm:$0xff]   ;;  %v6120_v51 = vld [vmem:[#allocation13 + $0x38] sm:$0xff]   ;;  %v5121_v25 = vld [vmem:[%s6599_s10] ss:$0 sm:$0xff]  ;;  %s6329_s10 = smov [#allocation14]  }
 0x472   :  { %s4573_s3 = sshll.u32 %s6329_s10, 4  ;;  %s4574_s3 = int_to_ptr.vmem [resolvable:$true] %s4573_s3 }
 0x473   :  { %v3865_v22 = vpack.c.bf16 %v3858_v53, %v3858_v53  ;;  %p6284_p1 = scmp.lt.s32.totalorder %s4574_s3, %s4574_s3 }
 0x475   :  { %v3871_v24 = vmul.bf16 1009007652, %v3865_v22  ;;  %vm3868_vm10 = vcmp.ge.bf16.partialorder %v3865_v22, 0 }
 0x477   :  { %v3874_v14 = vsel %vm3868_vm10, %v3865_v22, %v3871_v24 }
 0x48d   :  { %v3776_v56 = vpop.f32.mrb[8].mxu0 }
 0x48e   :  { %v5250_v57 = vadd.f32 %v3776_v56, %v3177_v54  ;;  %v3778_v58 = vpop.f32.mrb[9].mxu0 }
 0x48f   :  { %v5251_v59 = vadd.f32 %v3778_v58, %v3181_v55  ;;  %v3780_v60 = vpop.f32.mrb[10].mxu0 }
 0x490   :  { %v3863_v17 = vpack.c.bf16 %v5250_v57, %v5250_v57  ;;  %v3781_v11 = vpop.f32.mrb[11].mxu0 }
 0x491   :  { %v3864_v61 = vpack.c.bf16 %v5251_v59, %v5251_v59 }
 0x492   :  { %v3869_v33 = vmul.bf16 1009007652, %v3863_v17  ;;  %vm3866_vm8 = vcmp.ge.bf16.partialorder %v3863_v17, 0 }
 0x493   :  { %v3870_v62 = vmul.bf16 1009007652, %v3864_v61  ;;  %vm3867_vm9 = vcmp.ge.bf16.partialorder %v3864_v61, 0 }
 0x494   :  { %v3872_v2 = vsel %vm3866_vm8, %v3863_v17, %v3869_v33  ;;  %v5138_v17 = vld [vmem:[%s6601_s12] ss:$0 sm:$0xff]  ;;  %s6279_s12 = scalar_lea.vmem %s4574_s3, 128 }
 0x495   :  { %v3873_v0 = vsel %vm3867_vm9, %v3864_v61, %v3870_v62  ;;  %p6280_p0 = scmp.ne.s32.totalorder %s4574_s3, %s6279_s12  ;;  %p6285_p2 = scmp.lt.s32.totalorder %s6279_s12, %s6279_s12 }
 0x496   :  { %4207 = vmatprep.mubr.bf16.mxu1 %v3873_v0 }
 0x497   :  { %4208 = vmatmul.mubr.bf16.vlgmr.msra.gmra.mrb[16].mxu1 %v3872_v2  ;;  %p6286_p3 = por %p6285_p2, %p6284_p1 }
 0x498   :  { %4217 = vmatpush1.bf16.msra.mxu1 %v6073_v63  ;;  %4248 = vmatprep.mubr.bf16.mxu1 %v6326_v4 }
 0x499   :  { %4218 = vmatprep.subr.bf16.mxu1 %v6078_v1  ;;  %p6287_p4 = pnand %p6286_p3, %p6280_p0 }
 0x49c   :  { %4219 = vmatpush1.bf16.msra.mxu1 %v6076_v3 }
 0x49d   :  { %4220 = vmatprep.subr.bf16.mxu1 %v6081_v5 }
 0x4a0   :  { %4221 = vmatpush1.bf16.msra.mxu1 %v6079_v6 }
 0x4a1   :  { %4222 = vmatprep.subr.bf16.mxu1 %v6084_v7 }
 0x4a4   :  { %4223 = vmatpush1.bf16.msra.mxu1 %v6082_v8 }
 0x4a5   :  { %4224 = vmatprep.subr.bf16.mxu1 %v6087_v9 }
 0x4a8   :  { %4225 = vmatpush1.bf16.msra.mxu1 %v6085_v10 }
 0x4a9   :  { %4226 = vmatprep.subr.bf16.mxu1 %v6090_v12 }
 0x4ac   :  { %4227 = vmatpush1.bf16.msra.mxu1 %v6088_v13 }
 0x4ad   :  { %4228 = vmatprep.subr.bf16.mxu1 %v6093_v15 }
 0x4b0   :  { %4229 = vmatpush1.bf16.msra.mxu1 %v6091_v16 }
 0x4b1   :  { %4230 = vmatprep.subr.bf16.mxu1 %v6096_v21 }
 0x4b4   :  { %4231 = vmatpush1.bf16.msra.mxu1 %v6094_v23 }
 0x4b7   :  { %4249 = vmatmul.mubr.bf16.vlgmr.msra.gmra.mrb[16].mxu1 %v3874_v14 }
 0x58a   :  { %v4250_v35 = vpop.f32.mrb[16].mxu1 }
 0x58b   :  { %v5252_v36 = vadd.f32 %v4250_v35, %v3928_v32  ;;  %v4252_v37 = vpop.f32.mrb[17].mxu1 }
 0x58c   :  { %v5253_v38 = vadd.f32 %v4252_v37, %v3932_v34  ;;  %v4254_v39 = vpop.f32.mrb[18].mxu1 }
 0x58d   :  { %v4257_v40 = vpack.c.bf16 %v5252_v36, %v5252_v36  ;;  %v4255_v41 = vpop.f32.mrb[19].mxu1 }
 0x58e   :  { %v4258_v42 = vpack.c.bf16 %v5253_v38, %v5253_v38 }
 0x58f   :  { %v4261_v43 = vmul.bf16 1009007652, %v4257_v40  ;;  %vm4259_vm11 = vcmp.ge.bf16.partialorder %v4257_v40, 0 }
 0x590   :  { %v4262_v44 = vmul.bf16 1009007652, %v4258_v42  ;;  %vm4260_vm12 = vcmp.ge.bf16.partialorder %v4258_v42, 0 }
 0x591   :  { %v4263_v47 = vsel %vm4259_vm11, %v4257_v40, %v4261_v43 }
 0x592   :  { %v4264_v46 = vsel %vm4260_vm12, %v4258_v42, %v4262_v44 }
 0x593   :  { %4432 = vmatprep.mubr.bf16.mxu0 %v4264_v46 }
 0x594   :  { %4433 = vmatmul.mubr.bf16.vlgmr.msra.gmra.mrb[12].mxu0 %v4263_v47 }
 0x595   :  { %5223 = vmatpush3.bf16.msra.mxu0 %v6113_v45  ;;  %5238 = vmatprep.mubr.msk.bf16.mxu0 %vm6328_vm13, %v6327_v30 }
 0x596   :  { %5224 = vmatprep.subr.bf16.mxu0 %v6327_v30 }
 0x599   :  { %5225 = vmatpush3.bf16.msra.mxu0 %v6114_v18 }
 0x59a   :  { %5226 = vmatprep.subr.bf16.mxu0 %v6327_v30 }
 0x59d   :  { %5227 = vmatpush3.bf16.msra.mxu0 %v6115_v20 }
 0x59e   :  { %5228 = vmatprep.subr.bf16.mxu0 %v6327_v30 }
 0x5a1   :  { %5229 = vmatpush3.bf16.msra.mxu0 %v6116_v48 }
 0x5a2   :  { %5230 = vmatprep.subr.bf16.mxu0 %v6327_v30 }
 0x5a5   :  { %5231 = vmatpush3.bf16.msra.mxu0 %v6117_v19 }
 0x5a6   :  { %5232 = vmatprep.subr.bf16.mxu0 %v6327_v30 }
 0x5a9   :  { %5233 = vmatpush3.bf16.msra.mxu0 %v6118_v49 }
 0x5aa   :  { %5234 = vmatprep.subr.bf16.mxu0 %v6327_v30 }
 0x5ad   :  { %5235 = vmatpush3.bf16.msra.mxu0 %v6119_v50 }
 0x5ae   :  { %5236 = vmatprep.subr.bf16.mxu0 %v6327_v30 }
 0x5b1   :  { %5237 = vmatpush3.bf16.msra.mxu0 %v6120_v51 }
 0x667   :  { %v5207_v52 = vpop.f32.mrb[12].mxu0 }
 0x668   :  { %v5208_v53 = vpop.f32.mrb[13].mxu0 }
 0x669   :  { %v5209_v54 = vadd.f32 %v5208_v53, %v5207_v52  ;;  %v5210_v55 = vpop.f32.mrb[14].mxu0 }
 0x66a   :  { %v5211_v56 = vpop.f32.mrb[15].mxu0 }
 0x66b   :  { %v4435_v57 = vadd.f32 %v5209_v54, %v5121_v25 }
 0x66d   :  { %v4440_v58 = vpack.c.bf16 %v4435_v57, %v4435_v57 }
 0x66f   :  { %v4442_v59 = vmul.bf16 1009007652, %v4440_v58  ;;  %vm4441_vm14 = vcmp.ge.bf16.partialorder %v4440_v58, 0 }
 0x671   :  { %v4443_v60 = vsel %vm4441_vm14, %v4440_v58, %v4442_v59 }
 0x672   :  { %5239 = vmatmul.mubr.bf16.vlgmr.msra.gmra.mrb[16].mxu0 %v4443_v60 }
 0x745   :  { %v4549_v11 = vpop.f32.mrb[16].mxu0 }
 0x746   :  { %v4550_v61 = vadd.f32 %v5138_v17, %v4549_v11  ;;  %v5240_v33 = vpop.f32.mrb[17].mxu0 }
 0x747   :  { %v4552_v62 = vpop.f32.mrb[18].mxu0 }
 0x748   :  { %4555 = vmax.xlane.f32.xlu0 %v4550_v61  ;;  %v5241_v63 = vpop.f32.mrb[19].mxu0 }
 0x7d5   :  { %v4556_v0 = vpop.xlane.xlu0 %4555 }
 0x7d6   :  { %v4557_v1 = vsub.f32 %v4550_v61, %v4556_v0 }
 0x7d8   :  { %v4558_v2 = vmul.f32 1.442695, %v4557_v1 }
 0x7da   :  { %6121 = vpow2.f32 %v4558_v2 }
 0x7e4   :  { %v6122_v3 = vpop.eup %6121 }
 0x7e5   :  { %4560 = vadd.xlane.f32.xlu0 %v6122_v3 }
 0x872   :  { %v4561_v4 = vpop.xlane.xlu0 %4560 }
 0x873   :  { %6123 = vlog2.f32 %v4561_v4 }
 0x87d   :  { %v6124_v5 = vpop.eup %6123 }
 0x87e   :  { %v4563_v6 = vmul.f32 0.6931472, %v6124_v5 }
 0x880   :  { %v4564_v7 = vadd.f32 %v4563_v6, %v4556_v0 }
 0x882   :  { %v4565_v8 = vsub.f32 %v4550_v61, %v4564_v7 }
 0x884   :  { %4566 = vst [vmem:[#allocation14] sm:$0xff] %v4565_v8 }
 0x885   :  { %6290 = shalt.err (!%p6287_p4)
}
 0x886   :  { %s6291_s20 = scalar_lea.hbm %s6602_s13, 128 }
 0x887   :  { %p6292_p5 = scmp.ne.s32.totalorder %s6602_s13, %s6291_s20  ;;  %p6295_p6 = scmp.lt.u32.totalorder %s6291_s20, %s6602_s13 }
 0x889   :  { %p6297_p7 = pnand %p6295_p6, %p6292_p5 }
 0x88b   :  { %6300 = shalt.err (!%p6297_p7)
}
 0x88c   :  { %4576 = dma.vmem_to_hbm [thread:$0]  %s4574_s3, 128, %s6602_s13, [#allocation4]  }
 0x88d   :  { %6309 = dma.done.wait [#allocation4], 128  }
 0x88e   :  { %6310 = vsyncadd [#allocation4], 4294967168 }
 0x88f   :  { %4580 = vsyncpa [#allocation3], 1 }
 0x890   :  { %4581 = vsyncpa [#allocation6], 1 }
 0x891   :  { %4582 = vsyncpa [#allocation9], 1 }
 0x892   :  { %4583 = vsyncpa [#allocation12], 1 }
 0x893   :  { %4584 = vsyncpa [#allocation4], 1 }

// kernel: tpu_custom_call.1
= control target key start
LH: loop header
LB: loop body
LE: loop exit
PB: predicated region body
PF: predicated region fallthrough
CT: control target
= control target key end

     0   :  { %18 = vsyncpa [#allocation3], 0  ;;  %s6589_s0 = inlined_call_operand.hbm [shape: bf16[8,1024], index: 0, kind: input, shape index: {}]   ;;  %s6590_s1 = inlined_call_operand.hbm [shape: bf16[1024,512], index: 1, kind: input, shape index: {}]   ;;  %s6591_s2 = inlined_call_operand.vmem [shape: f32[1,512], index: 2, kind: input, shape index: {}]   ;;  %s6592_s3 = inlined_call_operand.hbm [shape: bf16[512,512], index: 3, kind: input, shape index: {}]   ;;  %s6593_s4 = inlined_call_operand.vmem [shape: f32[1,512], index: 4, kind: input, shape index: {}]   ;;  %s6594_s5 = inlined_call_operand.hbm [shape: bf16[512,384], index: 5, kind: input, shape index: {}]   ;;  %s6595_s6 = inlined_call_operand.vmem [shape: f32[1,384], index: 6, kind: input, shape index: {}]   ;;  %s6596_s7 = inlined_call_operand.hbm [shape: bf16[384,256], index: 7, kind: input, shape index: {}]   ;;  %s6597_s8 = inlined_call_operand.vmem [shape: f32[1,256], index: 8, kind: input, shape index: {}]   ;;  %s6598_s9 = inlined_call_operand.hbm [shape: bf16[256,128], index: 9, kind: input, shape index: {}]   ;;  %s6599_s10 = inlined_call_operand.vmem [shape: f32[1,128], index: 10, kind: input, shape index: {}]   ;;  %s6600_s11 = inlined_call_operand.hbm [shape: bf16[128,128], index: 11, kind: input, shape index: {}]   ;;  %s6601_s12 = inlined_call_operand.vmem [shape: f32[1,128], index: 12, kind: input, shape index: {}]   ;;  %s6602_s13 = inlined_call_operand.hbm [shape: f32[8,128], index: 13, kind: output, shape index: {}]  }
   0x1   :  { %19 = vsyncpa [#allocation6], 0 }
   0x2   :  { %20 = vsyncpa [#allocation9], 0 }
   0x3   :  { %21 = vsyncpa [#allocation12], 0 }
   0x4   :  { %22 = vsyncpa [#allocation4], 0  ;;  %s6311_s25 = smov [#allocation5]   ;;  %s6125_s29 = scalar_lea.hbm %s6590_s1, 32768 }
   0x5   :  { %s38_s26 = sshll.u32 %s6311_s25, 4  ;;  %p6126_p0 = scmp.ne.s32.totalorder %s6590_s1, %s6125_s29  ;;  %s39_s26 = int_to_ptr.vmem [resolvable:$true] %s38_s26 }
   0x6   :  { %p6129_p1 = scmp.lt.u32.totalorder %s6125_s29, %s6590_s1 }
   0x8   :  { %p6131_p2 = pnand %p6129_p1, %p6126_p0 }
   0xa   :  { %6134 = shalt.err (!%p6131_p2)
}
   0xb   :  { %s6135_s17 = scalar_lea.vmem %s39_s26, 32768  ;;  %p6140_p4 = scmp.lt.s32.totalorder %s39_s26, %s39_s26 }
   0xc   :  { %p6136_p3 = scmp.ne.s32.totalorder %s39_s26, %s6135_s17  ;;  %p6141_p5 = scmp.lt.s32.totalorder %s6135_s17, %s6135_s17 }
   0xe   :  { %p6142_p6 = por %p6141_p5, %p6140_p4 }
  0x10   :  { %p6143_p7 = pnand %p6142_p6, %p6136_p3 }
  0x12   :  { %6146 = shalt.err (!%p6143_p7)
}
  0x13   :  { %s6312_s18 = smov 256   ;;  %s6313_s19 = smov 16  }
  0x14   :  { %44 = dma.hbm_to_vmem [thread:$0]  %s6590_s1, 32768, %s39_s26, [#allocation6], %s6312_s18, %s6312_s18, %s6313_s19  }
  0x15   :  { %s6314_s22 = smov [#allocation8]   ;;  %s6147_s27 = scalar_lea.hbm %s6594_s5, 12288 }
  0x16   :  { %s66_s23 = sshll.u32 %s6314_s22, 4  ;;  %p6148_p8 = scmp.ne.s32.totalorder %s6594_s5, %s6147_s27  ;;  %s67_s23 = int_to_ptr.vmem [resolvable:$true] %s66_s23 }
  0x17   :  { %p6151_p9 = scmp.lt.u32.totalorder %s6147_s27, %s6594_s5 }
  0x19   :  { %p6153_p10 = pnand %p6151_p9, %p6148_p8 }
  0x1b   :  { %6156 = shalt.err (!%p6153_p10)
}
  0x1c   :  { %s6157_s15 = scalar_lea.vmem %s67_s23, 12288  ;;  %p6162_p12 = scmp.lt.s32.totalorder %s67_s23, %s67_s23 }
  0x1d   :  { %p6158_p11 = scmp.ne.s32.totalorder %s67_s23, %s6157_s15  ;;  %p6163_p13 = scmp.lt.s32.totalorder %s6157_s15, %s6157_s15 }
  0x1f   :  { %p6164_p0 = por %p6163_p13, %p6162_p12 }
  0x21   :  { %p6165_p1 = pnand %p6164_p0, %p6158_p11 }
  0x23   :  { %6168 = shalt.err (!%p6165_p1)
}
  0x24   :  { %s6315_s1 = smov 192   ;;  %s6316_s26 = smov 12  }
  0x25   :  { %72 = dma.hbm_to_vmem [thread:$0]  %s6594_s5, 12288, %s67_s23, [#allocation9], %s6315_s1, %s6315_s1, %s6316_s26  }
  0x26   :  { %s6317_s20 = smov [#allocation11]   ;;  %s6169_s25 = scalar_lea.hbm %s6598_s9, 2048 }
  0x27   :  { %s94_s21 = sshll.u32 %s6317_s20, 4  ;;  %p6170_p2 = scmp.ne.s32.totalorder %s6598_s9, %s6169_s25  ;;  %s95_s21 = int_to_ptr.vmem [resolvable:$true] %s94_s21 }
  0x28   :  { %p6173_p3 = scmp.lt.u32.totalorder %s6169_s25, %s6598_s9 }
  0x2a   :  { %p6175_p4 = pnand %p6173_p3, %p6170_p2 }
  0x2c   :  { %6178 = shalt.err (!%p6175_p4)
}
  0x2d   :  { %s6179_s14 = scalar_lea.vmem %s95_s21, 2048  ;;  %p6184_p6 = scmp.lt.s32.totalorder %s95_s21, %s95_s21 }
  0x2e   :  { %p6180_p5 = scmp.ne.s32.totalorder %s95_s21, %s6179_s14  ;;  %p6185_p7 = scmp.lt.s32.totalorder %s6179_s14, %s6179_s14 }
  0x30   :  { %p6186_p8 = por %p6185_p7, %p6184_p6 }
  0x32   :  { %p6187_p9 = pnand %p6186_p8, %p6180_p5 }
  0x34   :  { %6190 = shalt.err (!%p6187_p9)
}
  0x35   :  { %s6318_s5 = smov 64   ;;  %s6319_s23 = smov 4  }
  0x36   :  { %100 = dma.hbm_to_vmem [thread:$0]  %s6598_s9, 2048, %s95_s21, [#allocation12], %s6318_s5, %s6318_s5, %s6319_s23  }
  0x37   :  { %s6320_s26 = smov [#allocation2]   ;;  %s6321_s17 = smov [#allocation7]  }
  0x38   :  { %s29_s16 = sshll.u32 %s6320_s26, 4  ;;  %s52_s20 = sshll.u32 %s6321_s17, 4  ;;  %s30_s16 = int_to_ptr.vmem [resolvable:$true] %s29_s16  ;;  %s53_s20 = int_to_ptr.vmem [resolvable:$true] %s52_s20 }
  0x39   :  { %s6191_s25 = scalar_lea.hbm %s6589_s0, 512 }
  0x3a   :  { %p6192_p10 = scmp.ne.s32.totalorder %s6589_s0, %s6191_s25  ;;  %p6195_p11 = scmp.lt.u32.totalorder %s6191_s25, %s6589_s0 }
  0x3c   :  { %p6197_p12 = pnand %p6195_p11, %p6192_p10 }
  0x3e   :  { %6200 = shalt.err (!%p6197_p12)
}
  0x3f   :  { %s6201_s9 = scalar_lea.vmem %s30_s16, 512  ;;  %p6206_p0 = scmp.lt.s32.totalorder %s30_s16, %s30_s16 }
  0x40   :  { %p6202_p13 = scmp.ne.s32.totalorder %s30_s16, %s6201_s9  ;;  %p6207_p1 = scmp.lt.s32.totalorder %s6201_s9, %s6201_s9 }
  0x42   :  { %p6208_p2 = por %p6207_p1, %p6206_p0 }
  0x44   :  { %p6209_p3 = pnand %p6208_p2, %p6202_p13 }
  0x46   :  { %6212 = shalt.err (!%p6209_p3)
}
  0x47   :  { %32 = dma.hbm_to_vmem [thread:$0]  %s6589_s0, 512, %s30_s16, [#allocation3]  }
  0x48   :  { %s6213_s26 = scalar_lea.hbm %s6592_s3, 16384 }
  0x49   :  { %p6214_p4 = scmp.ne.s32.totalorder %s6592_s3, %s6213_s26  ;;  %p6217_p5 = scmp.lt.u32.totalorder %s6213_s26, %s6592_s3 }
  0x4b   :  { %p6219_p6 = pnand %p6217_p5, %p6214_p4 }
  0x4d   :  { %6222 = shalt.err (!%p6219_p6)
}
  0x4e   :  { %s6223_s27 = scalar_lea.vmem %s53_s20, 16384  ;;  %p6228_p8 = scmp.lt.s32.totalorder %s53_s20, %s53_s20 }
  0x4f   :  { %p6224_p7 = scmp.ne.s32.totalorder %s53_s20, %s6223_s27  ;;  %p6229_p9 = scmp.lt.s32.totalorder %s6223_s27, %s6223_s27 }
  0x51   :  { %p6230_p10 = por %p6229_p9, %p6228_p8 }
  0x53   :  { %p6231_p11 = pnand %p6230_p10, %p6224_p7 }
  0x55   :  { %6234 = shalt.err (!%p6231_p11)
}
  0x56   :  { %58 = dma.hbm_to_vmem [thread:$0]  %s6592_s3, 16384, %s53_s20, [#allocation6], %s6312_s18, %s6312_s18, %s6313_s19  }
  0x57   :  { %s6322_s28 = smov [#allocation10]   ;;  %s6235_s21 = scalar_lea.hbm %s6596_s7, 6144 }
  0x58   :  { %s80_s29 = sshll.u32 %s6322_s28, 4  ;;  %p6236_p12 = scmp.ne.s32.totalorder %s6596_s7, %s6235_s21  ;;  %s81_s29 = int_to_ptr.vmem [resolvable:$true] %s80_s29 }
  0x59   :  { %p6239_p13 = scmp.lt.u32.totalorder %s6235_s21, %s6596_s7 }
  0x5b   :  { %p6241_p0 = pnand %p6239_p13, %p6236_p12 }
  0x5d   :  { %6244 = shalt.err (!%p6241_p0)
}
  0x5e   :  { %s6245_s17 = scalar_lea.vmem %s81_s29, 6144  ;;  %p6250_p2 = scmp.lt.s32.totalorder %s81_s29, %s81_s29 }
  0x5f   :  { %p6246_p1 = scmp.ne.s32.totalorder %s81_s29, %s6245_s17  ;;  %p6251_p3 = scmp.lt.s32.totalorder %s6245_s17, %s6245_s17 }
  0x61   :  { %p6252_p4 = por %p6251_p3, %p6250_p2 }
  0x63   :  { %p6253_p5 = pnand %p6252_p4, %p6246_p1 }
  0x65   :  { %6256 = shalt.err (!%p6253_p5)
}
  0x66   :  { %s6323_s3 = smov 128   ;;  %s6324_s18 = smov 8  }
  0x67   :  { %86 = dma.hbm_to_vmem [thread:$0]  %s6596_s7, 6144, %s81_s29, [#allocation9], %s6323_s3, %s6323_s3, %s6324_s18  }
  0x68   :  { %s6325_s22 = smov [#allocation13]   ;;  %s6257_s0 = scalar_lea.hbm %s6600_s11, 1024 }
  0x69   :  { %s108_s24 = sshll.u32 %s6325_s22, 4  ;;  %p6258_p6 = scmp.ne.s32.totalorder %s6600_s11, %s6257_s0  ;;  %s109_s24 = int_to_ptr.vmem [resolvable:$true] %s108_s24 }
  0x6a   :  { %p6261_p7 = scmp.lt.u32.totalorder %s6257_s0, %s6600_s11 }
  0x6c   :  { %p6263_p8 = pnand %p6261_p7, %p6258_p6 }
  0x6e   :  { %6266 = shalt.err (!%p6263_p8)
}
  0x6f   :  { %s6267_s21 = scalar_lea.vmem %s109_s24, 1024  ;;  %p6272_p10 = scmp.lt.s32.totalorder %s109_s24, %s109_s24 }
  0x70   :  { %p6268_p9 = scmp.ne.s32.totalorder %s109_s24, %s6267_s21  ;;  %p6273_p11 = scmp.lt.s32.totalorder %s6267_s21, %s6267_s21 }
  0x72   :  { %p6274_p12 = por %p6273_p11, %p6272_p10 }
  0x74   :  { %p6275_p13 = pnand %p6274_p12, %p6268_p9 }
  0x76   :  { %6278 = shalt.err (!%p6275_p13)
}
  0x77   :  { %114 = dma.hbm_to_vmem [thread:$0]  %s6600_s11, 1024, %s109_s24, [#allocation12], %s6318_s5, %s6318_s5, %s6319_s23  }
  0x78   :  { %6301 = dma.done.wait [#allocation3], 512  }
  0x79   :  { %6302 = vsyncadd [#allocation3], 4294966784 }
  0x7a   :  { %6303 = dma.done.wait [#allocation6], 49152  }
  0x7b   :  { %6304 = vsyncadd [#allocation6], 4294918144 }
  0x7c   :  { %6305 = dma.done.wait [#allocation9], 18432  }
  0x7d   :  { %6306 = vsyncadd [#allocation9], 4294948864 }
  0x7e   :  { %6307 = dma.done.wait [#allocation12], 3072  }
  0x7f   :  { %6308 = vsyncadd [#allocation12], 4294964224  ;;  %v5313_v0 = vld [vmem:[#allocation5 + $0x4] ss:$16 sps:$4 sm:$0xff]   ;;  %v5315_v1 = vld [vmem:[#allocation5 + $0xc] ss:$16 sps:$4 sm:$0xff]  }
  0x80   :  { %1730 = vmatprep.subr.bf16.mxu0 %v5313_v0  ;;  %v5317_v2 = vld [vmem:[#allocation5] ss:$16 sps:$4 sm:$0xff]   ;;  %v5318_v3 = vld [vmem:[#allocation5 + $0x8] ss:$16 sps:$4 sm:$0xff]   ;;  %1894 = vmatprep.subr.bf16.mxu1 %v5315_v1  ;;  %v5319_v4 = vld [vmem:[#allocation5 + $0x24] ss:$16 sps:$4 sm:$0xff]  }
  0x81   :  { %1731 = vmatpush1.bf16.msra.mxu0 %v5317_v2  ;;  %1895 = vmatpush1.bf16.msra.mxu1 %v5318_v3  ;;  %v5321_v5 = vld [vmem:[#allocation5 + $0x2c] ss:$16 sps:$4 sm:$0xff]   ;;  %v5323_v6 = vld [vmem:[#allocation5 + $0x20] ss:$16 sps:$4 sm:$0xff]   ;;  %v5324_v7 = vld [vmem:[#allocation5 + $0x28] ss:$16 sps:$4 sm:$0xff]  }
  0x82   :  { %1732 = vmatprep.subr.bf16.mxu0 %v5319_v4  ;;  %1896 = vmatprep.subr.bf16.mxu1 %v5321_v5  ;;  %v5325_v8 = vld [vmem:[#allocation5 + $0x44] ss:$16 sps:$4 sm:$0xff]   ;;  %v5327_v9 = vld [vmem:[#allocation5 + $0x4c] ss:$16 sps:$4 sm:$0xff]   ;;  %v5329_v10 = vld [vmem:[#allocation5 + $0x40] ss:$16 sps:$4 sm:$0xff]  }
  0x83   :  { %v5330_v11 = vld [vmem:[#allocation5 + $0x48] ss:$16 sps:$4 sm:$0xff]   ;;  %v5331_v12 = vld [vmem:[#allocation5 + $0x64] ss:$16 sps:$4 sm:$0xff]   ;;  %v5333_v13 = vld [vmem:[#allocation5 + $0x6c] ss:$16 sps:$4 sm:$0xff]  }
  0x84   :  { %v5335_v14 = vld [vmem:[#allocation5 + $0x60] ss:$16 sps:$4 sm:$0xff]   ;;  %v5336_v15 = vld [vmem:[#allocation5 + $0x68] ss:$16 sps:$4 sm:$0xff]   ;;  %v5337_v16 = vld [vmem:[#allocation5 + $0x84] ss:$16 sps:$4 sm:$0xff]  }
  0x85   :  { %1733 = vmatpush1.bf16.msra.mxu0 %v5323_v6  ;;  %1897 = vmatpush1.bf16.msra.mxu1 %v5324_v7  ;;  %v5339_v17 = vld [vmem:[#allocation5 + $0x8c] ss:$16 sps:$4 sm:$0xff]   ;;  %v5341_v18 = vld [vmem:[#allocation5 + $0x80] ss:$16 sps:$4 sm:$0xff]   ;;  %v5342_v19 = vld [vmem:[#allocation5 + $0x88] ss:$16 sps:$4 sm:$0xff]  }
  0x86   :  { %1734 = vmatprep.subr.bf16.mxu0 %v5325_v8  ;;  %1898 = vmatprep.subr.bf16.mxu1 %v5327_v9  ;;  %v5343_v20 = vld [vmem:[#allocation5 + $0xa4] ss:$16 sps:$4 sm:$0xff]   ;;  %v5345_v21 = vld [vmem:[#allocation5 + $0xac] ss:$16 sps:$4 sm:$0xff]   ;;  %v5347_v22 = vld [vmem:[#allocation5 + $0xa0] ss:$16 sps:$4 sm:$0xff]  }
  0x87   :  { %v5348_v23 = vld [vmem:[#allocation5 + $0xa8] ss:$16 sps:$4 sm:$0xff]   ;;  %v5349_v24 = vld [vmem:[#allocation5 + $0xc4] ss:$16 sps:$4 sm:$0xff]   ;;  %v5351_v25 = vld [vmem:[#allocation5 + $0xcc] ss:$16 sps:$4 sm:$0xff]  }
  0x88   :  { %v5353_v26 = vld [vmem:[#allocation5 + $0xc0] ss:$16 sps:$4 sm:$0xff]   ;;  %v5354_v27 = vld [vmem:[#allocation5 + $0xc8] ss:$16 sps:$4 sm:$0xff]   ;;  %v5355_v28 = vld [vmem:[#allocation5 + $0xe4] ss:$16 sps:$4 sm:$0xff]  }
  0x89   :  { %1735 = vmatpush1.bf16.msra.mxu0 %v5329_v10  ;;  %1899 = vmatpush1.bf16.msra.mxu1 %v5330_v11  ;;  %v5357_v29 = vld [vmem:[#allocation5 + $0xec] ss:$16 sps:$4 sm:$0xff]   ;;  %v5359_v30 = vld [vmem:[#allocation5 + $0xe0] ss:$16 sps:$4 sm:$0xff]   ;;  %v5360_v31 = vld [vmem:[#allocation5 + $0xe8] ss:$16 sps:$4 sm:$0xff]  }
  0x8a   :  { %1736 = vmatprep.subr.bf16.mxu0 %v5331_v12  ;;  %1900 = vmatprep.subr.bf16.mxu1 %v5333_v13  ;;  %v5361_v32 = vld [vmem:[#allocation5 + $0x104] ss:$16 sps:$4 sm:$0xff]   ;;  %v5363_v33 = vld [vmem:[#allocation5 + $0x10c] ss:$16 sps:$4 sm:$0xff]   ;;  %v5365_v34 = vld [vmem:[#allocation5 + $0x100] ss:$16 sps:$4 sm:$0xff]  }
  0x8b   :  { %v5366_v35 = vld [vmem:[#allocation5 + $0x108] ss:$16 sps:$4 sm:$0xff]   ;;  %v5367_v36 = vld [vmem:[#allocation5 + $0x124] ss:$16 sps:$4 sm:$0xff]   ;;  %v5369_v37 = vld [vmem:[#allocation5 + $0x12c] ss:$16 sps:$4 sm:$0xff]  }
  0x8c   :  { %v5371_v38 = vld [vmem:[#allocation5 + $0x120] ss:$16 sps:$4 sm:$0xff]   ;;  %v5372_v39 = vld [vmem:[#allocation5 + $0x128] ss:$16 sps:$4 sm:$0xff]   ;;  %v5373_v40 = vld [vmem:[#allocation5 + $0x144] ss:$16 sps:$4 sm:$0xff]  }
  0x8d   :  { %1737 = vmatpush1.bf16.msra.mxu0 %v5335_v14  ;;  %1901 = vmatpush1.bf16.msra.mxu1 %v5336_v15  ;;  %v5375_v41 = vld [vmem:[#allocation5 + $0x14c] ss:$16 sps:$4 sm:$0xff]   ;;  %v5377_v42 = vld [vmem:[#allocation5 + $0x140] ss:$16 sps:$4 sm:$0xff]   ;;  %v5378_v43 = vld [vmem:[#allocation5 + $0x148] ss:$16 sps:$4 sm:$0xff]  }
  0x8e   :  { %1738 = vmatprep.subr.bf16.mxu0 %v5337_v16  ;;  %1902 = vmatprep.subr.bf16.mxu1 %v5339_v17  ;;  %v5379_v44 = vld [vmem:[#allocation5 + $0x164] ss:$16 sps:$4 sm:$0xff]   ;;  %v5381_v45 = vld [vmem:[#allocation5 + $0x16c] ss:$16 sps:$4 sm:$0xff]   ;;  %v5383_v47 = vld [vmem:[#allocation5 + $0x160] ss:$16 sps:$4 sm:$0xff]  }
  0x8f   :  { %v140_v46 = vld [vmem:[#allocation2] sm:$0xff]  ;;  %v5384_v49 = vld [vmem:[#allocation5 + $0x168] ss:$16 sps:$4 sm:$0xff]   ;;  %v5387_v51 = vld [vmem:[#allocation5 + $0x18c] ss:$16 sps:$4 sm:$0xff]   ;;  %vm6328_vm13 = vmmov 0  }
  0x90   :  { %v4586_v48 = vcombine.high %v140_v46, %v140_v46  ;;  %v5385_v50 = vld [vmem:[#allocation5 + $0x184] ss:$16 sps:$4 sm:$0xff]   ;;  %v5389_v52 = vld [vmem:[#allocation5 + $0x180] ss:$16 sps:$4 sm:$0xff]   ;;  %v5390_v53 = vld [vmem:[#allocation5 + $0x188] ss:$16 sps:$4 sm:$0xff]   ;;  %v4585_v4 = vcombine.low %v140_v46, %v140_v46 }
  0x91   :  { %1739 = vmatpush1.bf16.msra.mxu0 %v5341_v18  ;;  %1903 = vmatpush1.bf16.msra.mxu1 %v5342_v19  ;;  %v5391_v54 = vld [vmem:[#allocation5 + $0x1a4] ss:$16 sps:$4 sm:$0xff]   ;;  %v5393_v55 = vld [vmem:[#allocation5 + $0x1ac] ss:$16 sps:$4 sm:$0xff]   ;;  %v5395_v56 = vld [vmem:[#allocation5 + $0x1a0] ss:$16 sps:$4 sm:$0xff]  }
  0x92   :  { %1740 = vmatprep.subr.bf16.mxu0 %v5343_v20  ;;  %1904 = vmatprep.subr.bf16.mxu1 %v5345_v21  ;;  %v5396_v57 = vld [vmem:[#allocation5 + $0x1a8] ss:$16 sps:$4 sm:$0xff]   ;;  %v5397_v58 = vld [vmem:[#allocation5 + $0x1c4] ss:$16 sps:$4 sm:$0xff]   ;;  %v5399_v59 = vld [vmem:[#allocation5 + $0x1cc] ss:$16 sps:$4 sm:$0xff]  }
  0x93   :  { %1762 = vmatprep.mubr.bf16.mxu0 %v4586_v48  ;;  %1926 = vmatprep.mubr.bf16.mxu1 %v4586_v48  ;;  %v5401_v60 = vld [vmem:[#allocation5 + $0x1c0] ss:$16 sps:$4 sm:$0xff]   ;;  %v5402_v61 = vld [vmem:[#allocation5 + $0x1c8] ss:$16 sps:$4 sm:$0xff]   ;;  %v5403_v62 = vld [vmem:[#allocation5 + $0x1e4] ss:$16 sps:$4 sm:$0xff]  }
  0x94   :  { %v5405_v63 = vld [vmem:[#allocation5 + $0x1ec] ss:$16 sps:$4 sm:$0xff]   ;;  %v5407_v0 = vld [vmem:[#allocation5 + $0x1e0] ss:$16 sps:$4 sm:$0xff]   ;;  %v5408_v1 = vld [vmem:[#allocation5 + $0x1e8] ss:$16 sps:$4 sm:$0xff]  }
  0x95   :  { %1741 = vmatpush1.bf16.msra.mxu0 %v5347_v22  ;;  %1905 = vmatpush1.bf16.msra.mxu1 %v5348_v23  ;;  %v5413_v2 = vld [vmem:[#allocation5 + $0x204] ss:$16 sps:$4 sm:$0xff]   ;;  %v5416_v3 = vld [vmem:[#allocation5 + $0x20c] ss:$16 sps:$4 sm:$0xff]   ;;  %v5411_v5 = vld [vmem:[#allocation5 + $0x200] ss:$16 sps:$4 sm:$0xff]  }
  0x96   :  { %1742 = vmatprep.subr.bf16.mxu0 %v5349_v24  ;;  %1906 = vmatprep.subr.bf16.mxu1 %v5351_v25  ;;  %v5414_v6 = vld [vmem:[#allocation5 + $0x208] ss:$16 sps:$4 sm:$0xff]   ;;  %v5419_v7 = vld [vmem:[#allocation5 + $0x224] ss:$16 sps:$4 sm:$0xff]   ;;  %v5422_v8 = vld [vmem:[#allocation5 + $0x22c] ss:$16 sps:$4 sm:$0xff]  }
  0x97   :  { %v5417_v9 = vld [vmem:[#allocation5 + $0x220] ss:$16 sps:$4 sm:$0xff]   ;;  %v5420_v10 = vld [vmem:[#allocation5 + $0x228] ss:$16 sps:$4 sm:$0xff]   ;;  %v5425_v11 = vld [vmem:[#allocation5 + $0x244] ss:$16 sps:$4 sm:$0xff]  }
  0x98   :  { %v5428_v12 = vld [vmem:[#allocation5 + $0x24c] ss:$16 sps:$4 sm:$0xff]   ;;  %v5423_v13 = vld [vmem:[#allocation5 + $0x240] ss:$16 sps:$4 sm:$0xff]   ;;  %v5426_v14 = vld [vmem:[#allocation5 + $0x248] ss:$16 sps:$4 sm:$0xff]  }
  0x99   :  { %1743 = vmatpush1.bf16.msra.mxu0 %v5353_v26  ;;  %1907 = vmatpush1.bf16.msra.mxu1 %v5354_v27  ;;  %v5431_v15 = vld [vmem:[#allocation5 + $0x264] ss:$16 sps:$4 sm:$0xff]   ;;  %v5434_v16 = vld [vmem:[#allocation5 + $0x26c] ss:$16 sps:$4 sm:$0xff]   ;;  %v5429_v17 = vld [vmem:[#allocation5 + $0x260] ss:$16 sps:$4 sm:$0xff]  }
  0x9a   :  { %1744 = vmatprep.subr.bf16.mxu0 %v5355_v28  ;;  %1908 = vmatprep.subr.bf16.mxu1 %v5357_v29  ;;  %v5432_v18 = vld [vmem:[#allocation5 + $0x268] ss:$16 sps:$4 sm:$0xff]   ;;  %v5437_v19 = vld [vmem:[#allocation5 + $0x284] ss:$16 sps:$4 sm:$0xff]   ;;  %v5440_v20 = vld [vmem:[#allocation5 + $0x28c] ss:$16 sps:$4 sm:$0xff]  }
  0x9b   :  { %v5435_v21 = vld [vmem:[#allocation5 + $0x280] ss:$16 sps:$4 sm:$0xff]   ;;  %v5438_v22 = vld [vmem:[#allocation5 + $0x288] ss:$16 sps:$4 sm:$0xff]   ;;  %v5443_v23 = vld [vmem:[#allocation5 + $0x2a4] ss:$16 sps:$4 sm:$0xff]  }
  0x9c   :  { %v5446_v24 = vld [vmem:[#allocation5 + $0x2ac] ss:$16 sps:$4 sm:$0xff]   ;;  %v5441_v25 = vld [vmem:[#allocation5 + $0x2a0] ss:$16 sps:$4 sm:$0xff]   ;;  %v5444_v26 = vld [vmem:[#allocation5 + $0x2a8] ss:$16 sps:$4 sm:$0xff]  }
  0x9d   :  { %1745 = vmatpush1.bf16.msra.mxu0 %v5359_v30  ;;  %1909 = vmatpush1.bf16.msra.mxu1 %v5360_v31  ;;  %v5449_v27 = vld [vmem:[#allocation5 + $0x2c4] ss:$16 sps:$4 sm:$0xff]   ;;  %v5452_v28 = vld [vmem:[#allocation5 + $0x2cc] ss:$16 sps:$4 sm:$0xff]   ;;  %v5447_v31 = vld [vmem:[#allocation5 + $0x2c0] ss:$16 sps:$4 sm:$0xff]  }
  0x9e   :  { %1746 = vmatprep.subr.bf16.mxu0 %v5361_v32  ;;  %1910 = vmatprep.subr.bf16.mxu1 %v5363_v33  ;;  %v6496_v29 = vld [vmem:[#allocation2 + $0x8] sm:$0xff]  ;;  %v5455_v33 = vld [vmem:[#allocation5 + $0x2e4] ss:$16 sps:$4 sm:$0xff]  }
  0x9f   :  { %v4588_v30 = vcombine.high %v6496_v29, %v6496_v29  ;;  %v5450_v32 = vld [vmem:[#allocation5 + $0x2c8] ss:$16 sps:$4 sm:$0xff]   ;;  %v5476_v46 = vld [vmem:[#allocation5 + $0x34c] ss:$16 sps:$4 sm:$0xff]  }
  0xa0   :  { %v5474_v48 = vld [vmem:[#allocation5 + $0x348] ss:$16 sps:$4 sm:$0xff]  }
  0xa1   :  { %1747 = vmatpush1.bf16.msra.mxu0 %v5365_v34  ;;  %1911 = vmatpush1.bf16.msra.mxu1 %v5366_v35  ;;  %v5458_v34 = vld [vmem:[#allocation5 + $0x2ec] ss:$16 sps:$4 sm:$0xff]   ;;  %v5453_v35 = vld [vmem:[#allocation5 + $0x2e0] ss:$16 sps:$4 sm:$0xff]  }
  0xa2   :  { %1748 = vmatprep.subr.bf16.mxu0 %v5367_v36  ;;  %1912 = vmatprep.subr.bf16.mxu1 %v5369_v37  ;;  %v5456_v36 = vld [vmem:[#allocation5 + $0x2e8] ss:$16 sps:$4 sm:$0xff]   ;;  %v5461_v37 = vld [vmem:[#allocation5 + $0x304] ss:$16 sps:$4 sm:$0xff]  }
  0xa5   :  { %1749 = vmatpush1.bf16.msra.mxu0 %v5371_v38  ;;  %1913 = vmatpush1.bf16.msra.mxu1 %v5372_v39  ;;  %v5464_v38 = vld [vmem:[#allocation5 + $0x30c] ss:$16 sps:$4 sm:$0xff]   ;;  %v5459_v39 = vld [vmem:[#allocation5 + $0x300] ss:$16 sps:$4 sm:$0xff]  }
  0xa6   :  { %1750 = vmatprep.subr.bf16.mxu0 %v5373_v40  ;;  %1914 = vmatprep.subr.bf16.mxu1 %v5375_v41  ;;  %v5462_v40 = vld [vmem:[#allocation5 + $0x308] ss:$16 sps:$4 sm:$0xff]   ;;  %v5467_v41 = vld [vmem:[#allocation5 + $0x324] ss:$16 sps:$4 sm:$0xff]  }
  0xa9   :  { %1751 = vmatpush1.bf16.msra.mxu0 %v5377_v42  ;;  %1915 = vmatpush1.bf16.msra.mxu1 %v5378_v43  ;;  %v5470_v42 = vld [vmem:[#allocation5 + $0x32c] ss:$16 sps:$4 sm:$0xff]   ;;  %v5465_v43 = vld [vmem:[#allocation5 + $0x320] ss:$16 sps:$4 sm:$0xff]  }
  0xaa   :  { %1752 = vmatprep.subr.bf16.mxu0 %v5379_v44  ;;  %1916 = vmatprep.subr.bf16.mxu1 %v5381_v45  ;;  %v5468_v44 = vld [vmem:[#allocation5 + $0x328] ss:$16 sps:$4 sm:$0xff]   ;;  %v5473_v45 = vld [vmem:[#allocation5 + $0x344] ss:$16 sps:$4 sm:$0xff]  }
  0xad   :  { %1753 = vmatpush1.bf16.msra.mxu0 %v5383_v47  ;;  %1917 = vmatpush1.bf16.msra.mxu1 %v5384_v49  ;;  %v5471_v47 = vld [vmem:[#allocation5 + $0x340] ss:$16 sps:$4 sm:$0xff]   ;;  %v5479_v49 = vld [vmem:[#allocation5 + $0x364] ss:$16 sps:$4 sm:$0xff]  }
  0xae   :  { %1754 = vmatprep.subr.bf16.mxu0 %v5385_v50  ;;  %1918 = vmatprep.subr.bf16.mxu1 %v5387_v51  ;;  %v5482_v50 = vld [vmem:[#allocation5 + $0x36c] ss:$16 sps:$4 sm:$0xff]   ;;  %v5477_v51 = vld [vmem:[#allocation5 + $0x360] ss:$16 sps:$4 sm:$0xff]  }
  0xb1   :  { %1755 = vmatpush1.bf16.msra.mxu0 %v5389_v52  ;;  %1919 = vmatpush1.bf16.msra.mxu1 %v5390_v53  ;;  %v5480_v52 = vld [vmem:[#allocation5 + $0x368] ss:$16 sps:$4 sm:$0xff]   ;;  %v5485_v53 = vld [vmem:[#allocation5 + $0x384] ss:$16 sps:$4 sm:$0xff]  }
  0xb2   :  { %1756 = vmatprep.subr.bf16.mxu0 %v5391_v54  ;;  %1920 = vmatprep.subr.bf16.mxu1 %v5393_v55  ;;  %v5488_v54 = vld [vmem:[#allocation5 + $0x38c] ss:$16 sps:$4 sm:$0xff]   ;;  %v5483_v55 = vld [vmem:[#allocation5 + $0x380] ss:$16 sps:$4 sm:$0xff]  }
  0xb5   :  { %1757 = vmatpush1.bf16.msra.mxu0 %v5395_v56  ;;  %1921 = vmatpush1.bf16.msra.mxu1 %v5396_v57  ;;  %v5486_v56 = vld [vmem:[#allocation5 + $0x388] ss:$16 sps:$4 sm:$0xff]   ;;  %v5491_v57 = vld [vmem:[#allocation5 + $0x3a4] ss:$16 sps:$4 sm:$0xff]  }
  0xb6   :  { %1758 = vmatprep.subr.bf16.mxu0 %v5397_v58  ;;  %1922 = vmatprep.subr.bf16.mxu1 %v5399_v59  ;;  %v5494_v58 = vld [vmem:[#allocation5 + $0x3ac] ss:$16 sps:$4 sm:$0xff]   ;;  %v5489_v59 = vld [vmem:[#allocation5 + $0x3a0] ss:$16 sps:$4 sm:$0xff]  }
  0xb9   :  { %1759 = vmatpush1.bf16.msra.mxu0 %v5401_v60  ;;  %1923 = vmatpush1.bf16.msra.mxu1 %v5402_v61  ;;  %v5492_v60 = vld [vmem:[#allocation5 + $0x3a8] ss:$16 sps:$4 sm:$0xff]   ;;  %v5497_v61 = vld [vmem:[#allocation5 + $0x3c4] ss:$16 sps:$4 sm:$0xff]  }
  0xba   :  { %1760 = vmatprep.subr.bf16.mxu0 %v5403_v62  ;;  %1924 = vmatprep.subr.bf16.mxu1 %v5405_v63  ;;  %v5500_v62 = vld [vmem:[#allocation5 + $0x3cc] ss:$16 sps:$4 sm:$0xff]   ;;  %v5495_v63 = vld [vmem:[#allocation5 + $0x3c0] ss:$16 sps:$4 sm:$0xff]  }
  0xbd   :  { %1761 = vmatpush1.bf16.msra.mxu0 %v5407_v0  ;;  %1925 = vmatpush1.bf16.msra.mxu1 %v5408_v1  ;;  %v5498_v0 = vld [vmem:[#allocation5 + $0x3c8] ss:$16 sps:$4 sm:$0xff]   ;;  %v5503_v1 = vld [vmem:[#allocation5 + $0x3e4] ss:$16 sps:$4 sm:$0xff]  }
  0xbe   :  { %1771 = vmatprep.subr.bf16.mxu0 %v5413_v2  ;;  %1935 = vmatprep.subr.bf16.mxu1 %v5416_v3  ;;  %v5506_v2 = vld [vmem:[#allocation5 + $0x3ec] ss:$16 sps:$4 sm:$0xff]   ;;  %v5501_v3 = vld [vmem:[#allocation5 + $0x3e0] ss:$16 sps:$4 sm:$0xff]  }
  0xc0   :  { %1763 = vmatmul.mubr.bf16.vlgmr.msra.gmra.mrb[0].mxu0 %v4585_v4  ;;  %1927 = vmatmul.mubr.bf16.vlgmr.msra.gmra.mrb[0].mxu1 %v4585_v4  ;;  %v5504_v4 = vld [vmem:[#allocation5 + $0x3e8] ss:$16 sps:$4 sm:$0xff]  }
  0xc1   :  { %1772 = vmatpush1.bf16.msra.mxu0 %v5411_v5  ;;  %1936 = vmatpush1.bf16.msra.mxu1 %v5414_v6  ;;  %v5511_v5 = vld [vmem:[#allocation5 + $0x404] ss:$16 sps:$4 sm:$0xff]   ;;  %v5514_v6 = vld [vmem:[#allocation5 + $0x40c] ss:$16 sps:$4 sm:$0xff]  }
  0xc2   :  { %1773 = vmatprep.subr.bf16.mxu0 %v5419_v7  ;;  %1937 = vmatprep.subr.bf16.mxu1 %v5422_v8  ;;  %v4587_v7 = vcombine.low %v6496_v29, %v6496_v29  ;;  %v5509_v8 = vld [vmem:[#allocation5 + $0x400] ss:$16 sps:$4 sm:$0xff]   ;;  %v5544_v29 = vld [vmem:[#allocation5 + $0x4ac] ss:$16 sps:$4 sm:$0xff]  }
  0xc3   :  { %1803 = vmatprep.mubr.bf16.mxu0 %v4588_v30  ;;  %1967 = vmatprep.mubr.bf16.mxu1 %v4588_v30  ;;  %v5539_v30 = vld [vmem:[#allocation5 + $0x4a0] ss:$16 sps:$4 sm:$0xff]  }
  0xc5   :  { %1774 = vmatpush1.bf16.msra.mxu0 %v5417_v9  ;;  %1938 = vmatpush1.bf16.msra.mxu1 %v5420_v10  ;;  %v5512_v9 = vld [vmem:[#allocation5 + $0x408] ss:$16 sps:$4 sm:$0xff]   ;;  %v5517_v10 = vld [vmem:[#allocation5 + $0x424] ss:$16 sps:$4 sm:$0xff]  }
  0xc6   :  { %1775 = vmatprep.subr.bf16.mxu0 %v5425_v11  ;;  %1939 = vmatprep.subr.bf16.mxu1 %v5428_v12  ;;  %v6502_v11 = vld [vmem:[#allocation2 + $0x10] sm:$0xff]  ;;  %v5520_v12 = vld [vmem:[#allocation5 + $0x42c] ss:$16 sps:$4 sm:$0xff]  }
  0xc9   :  { %1776 = vmatpush1.bf16.msra.mxu0 %v5423_v13  ;;  %1940 = vmatpush1.bf16.msra.mxu1 %v5426_v14  ;;  %v4590_v13 = vcombine.high %v6502_v11, %v6502_v11  ;;  %v5515_v14 = vld [vmem:[#allocation5 + $0x420] ss:$16 sps:$4 sm:$0xff]  }
  0xca   :  { %1777 = vmatprep.subr.bf16.mxu0 %v5431_v15  ;;  %1941 = vmatprep.subr.bf16.mxu1 %v5434_v16  ;;  %v5518_v15 = vld [vmem:[#allocation5 + $0x428] ss:$16 sps:$4 sm:$0xff]   ;;  %v5523_v16 = vld [vmem:[#allocation5 + $0x444] ss:$16 sps:$4 sm:$0xff]  }
  0xcd   :  { %1778 = vmatpush1.bf16.msra.mxu0 %v5429_v17  ;;  %1942 = vmatpush1.bf16.msra.mxu1 %v5432_v18  ;;  %v5526_v17 = vld [vmem:[#allocation5 + $0x44c] ss:$16 sps:$4 sm:$0xff]   ;;  %v5521_v18 = vld [vmem:[#allocation5 + $0x440] ss:$16 sps:$4 sm:$0xff]  }
  0xce   :  { %1779 = vmatprep.subr.bf16.mxu0 %v5437_v19  ;;  %1943 = vmatprep.subr.bf16.mxu1 %v5440_v20  ;;  %v5524_v19 = vld [vmem:[#allocation5 + $0x448] ss:$16 sps:$4 sm:$0xff]   ;;  %v5529_v20 = vld [vmem:[#allocation5 + $0x464] ss:$16 sps:$4 sm:$0xff]  }
  0xd1   :  { %1780 = vmatpush1.bf16.msra.mxu0 %v5435_v21  ;;  %1944 = vmatpush1.bf16.msra.mxu1 %v5438_v22  ;;  %v5532_v21 = vld [vmem:[#allocation5 + $0x46c] ss:$16 sps:$4 sm:$0xff]   ;;  %v5527_v22 = vld [vmem:[#allocation5 + $0x460] ss:$16 sps:$4 sm:$0xff]  }
  0xd2   :  { %1781 = vmatprep.subr.bf16.mxu0 %v5443_v23  ;;  %1945 = vmatprep.subr.bf16.mxu1 %v5446_v24  ;;  %v5530_v23 = vld [vmem:[#allocation5 + $0x468] ss:$16 sps:$4 sm:$0xff]   ;;  %v5535_v24 = vld [vmem:[#allocation5 + $0x484] ss:$16 sps:$4 sm:$0xff]  }
  0xd5   :  { %1782 = vmatpush1.bf16.msra.mxu0 %v5441_v25  ;;  %1946 = vmatpush1.bf16.msra.mxu1 %v5444_v26  ;;  %v5538_v25 = vld [vmem:[#allocation5 + $0x48c] ss:$16 sps:$4 sm:$0xff]   ;;  %v5533_v26 = vld [vmem:[#allocation5 + $0x480] ss:$16 sps:$4 sm:$0xff]  }
  0xd6   :  { %1783 = vmatprep.subr.bf16.mxu0 %v5449_v27  ;;  %1947 = vmatprep.subr.bf16.mxu1 %v5452_v28  ;;  %v5536_v27 = vld [vmem:[#allocation5 + $0x488] ss:$16 sps:$4 sm:$0xff]   ;;  %v5541_v28 = vld [vmem:[#allocation5 + $0x4a4] ss:$16 sps:$4 sm:$0xff]  }
  0xd9   :  { %1784 = vmatpush1.bf16.msra.mxu0 %v5447_v31  ;;  %1948 = vmatpush1.bf16.msra.mxu1 %v5450_v32  ;;  %v5542_v31 = vld [vmem:[#allocation5 + $0x4a8] ss:$16 sps:$4 sm:$0xff]   ;;  %v5547_v32 = vld [vmem:[#allocation5 + $0x4c4] ss:$16 sps:$4 sm:$0xff]  }
  0xda   :  { %1785 = vmatprep.subr.bf16.mxu0 %v5455_v33  ;;  %1949 = vmatprep.subr.bf16.mxu1 %v5458_v34  ;;  %v5550_v33 = vld [vmem:[#allocation5 + $0x4cc] ss:$16 sps:$4 sm:$0xff]   ;;  %v5545_v34 = vld [vmem:[#allocation5 + $0x4c0] ss:$16 sps:$4 sm:$0xff]  }
  0xdd   :  { %1786 = vmatpush1.bf16.msra.mxu0 %v5453_v35  ;;  %1950 = vmatpush1.bf16.msra.mxu1 %v5456_v36  ;;  %v5548_v35 = vld [vmem:[#allocation5 + $0x4c8] ss:$16 sps:$4 sm:$0xff]   ;;  %v5553_v36 = vld [vmem:[#allocation5 + $0x4e4] ss:$16 sps:$4 sm:$0xff]  }
  0xde   :  { %1787 = vmatprep.subr.bf16.mxu0 %v5461_v37  ;;  %1951 = vmatprep.subr.bf16.mxu1 %v5464_v38  ;;  %v5556_v37 = vld [vmem:[#allocation5 + $0x4ec] ss:$16 sps:$4 sm:$0xff]   ;;  %v5551_v38 = vld [vmem:[#allocation5 + $0x4e0] ss:$16 sps:$4 sm:$0xff]  }
  0xe1   :  { %1788 = vmatpush1.bf16.msra.mxu0 %v5459_v39  ;;  %1952 = vmatpush1.bf16.msra.mxu1 %v5462_v40  ;;  %v5554_v39 = vld [vmem:[#allocation5 + $0x4e8] ss:$16 sps:$4 sm:$0xff]   ;;  %v5559_v40 = vld [vmem:[#allocation5 + $0x504] ss:$16 sps:$4 sm:$0xff]  }
  0xe2   :  { %1789 = vmatprep.subr.bf16.mxu0 %v5467_v41  ;;  %1953 = vmatprep.subr.bf16.mxu1 %v5470_v42  ;;  %v5562_v41 = vld [vmem:[#allocation5 + $0x50c] ss:$16 sps:$4 sm:$0xff]   ;;  %v5557_v42 = vld [vmem:[#allocation5 + $0x500] ss:$16 sps:$4 sm:$0xff]  }
  0xe5   :  { %1790 = vmatpush1.bf16.msra.mxu0 %v5465_v43  ;;  %1954 = vmatpush1.bf16.msra.mxu1 %v5468_v44  ;;  %v5560_v43 = vld [vmem:[#allocation5 + $0x508] ss:$16 sps:$4 sm:$0xff]   ;;  %v5565_v44 = vld [vmem:[#allocation5 + $0x524] ss:$16 sps:$4 sm:$0xff]  }
  0xe6   :  { %1791 = vmatprep.subr.bf16.mxu0 %v5473_v45  ;;  %1955 = vmatprep.subr.bf16.mxu1 %v5476_v46  ;;  %v5568_v45 = vld [vmem:[#allocation5 + $0x52c] ss:$16 sps:$4 sm:$0xff]   ;;  %v5563_v46 = vld [vmem:[#allocation5 + $0x520] ss:$16 sps:$4 sm:$0xff]  }
  0xe9   :  { %1792 = vmatpush1.bf16.msra.mxu0 %v5471_v47  ;;  %1956 = vmatpush1.bf16.msra.mxu1 %v5474_v48  ;;  %v5566_v47 = vld [vmem:[#allocation5 + $0x528] ss:$16 sps:$4 sm:$0xff]   ;;  %v5571_v48 = vld [vmem:[#allocation5 + $0x544] ss:$16 sps:$4 sm:$0xff]  }
  0xea   :  { %1793 = vmatprep.subr.bf16.mxu0 %v5479_v49  ;;  %1957 = vmatprep.subr.bf16.mxu1 %v5482_v50  ;;  %v5574_v49 = vld [vmem:[#allocation5 + $0x54c] ss:$16 sps:$4 sm:$0xff]   ;;  %v5569_v50 = vld [vmem:[#allocation5 + $0x540] ss:$16 sps:$4 sm:$0xff]  }
  0xed   :  { %1794 = vmatpush1.bf16.msra.mxu0 %v5477_v51  ;;  %1958 = vmatpush1.bf16.msra.mxu1 %v5480_v52  ;;  %v5572_v51 = vld [vmem:[#allocation5 + $0x548] ss:$16 sps:$4 sm:$0xff]   ;;  %v5577_v52 = vld [vmem:[#allocation5 + $0x564] ss:$16 sps:$4 sm:$0xff]  }
  0xee   :  { %1795 = vmatprep.subr.bf16.mxu0 %v5485_v53  ;;  %1959 = vmatprep.subr.bf16.mxu1 %v5488_v54  ;;  %v5580_v53 = vld [vmem:[#allocation5 + $0x56c] ss:$16 sps:$4 sm:$0xff]   ;;  %v5575_v54 = vld [vmem:[#allocation5 + $0x560] ss:$16 sps:$4 sm:$0xff]  }
  0xf1   :  { %1796 = vmatpush1.bf16.msra.mxu0 %v5483_v55  ;;  %1960 = vmatpush1.bf16.msra.mxu1 %v5486_v56  ;;  %v5578_v55 = vld [vmem:[#allocation5 + $0x568] ss:$16 sps:$4 sm:$0xff]   ;;  %v5583_v56 = vld [vmem:[#allocation5 + $0x584] ss:$16 sps:$4 sm:$0xff]  }
  0xf2   :  { %1797 = vmatprep.subr.bf16.mxu0 %v5491_v57  ;;  %1961 = vmatprep.subr.bf16.mxu1 %v5494_v58  ;;  %v5586_v57 = vld [vmem:[#allocation5 + $0x58c] ss:$16 sps:$4 sm:$0xff]   ;;  %v5581_v58 = vld [vmem:[#allocation5 + $0x580] ss:$16 sps:$4 sm:$0xff]  }
  0xf5   :  { %1798 = vmatpush1.bf16.msra.mxu0 %v5489_v59  ;;  %1962 = vmatpush1.bf16.msra.mxu1 %v5492_v60  ;;  %v5584_v59 = vld [vmem:[#allocation5 + $0x588] ss:$16 sps:$4 sm:$0xff]   ;;  %v5589_v60 = vld [vmem:[#allocation5 + $0x5a4] ss:$16 sps:$4 sm:$0xff]  }
  0xf6   :  { %1799 = vmatprep.subr.bf16.mxu0 %v5497_v61  ;;  %1963 = vmatprep.subr.bf16.mxu1 %v5500_v62  ;;  %v5592_v61 = vld [vmem:[#allocation5 + $0x5ac] ss:$16 sps:$4 sm:$0xff]   ;;  %v5587_v62 = vld [vmem:[#allocation5 + $0x5a0] ss:$16 sps:$4 sm:$0xff]  }
  0xf9   :  { %1800 = vmatpush1.bf16.msra.mxu0 %v5495_v63  ;;  %1964 = vmatpush1.bf16.msra.mxu1 %v5498_v0  ;;  %v5590_v63 = vld [vmem:[#allocation5 + $0x5a8] ss:$16 sps:$4 sm:$0xff]   ;;  %v5595_v0 = vld [vmem:[#allocation5 + $0x5c4] ss:$16 sps:$4 sm:$0xff]  }
  0xfa   :  { %1801 = vmatprep.subr.bf16.mxu0 %v5503_v1  ;;  %1965 = vmatprep.subr.bf16.mxu1 %v5506_v2  ;;  %v5598_v1 = vld [vmem:[#allocation5 + $0x5cc] ss:$16 sps:$4 sm:$0xff]   ;;  %v5593_v2 = vld [vmem:[#allocation5 + $0x5c0] ss:$16 sps:$4 sm:$0xff]  }
  0xfd   :  { %1802 = vmatpush1.bf16.msra.mxu0 %v5501_v3  ;;  %1966 = vmatpush1.bf16.msra.mxu1 %v5504_v4  ;;  %v5596_v3 = vld [vmem:[#allocation5 + $0x5c8] ss:$16 sps:$4 sm:$0xff]   ;;  %v5601_v4 = vld [vmem:[#allocation5 + $0x5e4] ss:$16 sps:$4 sm:$0xff]  }
  0xfe   :  { %1812 = vmatprep.subr.bf16.mxu0 %v5511_v5  ;;  %1976 = vmatprep.subr.bf16.mxu1 %v5514_v6  ;;  %v5604_v5 = vld [vmem:[#allocation5 + $0x5ec] ss:$16 sps:$4 sm:$0xff]   ;;  %v5599_v6 = vld [vmem:[#allocation5 + $0x5e0] ss:$16 sps:$4 sm:$0xff]  }
 0x100   :  { %1804 = vmatmul.mubr.bf16.vlgmr.msra.gmra.mrb[0].mxu0 %v4587_v7  ;;  %1968 = vmatmul.mubr.bf16.vlgmr.msra.gmra.mrb[0].mxu1 %v4587_v7  ;;  %v5602_v7 = vld [vmem:[#allocation5 + $0x5e8] ss:$16 sps:$4 sm:$0xff]  }
 0x101   :  { %1813 = vmatpush1.bf16.msra.mxu0 %v5509_v8  ;;  %1977 = vmatpush1.bf16.msra.mxu1 %v5512_v9  ;;  %v5609_v8 = vld [vmem:[#allocation5 + $0x604] ss:$16 sps:$4 sm:$0xff]   ;;  %v5612_v9 = vld [vmem:[#allocation5 + $0x60c] ss:$16 sps:$4 sm:$0xff]  }
 0x102   :  { %1814 = vmatprep.subr.bf16.mxu0 %v5517_v10  ;;  %1978 = vmatprep.subr.bf16.mxu1 %v5520_v12  ;;  %v5607_v10 = vld [vmem:[#allocation5 + $0x600] ss:$16 sps:$4 sm:$0xff]   ;;  %v4589_v12 = vcombine.low %v6502_v11, %v6502_v11  ;;  %v5624_v11 = vld [vmem:[#allocation5 + $0x64c] ss:$16 sps:$4 sm:$0xff]  }
 0x103   :  { %1844 = vmatprep.mubr.bf16.mxu0 %v4590_v13  ;;  %2008 = vmatprep.mubr.bf16.mxu1 %v4590_v13  ;;  %v5610_v13 = vld [vmem:[#allocation5 + $0x608] ss:$16 sps:$4 sm:$0xff]  }
 0x105   :  { %1815 = vmatpush1.bf16.msra.mxu0 %v5515_v14  ;;  %1979 = vmatpush1.bf16.msra.mxu1 %v5518_v15  ;;  %v6508_v14 = vld [vmem:[#allocation2 + $0x18] sm:$0xff]  ;;  %v5615_v15 = vld [vmem:[#allocation5 + $0x624] ss:$16 sps:$4 sm:$0xff]  }
 0x106   :  { %1816 = vmatprep.subr.bf16.mxu0 %v5523_v16  ;;  %1980 = vmatprep.subr.bf16.mxu1 %v5526_v17  ;;  %v5618_v16 = vld [vmem:[#allocation5 + $0x62c] ss:$16 sps:$4 sm:$0xff]   ;;  %v4592_v17 = vcombine.high %v6508_v14, %v6508_v14 }
 0x109   :  { %1817 = vmatpush1.bf16.msra.mxu0 %v5521_v18  ;;  %1981 = vmatpush1.bf16.msra.mxu1 %v5524_v19  ;;  %v5613_v18 = vld [vmem:[#allocation5 + $0x620] ss:$16 sps:$4 sm:$0xff]   ;;  %v5616_v19 = vld [vmem:[#allocation5 + $0x628] ss:$16 sps:$4 sm:$0xff]  }
 0x10a   :  { %1818 = vmatprep.subr.bf16.mxu0 %v5529_v20  ;;  %1982 = vmatprep.subr.bf16.mxu1 %v5532_v21  ;;  %v5621_v20 = vld [vmem:[#allocation5 + $0x644] ss:$16 sps:$4 sm:$0xff]   ;;  %v5619_v21 = vld [vmem:[#allocation5 + $0x640] ss:$16 sps:$4 sm:$0xff]  }
 0x10d   :  { %1819 = vmatpush1.bf16.msra.mxu0 %v5527_v22  ;;  %1983 = vmatpush1.bf16.msra.mxu1 %v5530_v23  ;;  %v5622_v22 = vld [vmem:[#allocation5 + $0x648] ss:$16 sps:$4 sm:$0xff]   ;;  %v5627_v23 = vld [vmem:[#allocation5 + $0x664] ss:$16 sps:$4 sm:$0xff]  }
 0x10e   :  { %1820 = vmatprep.subr.bf16.mxu0 %v5535_v24  ;;  %1984 = vmatprep.subr.bf16.mxu1 %v5538_v25  ;;  %v5630_v24 = vld [vmem:[#allocation5 + $0x66c] ss:$16 sps:$4 sm:$0xff]   ;;  %v5625_v25 = vld [vmem:[#allocation5 + $0x660] ss:$16 sps:$4 sm:$0xff]  }
 0x111   :  { %1821 = vmatpush1.bf16.msra.mxu0 %v5533_v26  ;;  %1985 = vmatpush1.bf16.msra.mxu1 %v5536_v27  ;;  %v5628_v26 = vld [vmem:[#allocation5 + $0x668] ss:$16 sps:$4 sm:$0xff]   ;;  %v5633_v27 = vld [vmem:[#allocation5 + $0x684] ss:$16 sps:$4 sm:$0xff]  }
 0x112   :  { %1822 = vmatprep.subr.bf16.mxu0 %v5541_v28  ;;  %1986 = vmatprep.subr.bf16.mxu1 %v5544_v29  ;;  %v5636_v28 = vld [vmem:[#allocation5 + $0x68c] ss:$16 sps:$4 sm:$0xff]   ;;  %v5631_v29 = vld [vmem:[#allocation5 + $0x680] ss:$16 sps:$4 sm:$0xff]  }
 0x115   :  { %1823 = vmatpush1.bf16.msra.mxu0 %v5539_v30  ;;  %1987 = vmatpush1.bf16.msra.mxu1 %v5542_v31  ;;  %v5634_v30 = vld [vmem:[#allocation5 + $0x688] ss:$16 sps:$4 sm:$0xff]   ;;  %v5639_v31 = vld [vmem:[#allocation5 + $0x6a4] ss:$16 sps:$4 sm:$0xff]  }
 0x116   :  { %1824 = vmatprep.subr.bf16.mxu0 %v5547_v32  ;;  %1988 = vmatprep.subr.bf16.mxu1 %v5550_v33  ;;  %v5642_v32 = vld [vmem:[#allocation5 + $0x6ac] ss:$16 sps:$4 sm:$0xff]   ;;  %v5637_v33 = vld [vmem:[#allocation5 + $0x6a0] ss:$16 sps:$4 sm:$0xff]  }
 0x119   :  { %1825 = vmatpush1.bf16.msra.mxu0 %v5545_v34  ;;  %1989 = vmatpush1.bf16.msra.mxu1 %v5548_v35  ;;  %v5640_v34 = vld [vmem:[#allocation5 + $0x6a8] ss:$16 sps:$4 sm:$0xff]   ;;  %v5645_v35 = vld [vmem:[#allocation5 + $0x6c4] ss:$16 sps:$4 sm:$0xff]  }
 0x11a   :  { %1826 = vmatprep.subr.bf16.mxu0 %v5553_v36  ;;  %1990 = vmatprep.subr.bf16.mxu1 %v5556_v37  ;;  %v5648_v36 = vld [vmem:[#allocation5 + $0x6cc] ss:$16 sps:$4 sm:$0xff]   ;;  %v5643_v37 = vld [vmem:[#allocation5 + $0x6c0] ss:$16 sps:$4 sm:$0xff]  }
 0x11d   :  { %1827 = vmatpush1.bf16.msra.mxu0 %v5551_v38  ;;  %1991 = vmatpush1.bf16.msra.mxu1 %v5554_v39  ;;  %v5646_v38 = vld [vmem:[#allocation5 + $0x6c8] ss:$16 sps:$4 sm:$0xff]   ;;  %v5651_v39 = vld [vmem:[#allocation5 + $0x6e4] ss:$16 sps:$4 sm:$0xff]  }
 0x11e   :  { %1828 = vmatprep.subr.bf16.mxu0 %v5559_v40  ;;  %1992 = vmatprep.subr.bf16.mxu1 %v5562_v41  ;;  %v5654_v40 = vld [vmem:[#allocation5 + $0x6ec] ss:$16 sps:$4 sm:$0xff]   ;;  %v5649_v41 = vld [vmem:[#allocation5 + $0x6e0] ss:$16 sps:$4 sm:$0xff]  }
 0x121   :  { %1829 = vmatpush1.bf16.msra.mxu0 %v5557_v42  ;;  %1993 = vmatpush1.bf16.msra.mxu1 %v5560_v43  ;;  %v5652_v42 = vld [vmem:[#allocation5 + $0x6e8] ss:$16 sps:$4 sm:$0xff]   ;;  %v5657_v43 = vld [vmem:[#allocation5 + $0x704] ss:$16 sps:$4 sm:$0xff]  }
 0x122   :  { %1830 = vmatprep.subr.bf16.mxu0 %v5565_v44  ;;  %1994 = vmatprep.subr.bf16.mxu1 %v5568_v45  ;;  %v5660_v44 = vld [vmem:[#allocation5 + $0x70c] ss:$16 sps:$4 sm:$0xff]   ;;  %v5655_v45 = vld [vmem:[#allocation5 + $0x700] ss:$16 sps:$4 sm:$0xff]  }
 0x125   :  { %1831 = vmatpush1.bf16.msra.mxu0 %v5563_v46  ;;  %1995 = vmatpush1.bf16.msra.mxu1 %v5566_v47  ;;  %v5658_v46 = vld [vmem:[#allocation5 + $0x708] ss:$16 sps:$4 sm:$0xff]   ;;  %v5663_v47 = vld [vmem:[#allocation5 + $0x724] ss:$16 sps:$4 sm:$0xff]  }
 0x126   :  { %1832 = vmatprep.subr.bf16.mxu0 %v5571_v48  ;;  %1996 = vmatprep.subr.bf16.mxu1 %v5574_v49  ;;  %v5666_v48 = vld [vmem:[#allocation5 + $0x72c] ss:$16 sps:$4 sm:$0xff]   ;;  %v5661_v49 = vld [vmem:[#allocation5 + $0x720] ss:$16 sps:$4 sm:$0xff]  }
 0x129   :  { %1833 = vmatpush1.bf16.msra.mxu0 %v5569_v50  ;;  %1997 = vmatpush1.bf16.msra.mxu1 %v5572_v51  ;;  %v5664_v50 = vld [vmem:[#allocation5 + $0x728] ss:$16 sps:$4 sm:$0xff]   ;;  %v5669_v51 = vld [vmem:[#allocation5 + $0x744] ss:$16 sps:$4 sm:$0xff]  }
 0x12a   :  { %1834 = vmatprep.subr.bf16.mxu0 %v5577_v52  ;;  %1998 = vmatprep.subr.bf16.mxu1 %v5580_v53  ;;  %v5672_v52 = vld [vmem:[#allocation5 + $0x74c] ss:$16 sps:$4 sm:$0xff]   ;;  %v5667_v53 = vld [vmem:[#allocation5 + $0x740] ss:$16 sps:$4 sm:$0xff]  }
 0x12d   :  { %1835 = vmatpush1.bf16.msra.mxu0 %v5575_v54  ;;  %1999 = vmatpush1.bf16.msra.mxu1 %v5578_v55  ;;  %v5670_v54 = vld [vmem:[#allocation5 + $0x748] ss:$16 sps:$4 sm:$0xff]   ;;  %v5675_v55 = vld [vmem:[#allocation5 + $0x764] ss:$16 sps:$4 sm:$0xff]  }
 0x12e   :  { %1836 = vmatprep.subr.bf16.mxu0 %v5583_v56  ;;  %2000 = vmatprep.subr.bf16.mxu1 %v5586_v57  ;;  %v5678_v56 = vld [vmem:[#allocation5 + $0x76c] ss:$16 sps:$4 sm:$0xff]   ;;  %v5673_v57 = vld [vmem:[#allocation5 + $0x760] ss:$16 sps:$4 sm:$0xff]  }
 0x131   :  { %1837 = vmatpush1.bf16.msra.mxu0 %v5581_v58  ;;  %2001 = vmatpush1.bf16.msra.mxu1 %v5584_v59  ;;  %v5676_v58 = vld [vmem:[#allocation5 + $0x768] ss:$16 sps:$4 sm:$0xff]   ;;  %v5681_v59 = vld [vmem:[#allocation5 + $0x784] ss:$16 sps:$4 sm:$0xff]  }
 0x132   :  { %1838 = vmatprep.subr.bf16.mxu0 %v5589_v60  ;;  %2002 = vmatprep.subr.bf16.mxu1 %v5592_v61  ;;  %v5684_v60 = vld [vmem:[#allocation5 + $0x78c] ss:$16 sps:$4 sm:$0xff]   ;;  %v5679_v61 = vld [vmem:[#allocation5 + $0x780] ss:$16 sps:$4 sm:$0xff]  }
 0x135   :  { %1839 = vmatpush1.bf16.msra.mxu0 %v5587_v62  ;;  %2003 = vmatpush1.bf16.msra.mxu1 %v5590_v63  ;;  %v5682_v62 = vld [vmem:[#allocation5 + $0x788] ss:$16 sps:$4 sm:$0xff]   ;;  %v5687_v63 = vld [vmem:[#allocation5 + $0x7a4] ss:$16 sps:$4 sm:$0xff]  }
 0x136   :  { %1840 = vmatprep.subr.bf16.mxu0 %v5595_v0  ;;  %2004 = vmatprep.subr.bf16.mxu1 %v5598_v1  ;;  %v5690_v0 = vld [vmem:[#allocation5 + $0x7ac] ss:$16 sps:$4 sm:$0xff]   ;;  %v5685_v1 = vld [vmem:[#allocation5 + $0x7a0] ss:$16 sps:$4 sm:$0xff]  }
 0x139   :  { %1841 = vmatpush1.bf16.msra.mxu0 %v5593_v2  ;;  %2005 = vmatpush1.bf16.msra.mxu1 %v5596_v3  ;;  %v5688_v2 = vld [vmem:[#allocation5 + $0x7a8] ss:$16 sps:$4 sm:$0xff]   ;;  %v5693_v3 = vld [vmem:[#allocation5 + $0x7c4] ss:$16 sps:$4 sm:$0xff]  }
 0x13a   :  { %1842 = vmatprep.subr.bf16.mxu0 %v5601_v4  ;;  %2006 = vmatprep.subr.bf16.mxu1 %v5604_v5  ;;  %v5696_v4 = vld [vmem:[#allocation5 + $0x7cc] ss:$16 sps:$4 sm:$0xff]   ;;  %v5691_v5 = vld [vmem:[#allocation5 + $0x7c0] ss:$16 sps:$4 sm:$0xff]  }
 0x13d   :  { %1843 = vmatpush1.bf16.msra.mxu0 %v5599_v6  ;;  %2007 = vmatpush1.bf16.msra.mxu1 %v5602_v7  ;;  %v5694_v6 = vld [vmem:[#allocation5 + $0x7c8] ss:$16 sps:$4 sm:$0xff]   ;;  %v5699_v7 = vld [vmem:[#allocation5 + $0x7e4] ss:$16 sps:$4 sm:$0xff]  }
 0x13e   :  { %1853 = vmatprep.subr.bf16.mxu0 %v5609_v8  ;;  %2017 = vmatprep.subr.bf16.mxu1 %v5612_v9  ;;  %v5702_v8 = vld [vmem:[#allocation5 + $0x7ec] ss:$16 sps:$4 sm:$0xff]   ;;  %v5697_v9 = vld [vmem:[#allocation5 + $0x7e0] ss:$16 sps:$4 sm:$0xff]  }
 0x140   :  { %1845 = vmatmul.mubr.bf16.vlgmr.msra.gmra.mrb[0].mxu0 %v4589_v12  ;;  %2009 = vmatmul.mubr.bf16.vlgmr.msra.gmra.mrb[0].mxu1 %v4589_v12  ;;  %v5707_v12 = vld [vmem:[#allocation7 + $0x4] ss:$16 sps:$4 sm:$0xff]  }
 0x141   :  { %1854 = vmatpush1.bf16.msra.mxu0 %v5607_v10  ;;  %2018 = vmatpush1.bf16.msra.mxu1 %v5610_v13  ;;  %v5700_v10 = vld [vmem:[#allocation5 + $0x7e8] ss:$16 sps:$4 sm:$0xff]   ;;  %v5710_v13 = vld [vmem:[#allocation7 + $0xc] ss:$16 sps:$4 sm:$0xff]  }
 0x142   :  { %1855 = vmatprep.subr.bf16.mxu0 %v5615_v15  ;;  %2019 = vmatprep.subr.bf16.mxu1 %v5618_v16  ;;  %v5705_v15 = vld [vmem:[#allocation7] ss:$16 sps:$4 sm:$0xff]   ;;  %v5708_v16 = vld [vmem:[#allocation7 + $0x8] ss:$16 sps:$4 sm:$0xff]  }
 0x143   :  { %1885 = vmatprep.mubr.bf16.mxu0 %v4592_v17  ;;  %2049 = vmatprep.mubr.bf16.mxu1 %v4592_v17  ;;  %v4591_v17 = vcombine.low %v6508_v14, %v6508_v14  ;;  %v5728_v14 = vld [vmem:[#allocation7 + $0x6c] ss:$16 sps:$4 sm:$0xff]  }
 0x145   :  { %1856 = vmatpush1.bf16.msra.mxu0 %v5613_v18  ;;  %2020 = vmatpush1.bf16.msra.mxu1 %v5616_v19  ;;  %v5713_v18 = vld [vmem:[#allocation7 + $0x24] ss:$16 sps:$4 sm:$0xff]   ;;  %v5716_v19 = vld [vmem:[#allocation7 + $0x2c] ss:$16 sps:$4 sm:$0xff]  }
 0x146   :  { %1857 = vmatprep.subr.bf16.mxu0 %v5621_v20  ;;  %2021 = vmatprep.subr.bf16.mxu1 %v5624_v11  ;;  %v5711_v20 = vld [vmem:[#allocation7 + $0x20] ss:$16 sps:$4 sm:$0xff]   ;;  %v5714_v11 = vld [vmem:[#allocation7 + $0x28] ss:$16 sps:$4 sm:$0xff]  }
 0x149   :  { %1858 = vmatpush1.bf16.msra.mxu0 %v5619_v21  ;;  %2022 = vmatpush1.bf16.msra.mxu1 %v5622_v22  ;;  %v5719_v21 = vld [vmem:[#allocation7 + $0x44] ss:$16 sps:$4 sm:$0xff]   ;;  %v5722_v22 = vld [vmem:[#allocation7 + $0x4c] ss:$16 sps:$4 sm:$0xff]  }
 0x14a   :  { %1859 = vmatprep.subr.bf16.mxu0 %v5627_v23  ;;  %2023 = vmatprep.subr.bf16.mxu1 %v5630_v24  ;;  %v5717_v23 = vld [vmem:[#allocation7 + $0x40] ss:$16 sps:$4 sm:$0xff]   ;;  %v5720_v24 = vld [vmem:[#allocation7 + $0x48] ss:$16 sps:$4 sm:$0xff]  }
 0x14d   :  { %1860 = vmatpush1.bf16.msra.mxu0 %v5625_v25  ;;  %2024 = vmatpush1.bf16.msra.mxu1 %v5628_v26  ;;  %v5725_v25 = vld [vmem:[#allocation7 + $0x64] ss:$16 sps:$4 sm:$0xff]   ;;  %v5723_v26 = vld [vmem:[#allocation7 + $0x60] ss:$16 sps:$4 sm:$0xff]  }
 0x14e   :  { %1861 = vmatprep.subr.bf16.mxu0 %v5633_v27  ;;  %2025 = vmatprep.subr.bf16.mxu1 %v5636_v28  ;;  %v5726_v27 = vld [vmem:[#allocation7 + $0x68] ss:$16 sps:$4 sm:$0xff]   ;;  %v5731_v28 = vld [vmem:[#allocation7 + $0x84] ss:$16 sps:$4 sm:$0xff]  }
 0x151   :  { %1862 = vmatpush1.bf16.msra.mxu0 %v5631_v29  ;;  %2026 = vmatpush1.bf16.msra.mxu1 %v5634_v30  ;;  %v5734_v29 = vld [vmem:[#allocation7 + $0x8c] ss:$16 sps:$4 sm:$0xff]   ;;  %v5729_v30 = vld [vmem:[#allocation7 + $0x80] ss:$16 sps:$4 sm:$0xff]  }
 0x152   :  { %1863 = vmatprep.subr.bf16.mxu0 %v5639_v31  ;;  %2027 = vmatprep.subr.bf16.mxu1 %v5642_v32  ;;  %v5732_v31 = vld [vmem:[#allocation7 + $0x88] ss:$16 sps:$4 sm:$0xff]   ;;  %v5737_v32 = vld [vmem:[#allocation7 + $0xa4] ss:$16 sps:$4 sm:$0xff]  }
 0x155   :  { %1864 = vmatpush1.bf16.msra.mxu0 %v5637_v33  ;;  %2028 = vmatpush1.bf16.msra.mxu1 %v5640_v34  ;;  %v5740_v33 = vld [vmem:[#allocation7 + $0xac] ss:$16 sps:$4 sm:$0xff]   ;;  %v5735_v34 = vld [vmem:[#allocation7 + $0xa0] ss:$16 sps:$4 sm:$0xff]  }
 0x156   :  { %1865 = vmatprep.subr.bf16.mxu0 %v5645_v35  ;;  %2029 = vmatprep.subr.bf16.mxu1 %v5648_v36  ;;  %v5738_v35 = vld [vmem:[#allocation7 + $0xa8] ss:$16 sps:$4 sm:$0xff]   ;;  %v5743_v36 = vld [vmem:[#allocation7 + $0xc4] ss:$16 sps:$4 sm:$0xff]  }
 0x159   :  { %1866 = vmatpush1.bf16.msra.mxu0 %v5643_v37  ;;  %2030 = vmatpush1.bf16.msra.mxu1 %v5646_v38  ;;  %v5746_v37 = vld [vmem:[#allocation7 + $0xcc] ss:$16 sps:$4 sm:$0xff]   ;;  %v5741_v38 = vld [vmem:[#allocation7 + $0xc0] ss:$16 sps:$4 sm:$0xff]  }
 0x15a   :  { %1867 = vmatprep.subr.bf16.mxu0 %v5651_v39  ;;  %2031 = vmatprep.subr.bf16.mxu1 %v5654_v40  ;;  %v5744_v39 = vld [vmem:[#allocation7 + $0xc8] ss:$16 sps:$4 sm:$0xff]   ;;  %v5749_v40 = vld [vmem:[#allocation7 + $0xe4] ss:$16 sps:$4 sm:$0xff]  }
 0x15d   :  { %1868 = vmatpush1.bf16.msra.mxu0 %v5649_v41  ;;  %2032 = vmatpush1.bf16.msra.mxu1 %v5652_v42  ;;  %v5752_v41 = vld [vmem:[#allocation7 + $0xec] ss:$16 sps:$4 sm:$0xff]   ;;  %v5747_v42 = vld [vmem:[#allocation7 + $0xe0] ss:$16 sps:$4 sm:$0xff]  }
 0x15e   :  { %1869 = vmatprep.subr.bf16.mxu0 %v5657_v43  ;;  %2033 = vmatprep.subr.bf16.mxu1 %v5660_v44  ;;  %v5750_v43 = vld [vmem:[#allocation7 + $0xe8] ss:$16 sps:$4 sm:$0xff]   ;;  %v5755_v44 = vld [vmem:[#allocation7 + $0x104] ss:$16 sps:$4 sm:$0xff]  }
 0x161   :  { %1870 = vmatpush1.bf16.msra.mxu0 %v5655_v45  ;;  %2034 = vmatpush1.bf16.msra.mxu1 %v5658_v46  ;;  %v5758_v45 = vld [vmem:[#allocation7 + $0x10c] ss:$16 sps:$4 sm:$0xff]   ;;  %v5753_v46 = vld [vmem:[#allocation7 + $0x100] ss:$16 sps:$4 sm:$0xff]  }
 0x162   :  { %1871 = vmatprep.subr.bf16.mxu0 %v5663_v47  ;;  %2035 = vmatprep.subr.bf16.mxu1 %v5666_v48  ;;  %v5756_v47 = vld [vmem:[#allocation7 + $0x108] ss:$16 sps:$4 sm:$0xff]   ;;  %v5761_v48 = vld [vmem:[#allocation7 + $0x124] ss:$16 sps:$4 sm:$0xff]  }
 0x165   :  { %1872 = vmatpush1.bf16.msra.mxu0 %v5661_v49  ;;  %2036 = vmatpush1.bf16.msra.mxu1 %v5664_v50  ;;  %v5764_v49 = vld [vmem:[#allocation7 + $0x12c] ss:$16 sps:$4 sm:$0xff]   ;;  %v5759_v50 = vld [vmem:[#allocation7 + $0x120] ss:$16 sps:$4 sm:$0xff]  }
 0x166   :  { %1873 = vmatprep.subr.bf16.mxu0 %v5669_v51  ;;  %2037 = vmatprep.subr.bf16.mxu1 %v5672_v52  ;;  %v5762_v51 = vld [vmem:[#allocation7 + $0x128] ss:$16 sps:$4 sm:$0xff]   ;;  %v5767_v52 = vld [vmem:[#allocation7 + $0x144] ss:$16 sps:$4 sm:$0xff]  }
 0x169   :  { %1874 = vmatpush1.bf16.msra.mxu0 %v5667_v53  ;;  %2038 = vmatpush1.bf16.msra.mxu1 %v5670_v54  ;;  %v5770_v53 = vld [vmem:[#allocation7 + $0x14c] ss:$16 sps:$4 sm:$0xff]   ;;  %v5765_v54 = vld [vmem:[#allocation7 + $0x140] ss:$16 sps:$4 sm:$0xff]  }
 0x16a   :  { %1875 = vmatprep.subr.bf16.mxu0 %v5675_v55  ;;  %2039 = vmatprep.subr.bf16.mxu1 %v5678_v56  ;;  %v5768_v55 = vld [vmem:[#allocation7 + $0x148] ss:$16 sps:$4 sm:$0xff]   ;;  %v5773_v56 = vld [vmem:[#allocation7 + $0x164] ss:$16 sps:$4 sm:$0xff]  }
 0x16d   :  { %1876 = vmatpush1.bf16.msra.mxu0 %v5673_v57  ;;  %2040 = vmatpush1.bf16.msra.mxu1 %v5676_v58  ;;  %v5776_v57 = vld [vmem:[#allocation7 + $0x16c] ss:$16 sps:$4 sm:$0xff]   ;;  %v5771_v58 = vld [vmem:[#allocation7 + $0x160] ss:$16 sps:$4 sm:$0xff]  }
 0x16e   :  { %1877 = vmatprep.subr.bf16.mxu0 %v5681_v59  ;;  %2041 = vmatprep.subr.bf16.mxu1 %v5684_v60  ;;  %v5774_v59 = vld [vmem:[#allocation7 + $0x168] ss:$16 sps:$4 sm:$0xff]   ;;  %v5779_v60 = vld [vmem:[#allocation7 + $0x184] ss:$16 sps:$4 sm:$0xff]  }
 0x171   :  { %1878 = vmatpush1.bf16.msra.mxu0 %v5679_v61  ;;  %2042 = vmatpush1.bf16.msra.mxu1 %v5682_v62  ;;  %v5782_v61 = vld [vmem:[#allocation7 + $0x18c] ss:$16 sps:$4 sm:$0xff]   ;;  %v5777_v62 = vld [vmem:[#allocation7 + $0x180] ss:$16 sps:$4 sm:$0xff]  }
 0x172   :  { %1879 = vmatprep.subr.bf16.mxu0 %v5687_v63  ;;  %2043 = vmatprep.subr.bf16.mxu1 %v5690_v0  ;;  %v5780_v63 = vld [vmem:[#allocation7 + $0x188] ss:$16 sps:$4 sm:$0xff]   ;;  %v5785_v0 = vld [vmem:[#allocation7 + $0x1a4] ss:$16 sps:$4 sm:$0xff]  }
 0x175   :  { %1880 = vmatpush1.bf16.msra.mxu0 %v5685_v1  ;;  %2044 = vmatpush1.bf16.msra.mxu1 %v5688_v2  ;;  %v5788_v1 = vld [vmem:[#allocation7 + $0x1ac] ss:$16 sps:$4 sm:$0xff]   ;;  %v5783_v2 = vld [vmem:[#allocation7 + $0x1a0] ss:$16 sps:$4 sm:$0xff]  }
 0x176   :  { %1881 = vmatprep.subr.bf16.mxu0 %v5693_v3  ;;  %2045 = vmatprep.subr.bf16.mxu1 %v5696_v4  ;;  %v5786_v3 = vld [vmem:[#allocation7 + $0x1a8] ss:$16 sps:$4 sm:$0xff]   ;;  %v5791_v4 = vld [vmem:[#allocation7 + $0x1c4] ss:$16 sps:$4 sm:$0xff]  }
 0x179   :  { %1882 = vmatpush1.bf16.msra.mxu0 %v5691_v5  ;;  %2046 = vmatpush1.bf16.msra.mxu1 %v5694_v6  ;;  %v5794_v5 = vld [vmem:[#allocation7 + $0x1cc] ss:$16 sps:$4 sm:$0xff]   ;;  %v5789_v6 = vld [vmem:[#allocation7 + $0x1c0] ss:$16 sps:$4 sm:$0xff]  }
 0x17a   :  { %1883 = vmatprep.subr.bf16.mxu0 %v5699_v7  ;;  %2047 = vmatprep.subr.bf16.mxu1 %v5702_v8  ;;  %v5792_v7 = vld [vmem:[#allocation7 + $0x1c8] ss:$16 sps:$4 sm:$0xff]   ;;  %v5797_v8 = vld [vmem:[#allocation7 + $0x1e4] ss:$16 sps:$4 sm:$0xff]  }
 0x17d   :  { %1884 = vmatpush1.bf16.msra.mxu0 %v5697_v9  ;;  %2048 = vmatpush1.bf16.msra.mxu1 %v5700_v10  ;;  %v5800_v9 = vld [vmem:[#allocation7 + $0x1ec] ss:$16 sps:$4 sm:$0xff]   ;;  %v5795_v10 = vld [vmem:[#allocation7 + $0x1e0] ss:$16 sps:$4 sm:$0xff]  }
 0x17e   :  { %2864 = vmatprep.subr.bf16.mxu0 %v5707_v12  ;;  %2946 = vmatprep.subr.bf16.mxu1 %v5710_v13  ;;  %v5798_v12 = vld [vmem:[#allocation7 + $0x1e8] ss:$16 sps:$4 sm:$0xff]   ;;  %v5803_v13 = vld [vmem:[#allocation7 + $0x204] ss:$16 sps:$4 sm:$0xff]  }
 0x180   :  { %1886 = vmatmul.mubr.bf16.vlgmr.msra.gmra.mrb[0].mxu0 %v4591_v17  ;;  %2050 = vmatmul.mubr.bf16.vlgmr.msra.gmra.mrb[0].mxu1 %v4591_v17 }
 0x181   :  { %2865 = vmatpush1.bf16.msra.mxu0 %v5705_v15  ;;  %2947 = vmatpush1.bf16.msra.mxu1 %v5708_v16  ;;  %v5806_v15 = vld [vmem:[#allocation7 + $0x20c] ss:$16 sps:$4 sm:$0xff]   ;;  %v402_v16 = vlaneseq }
 0x182   :  { %2866 = vmatprep.subr.bf16.mxu0 %v5713_v18  ;;  %2948 = vmatprep.subr.bf16.mxu1 %v5716_v19  ;;  %v6522_v19 = vld [vmem:[%s6591_s2] sm:$0xf] }
 0x183   :  { %v6514_v17 = vshrl.u32 %v402_v16, 7  ;;  %v5860_v16 = vld [vmem:[#allocation7 + $0x32c] ss:$16 sps:$4 sm:$0xff]  }
 0x185   :  { %2867 = vmatpush1.bf16.msra.mxu0 %v5711_v20  ;;  %2949 = vmatpush1.bf16.msra.mxu1 %v5714_v11  ;;  %v6517_v18 = vsub.s32 0, %v6514_v17  ;;  %v6525_v20 = vsub.s32 1, %v6514_v17  ;;  %v416_v11 = vsub.s32 3, %v6514_v17 }
 0x186   :  { %2868 = vmatprep.subr.bf16.mxu0 %v5719_v21  ;;  %2950 = vmatprep.subr.bf16.mxu1 %v5722_v22 }
 0x187   :  { %v405_v21 = vrot.slane %v6522_v19, %v6517_v18  ;;  %v409_v22 = vrot.slane %v6522_v19, %v6525_v20 }
 0x189   :  { %2869 = vmatpush1.bf16.msra.mxu0 %v5717_v23  ;;  %2951 = vmatpush1.bf16.msra.mxu1 %v5720_v24  ;;  %v417_v23 = vrot.slane %v6522_v19, %v416_v11 }
 0x18a   :  { %2870 = vmatprep.subr.bf16.mxu0 %v5725_v25  ;;  %2952 = vmatprep.subr.bf16.mxu1 %v5728_v14 }
 0x18d   :  { %2871 = vmatpush1.bf16.msra.mxu0 %v5723_v26  ;;  %2953 = vmatpush1.bf16.msra.mxu1 %v5726_v27 }
 0x18e   :  { %2872 = vmatprep.subr.bf16.mxu0 %v5731_v28  ;;  %2954 = vmatprep.subr.bf16.mxu1 %v5734_v29 }
 0x191   :  { %2873 = vmatpush1.bf16.msra.mxu0 %v5729_v30  ;;  %2955 = vmatpush1.bf16.msra.mxu1 %v5732_v31 }
 0x192   :  { %2874 = vmatprep.subr.bf16.mxu0 %v5737_v32  ;;  %2956 = vmatprep.subr.bf16.mxu1 %v5740_v33 }
 0x195   :  { %2875 = vmatpush1.bf16.msra.mxu0 %v5735_v34  ;;  %2957 = vmatpush1.bf16.msra.mxu1 %v5738_v35 }
 0x196   :  { %2876 = vmatprep.subr.bf16.mxu0 %v5743_v36  ;;  %2958 = vmatprep.subr.bf16.mxu1 %v5746_v37 }
 0x199   :  { %2877 = vmatpush1.bf16.msra.mxu0 %v5741_v38  ;;  %2959 = vmatpush1.bf16.msra.mxu1 %v5744_v39 }
 0x19a   :  { %2878 = vmatprep.subr.bf16.mxu0 %v5749_v40  ;;  %2960 = vmatprep.subr.bf16.mxu1 %v5752_v41  ;;  %v5801_v40 = vld [vmem:[#allocation7 + $0x200] ss:$16 sps:$4 sm:$0xff]   ;;  %v5804_v41 = vld [vmem:[#allocation7 + $0x208] ss:$16 sps:$4 sm:$0xff]  }
 0x19d   :  { %2879 = vmatpush1.bf16.msra.mxu0 %v5747_v42  ;;  %2961 = vmatpush1.bf16.msra.mxu1 %v5750_v43 }
 0x19e   :  { %2880 = vmatprep.subr.bf16.mxu0 %v5755_v44  ;;  %2962 = vmatprep.subr.bf16.mxu1 %v5758_v45  ;;  %v5809_v44 = vld [vmem:[#allocation7 + $0x224] ss:$16 sps:$4 sm:$0xff]   ;;  %v5812_v45 = vld [vmem:[#allocation7 + $0x22c] ss:$16 sps:$4 sm:$0xff]  }
 0x1a1   :  { %2881 = vmatpush1.bf16.msra.mxu0 %v5753_v46  ;;  %2963 = vmatpush1.bf16.msra.mxu1 %v5756_v47  ;;  %v5807_v47 = vld [vmem:[#allocation7 + $0x220] ss:$16 sps:$4 sm:$0xff]  }
 0x1a2   :  { %2882 = vmatprep.subr.bf16.mxu0 %v5761_v48  ;;  %2964 = vmatprep.subr.bf16.mxu1 %v5764_v49  ;;  %v5810_v48 = vld [vmem:[#allocation7 + $0x228] ss:$16 sps:$4 sm:$0xff]   ;;  %v5815_v49 = vld [vmem:[#allocation7 + $0x244] ss:$16 sps:$4 sm:$0xff]  }
 0x1a5   :  { %2883 = vmatpush1.bf16.msra.mxu0 %v5759_v50  ;;  %2965 = vmatpush1.bf16.msra.mxu1 %v5762_v51  ;;  %v5818_v50 = vld [vmem:[#allocation7 + $0x24c] ss:$16 sps:$4 sm:$0xff]   ;;  %v5813_v51 = vld [vmem:[#allocation7 + $0x240] ss:$16 sps:$4 sm:$0xff]  }
 0x1a6   :  { %2884 = vmatprep.subr.bf16.mxu0 %v5767_v52  ;;  %2966 = vmatprep.subr.bf16.mxu1 %v5770_v53  ;;  %v5816_v52 = vld [vmem:[#allocation7 + $0x248] ss:$16 sps:$4 sm:$0xff]   ;;  %v5821_v53 = vld [vmem:[#allocation7 + $0x264] ss:$16 sps:$4 sm:$0xff]  }
 0x1a9   :  { %2885 = vmatpush1.bf16.msra.mxu0 %v5765_v54  ;;  %2967 = vmatpush1.bf16.msra.mxu1 %v5768_v55  ;;  %v5824_v54 = vld [vmem:[#allocation7 + $0x26c] ss:$16 sps:$4 sm:$0xff]   ;;  %v5819_v55 = vld [vmem:[#allocation7 + $0x260] ss:$16 sps:$4 sm:$0xff]  }
 0x1aa   :  { %2886 = vmatprep.subr.bf16.mxu0 %v5773_v56  ;;  %2968 = vmatprep.subr.bf16.mxu1 %v5776_v57  ;;  %v5822_v56 = vld [vmem:[#allocation7 + $0x268] ss:$16 sps:$4 sm:$0xff]   ;;  %v5827_v57 = vld [vmem:[#allocation7 + $0x284] ss:$16 sps:$4 sm:$0xff]  }
 0x1ad   :  { %2887 = vmatpush1.bf16.msra.mxu0 %v5771_v58  ;;  %2969 = vmatpush1.bf16.msra.mxu1 %v5774_v59  ;;  %v5830_v58 = vld [vmem:[#allocation7 + $0x28c] ss:$16 sps:$4 sm:$0xff]   ;;  %v5825_v59 = vld [vmem:[#allocation7 + $0x280] ss:$16 sps:$4 sm:$0xff]  }
 0x1ae   :  { %2888 = vmatprep.subr.bf16.mxu0 %v5779_v60  ;;  %2970 = vmatprep.subr.bf16.mxu1 %v5782_v61  ;;  %v5828_v60 = vld [vmem:[#allocation7 + $0x288] ss:$16 sps:$4 sm:$0xff]   ;;  %v5833_v61 = vld [vmem:[#allocation7 + $0x2a4] ss:$16 sps:$4 sm:$0xff]  }
 0x1b1   :  { %2889 = vmatpush1.bf16.msra.mxu0 %v5777_v62  ;;  %2971 = vmatpush1.bf16.msra.mxu1 %v5780_v63  ;;  %v5836_v62 = vld [vmem:[#allocation7 + $0x2ac] ss:$16 sps:$4 sm:$0xff]   ;;  %v5831_v63 = vld [vmem:[#allocation7 + $0x2a0] ss:$16 sps:$4 sm:$0xff]  }
 0x1b2   :  { %2890 = vmatprep.subr.bf16.mxu0 %v5785_v0  ;;  %2972 = vmatprep.subr.bf16.mxu1 %v5788_v1  ;;  %v5834_v0 = vld [vmem:[#allocation7 + $0x2a8] ss:$16 sps:$4 sm:$0xff]   ;;  %v5839_v1 = vld [vmem:[#allocation7 + $0x2c4] ss:$16 sps:$4 sm:$0xff]  }
 0x1b5   :  { %2891 = vmatpush1.bf16.msra.mxu0 %v5783_v2  ;;  %2973 = vmatpush1.bf16.msra.mxu1 %v5786_v3  ;;  %v5842_v2 = vld [vmem:[#allocation7 + $0x2cc] ss:$16 sps:$4 sm:$0xff]   ;;  %v5837_v3 = vld [vmem:[#allocation7 + $0x2c0] ss:$16 sps:$4 sm:$0xff]  }
 0x1b6   :  { %2892 = vmatprep.subr.bf16.mxu0 %v5791_v4  ;;  %2974 = vmatprep.subr.bf16.mxu1 %v5794_v5  ;;  %v5840_v4 = vld [vmem:[#allocation7 + $0x2c8] ss:$16 sps:$4 sm:$0xff]   ;;  %v5845_v5 = vld [vmem:[#allocation7 + $0x2e4] ss:$16 sps:$4 sm:$0xff]  }
 0x1b9   :  { %2893 = vmatpush1.bf16.msra.mxu0 %v5789_v6  ;;  %2975 = vmatpush1.bf16.msra.mxu1 %v5792_v7  ;;  %v5848_v6 = vld [vmem:[#allocation7 + $0x2ec] ss:$16 sps:$4 sm:$0xff]   ;;  %v5843_v7 = vld [vmem:[#allocation7 + $0x2e0] ss:$16 sps:$4 sm:$0xff]  }
 0x1ba   :  { %2894 = vmatprep.subr.bf16.mxu0 %v5797_v8  ;;  %2976 = vmatprep.subr.bf16.mxu1 %v5800_v9  ;;  %v5846_v8 = vld [vmem:[#allocation7 + $0x2e8] ss:$16 sps:$4 sm:$0xff]   ;;  %v5851_v9 = vld [vmem:[#allocation7 + $0x304] ss:$16 sps:$4 sm:$0xff]  }
 0x1bd   :  { %2895 = vmatpush1.bf16.msra.mxu0 %v5795_v10  ;;  %2977 = vmatpush1.bf16.msra.mxu1 %v5798_v12  ;;  %v5854_v10 = vld [vmem:[#allocation7 + $0x30c] ss:$16 sps:$4 sm:$0xff]   ;;  %v5849_v12 = vld [vmem:[#allocation7 + $0x300] ss:$16 sps:$4 sm:$0xff]  }
 0x1be   :  { %2905 = vmatprep.subr.bf16.mxu0 %v5803_v13  ;;  %2987 = vmatprep.subr.bf16.mxu1 %v5806_v15  ;;  %v5852_v13 = vld [vmem:[#allocation7 + $0x308] ss:$16 sps:$4 sm:$0xff]   ;;  %v5857_v15 = vld [vmem:[#allocation7 + $0x324] ss:$16 sps:$4 sm:$0xff]  }
 0x253   :  { %v1887_v24 = vpop.f32.mrb[0].mxu0  ;;  %v6535_v25 = vpop.f32.mrb[0].mxu1 }
 0x254   :  { %v5242_v14 = vadd.f32 %v1887_v24, %v405_v21  ;;  %v1889_v26 = vpop.f32.mrb[1].mxu0  ;;  %v2053_v27 = vpop.f32.mrb[1].mxu1  ;;  %v5855_v21 = vld [vmem:[#allocation7 + $0x320] ss:$16 sps:$4 sm:$0xff]   ;;  %v5866_v24 = vld [vmem:[#allocation7 + $0x34c] ss:$16 sps:$4 sm:$0xff]  }
 0x255   :  { %v5243_v28 = vadd.f32 %v1889_v26, %v409_v22  ;;  %v5245_v29 = vadd.f32 %v2053_v27, %v417_v23  ;;  %v1891_v30 = vpop.f32.mrb[2].mxu0  ;;  %v2055_v31 = vpop.f32.mrb[2].mxu1  ;;  %v5858_v22 = vld [vmem:[#allocation7 + $0x328] ss:$16 sps:$4 sm:$0xff]   ;;  %v5863_v23 = vld [vmem:[#allocation7 + $0x344] ss:$16 sps:$4 sm:$0xff]  }
 0x256   :  { %v2058_v32 = vpack.c.bf16 %v5242_v14, %v5242_v14  ;;  %v1892_v33 = vpop.f32.mrb[3].mxu0  ;;  %v2056_v34 = vpop.f32.mrb[3].mxu1  ;;  %v5861_v14 = vld [vmem:[#allocation7 + $0x340] ss:$16 sps:$4 sm:$0xff]   ;;  %v5864_v26 = vld [vmem:[#allocation7 + $0x348] ss:$16 sps:$4 sm:$0xff]  }
 0x257   :  { %v2059_v35 = vpack.c.bf16 %v5243_v28, %v5243_v28  ;;  %v2061_v36 = vpack.c.bf16 %v5245_v29, %v5245_v29  ;;  %v5869_v27 = vld [vmem:[#allocation7 + $0x364] ss:$16 sps:$4 sm:$0xff]   ;;  %v5872_v28 = vld [vmem:[#allocation7 + $0x36c] ss:$16 sps:$4 sm:$0xff]   ;;  %v5867_v29 = vld [vmem:[#allocation7 + $0x360] ss:$16 sps:$4 sm:$0xff]  }
 0x258   :  { %v2066_v37 = vmul.bf16 1009007652, %v2058_v32  ;;  %vm2062_vm0 = vcmp.ge.bf16.partialorder %v2058_v32, 0  ;;  %v5870_v30 = vld [vmem:[#allocation7 + $0x368] ss:$16 sps:$4 sm:$0xff]   ;;  %v6538_v33 = vsub.s32 2, %v6514_v17 }
 0x259   :  { %v2067_v38 = vmul.bf16 1009007652, %v2059_v35  ;;  %vm2063_vm1 = vcmp.ge.bf16.partialorder %v2059_v35, 0  ;;  %v2069_v39 = vmul.bf16 1009007652, %v2061_v36  ;;  %vm2065_vm2 = vcmp.ge.bf16.partialorder %v2061_v36, 0 }
 0x25a   :  { %v2070_v43 = vsel %vm2062_vm0, %v2058_v32, %v2066_v37  ;;  %v5875_v31 = vld [vmem:[#allocation7 + $0x384] ss:$16 sps:$4 sm:$0xff]   ;;  %v5878_v32 = vld [vmem:[#allocation7 + $0x38c] ss:$16 sps:$4 sm:$0xff]   ;;  %v5873_v34 = vld [vmem:[#allocation7 + $0x380] ss:$16 sps:$4 sm:$0xff]  }
 0x25b   :  { %v2071_v42 = vsel %vm2063_vm1, %v2059_v35, %v2067_v38  ;;  %v2073_v46 = vsel %vm2065_vm2, %v2061_v36, %v2069_v39  ;;  %v5876_v35 = vld [vmem:[#allocation7 + $0x388] ss:$16 sps:$4 sm:$0xff]   ;;  %v5881_v36 = vld [vmem:[#allocation7 + $0x3a4] ss:$16 sps:$4 sm:$0xff]   ;;  %v5884_v37 = vld [vmem:[#allocation7 + $0x3ac] ss:$16 sps:$4 sm:$0xff]   ;;  %v413_v38 = vrot.slane %v6522_v19, %v6538_v33 }
 0x25c   :  { %2896 = vmatprep.mubr.bf16.mxu0 %v2071_v42  ;;  %2978 = vmatprep.mubr.bf16.mxu1 %v2071_v42  ;;  %v5879_v39 = vld [vmem:[#allocation7 + $0x3a0] ss:$16 sps:$4 sm:$0xff]   ;;  %v5890_v42 = vld [vmem:[#allocation7 + $0x3cc] ss:$16 sps:$4 sm:$0xff]  }
 0x25d   :  { %2897 = vmatmul.mubr.bf16.vlgmr.msra.gmra.mrb[4].mxu0 %v2070_v43  ;;  %2979 = vmatmul.mubr.bf16.vlgmr.msra.gmra.mrb[4].mxu1 %v2070_v43  ;;  %v5244_v43 = vadd.f32 %v6535_v25, %v413_v38  ;;  %v5891_v19 = vld [vmem:[#allocation7 + $0x3e0] ss:$16 sps:$4 sm:$0xff]   ;;  %v5958_v38 = vld [vmem:[#allocation8 + $0x16c] ss:$12 sps:$4 sm:$0xff]  }
 0x25e   :  { %2906 = vmatpush1.bf16.msra.mxu0 %v5801_v40  ;;  %2988 = vmatpush1.bf16.msra.mxu1 %v5804_v41  ;;  %v5882_v40 = vld [vmem:[#allocation7 + $0x3a8] ss:$16 sps:$4 sm:$0xff]   ;;  %v5887_v41 = vld [vmem:[#allocation7 + $0x3c4] ss:$16 sps:$4 sm:$0xff]   ;;  %v5897_v25 = vld [vmem:[#allocation8] ss:$12 sps:$4 sm:$0xff]  }
 0x25f   :  { %2937 = vmatprep.mubr.bf16.mxu0 %v2073_v46  ;;  %3019 = vmatprep.mubr.bf16.mxu1 %v2073_v46  ;;  %v5893_v46 = vld [vmem:[#allocation7 + $0x3e4] ss:$16 sps:$4 sm:$0xff]  }
 0x260   :  { %2907 = vmatprep.subr.bf16.mxu0 %v5809_v44  ;;  %2989 = vmatprep.subr.bf16.mxu1 %v5812_v45  ;;  %v5885_v44 = vld [vmem:[#allocation7 + $0x3c0] ss:$16 sps:$4 sm:$0xff]   ;;  %v5888_v45 = vld [vmem:[#allocation7 + $0x3c8] ss:$16 sps:$4 sm:$0xff]  }
 0x262   :  { %2908 = vmatpush1.bf16.msra.mxu0 %v5807_v47  ;;  %2990 = vmatpush1.bf16.msra.mxu1 %v5810_v48  ;;  %v5896_v47 = vld [vmem:[#allocation7 + $0x3ec] ss:$16 sps:$4 sm:$0xff]   ;;  %v2060_v48 = vpack.c.bf16 %v5244_v43, %v5244_v43  ;;  %v5964_v43 = vld [vmem:[#allocation8 + $0x248] ss:$12 sps:$4 sm:$0xff]  }
 0x263   :  { %2909 = vmatprep.subr.bf16.mxu0 %v5815_v49  ;;  %2991 = vmatprep.subr.bf16.mxu1 %v5818_v50  ;;  %v5894_v49 = vld [vmem:[#allocation7 + $0x3e8] ss:$16 sps:$4 sm:$0xff]   ;;  %v5899_v50 = vld [vmem:[#allocation8 + $0x4] ss:$12 sps:$4 sm:$0xff]  }
 0x264   :  { %vm2064_vm3 = vcmp.ge.bf16.partialorder %v2060_v48, 0 }
 0x266   :  { %2910 = vmatpush1.bf16.msra.mxu0 %v5813_v51  ;;  %2992 = vmatpush1.bf16.msra.mxu1 %v5816_v52  ;;  %v5924_v51 = vld [vmem:[#allocation8 + $0xc8] ss:$12 sps:$4 sm:$0xff]   ;;  %v2068_v52 = vmul.bf16 1009007652, %v2060_v48 }
 0x267   :  { %2911 = vmatprep.subr.bf16.mxu0 %v5821_v53  ;;  %2993 = vmatprep.subr.bf16.mxu1 %v5824_v54  ;;  %v5925_v53 = vld [vmem:[#allocation8 + $0x8] ss:$12 sps:$4 sm:$0xff]  }
 0x268   :  { %v5902_v54 = vld [vmem:[#allocation8 + $0x1c] ss:$12 sps:$4 sm:$0xff]  }
 0x26a   :  { %2912 = vmatpush1.bf16.msra.mxu0 %v5819_v55  ;;  %2994 = vmatpush1.bf16.msra.mxu1 %v5822_v56  ;;  %v5929_v55 = vld [vmem:[#allocation8 + $0xe0] ss:$12 sps:$4 sm:$0xff]   ;;  %v2072_v56 = vsel %vm2064_vm3, %v2060_v48, %v2068_v52 }
 0x26b   :  { %2913 = vmatprep.subr.bf16.mxu0 %v5827_v57  ;;  %2995 = vmatprep.subr.bf16.mxu1 %v5830_v58  ;;  %v5900_v57 = vld [vmem:[#allocation8 + $0x18] ss:$12 sps:$4 sm:$0xff]   ;;  %v5930_v58 = vld [vmem:[#allocation8 + $0x20] ss:$12 sps:$4 sm:$0xff]  }
 0x26e   :  { %2914 = vmatpush1.bf16.msra.mxu0 %v5825_v59  ;;  %2996 = vmatpush1.bf16.msra.mxu1 %v5828_v60  ;;  %v5905_v59 = vld [vmem:[#allocation8 + $0x34] ss:$12 sps:$4 sm:$0xff]   ;;  %v5934_v60 = vld [vmem:[#allocation8 + $0xf8] ss:$12 sps:$4 sm:$0xff]  }
 0x26f   :  { %2915 = vmatprep.subr.bf16.mxu0 %v5833_v61  ;;  %2997 = vmatprep.subr.bf16.mxu1 %v5836_v62  ;;  %v5903_v61 = vld [vmem:[#allocation8 + $0x30] ss:$12 sps:$4 sm:$0xff]   ;;  %v5935_v62 = vld [vmem:[#allocation8 + $0x38] ss:$12 sps:$4 sm:$0xff]  }
 0x272   :  { %2916 = vmatpush1.bf16.msra.mxu0 %v5831_v63  ;;  %2998 = vmatpush1.bf16.msra.mxu1 %v5834_v0  ;;  %v5908_v63 = vld [vmem:[#allocation8 + $0x4c] ss:$12 sps:$4 sm:$0xff]   ;;  %v5939_v0 = vld [vmem:[#allocation8 + $0x110] ss:$12 sps:$4 sm:$0xff]  }
 0x273   :  { %2917 = vmatprep.subr.bf16.mxu0 %v5839_v1  ;;  %2999 = vmatprep.subr.bf16.mxu1 %v5842_v2  ;;  %v5906_v1 = vld [vmem:[#allocation8 + $0x48] ss:$12 sps:$4 sm:$0xff]   ;;  %v5940_v2 = vld [vmem:[#allocation8 + $0x50] ss:$12 sps:$4 sm:$0xff]  }
 0x276   :  { %2918 = vmatpush1.bf16.msra.mxu0 %v5837_v3  ;;  %3000 = vmatpush1.bf16.msra.mxu1 %v5840_v4  ;;  %v5911_v3 = vld [vmem:[#allocation8 + $0x64] ss:$12 sps:$4 sm:$0xff]   ;;  %v5944_v4 = vld [vmem:[#allocation8 + $0x128] ss:$12 sps:$4 sm:$0xff]  }
 0x277   :  { %2919 = vmatprep.subr.bf16.mxu0 %v5845_v5  ;;  %3001 = vmatprep.subr.bf16.mxu1 %v5848_v6  ;;  %v5909_v5 = vld [vmem:[#allocation8 + $0x60] ss:$12 sps:$4 sm:$0xff]   ;;  %v5945_v6 = vld [vmem:[#allocation8 + $0x68] ss:$12 sps:$4 sm:$0xff]  }
 0x27a   :  { %2920 = vmatpush1.bf16.msra.mxu0 %v5843_v7  ;;  %3002 = vmatpush1.bf16.msra.mxu1 %v5846_v8  ;;  %v5914_v7 = vld [vmem:[#allocation8 + $0x7c] ss:$12 sps:$4 sm:$0xff]   ;;  %v5949_v8 = vld [vmem:[#allocation8 + $0x140] ss:$12 sps:$4 sm:$0xff]  }
 0x27b   :  { %2921 = vmatprep.subr.bf16.mxu0 %v5851_v9  ;;  %3003 = vmatprep.subr.bf16.mxu1 %v5854_v10  ;;  %v5912_v9 = vld [vmem:[#allocation8 + $0x78] ss:$12 sps:$4 sm:$0xff]   ;;  %v5950_v10 = vld [vmem:[#allocation8 + $0x80] ss:$12 sps:$4 sm:$0xff]  }
 0x27e   :  { %2922 = vmatpush1.bf16.msra.mxu0 %v5849_v12  ;;  %3004 = vmatpush1.bf16.msra.mxu1 %v5852_v13  ;;  %v5917_v12 = vld [vmem:[#allocation8 + $0x94] ss:$12 sps:$4 sm:$0xff]   ;;  %v5915_v13 = vld [vmem:[#allocation8 + $0x90] ss:$12 sps:$4 sm:$0xff]  }
 0x27f   :  { %2923 = vmatprep.subr.bf16.mxu0 %v5857_v15  ;;  %3005 = vmatprep.subr.bf16.mxu1 %v5860_v16  ;;  %v5920_v15 = vld [vmem:[#allocation8 + $0xac] ss:$12 sps:$4 sm:$0xff]   ;;  %v5918_v16 = vld [vmem:[#allocation8 + $0xa8] ss:$12 sps:$4 sm:$0xff]  }
 0x282   :  { %2924 = vmatpush1.bf16.msra.mxu0 %v5855_v21  ;;  %3006 = vmatpush1.bf16.msra.mxu1 %v5858_v22  ;;  %v5923_v21 = vld [vmem:[#allocation8 + $0xc4] ss:$12 sps:$4 sm:$0xff]   ;;  %v5921_v22 = vld [vmem:[#allocation8 + $0xc0] ss:$12 sps:$4 sm:$0xff]  }
 0x283   :  { %2925 = vmatprep.subr.bf16.mxu0 %v5863_v23  ;;  %3007 = vmatprep.subr.bf16.mxu1 %v5866_v24  ;;  %v5928_v23 = vld [vmem:[#allocation8 + $0xdc] ss:$12 sps:$4 sm:$0xff]   ;;  %v5926_v24 = vld [vmem:[#allocation8 + $0xd8] ss:$12 sps:$4 sm:$0xff]  }
 0x286   :  { %2926 = vmatpush1.bf16.msra.mxu0 %v5861_v14  ;;  %3008 = vmatpush1.bf16.msra.mxu1 %v5864_v26  ;;  %v5933_v14 = vld [vmem:[#allocation8 + $0xf4] ss:$12 sps:$4 sm:$0xff]   ;;  %v5931_v26 = vld [vmem:[#allocation8 + $0xf0] ss:$12 sps:$4 sm:$0xff]  }
 0x287   :  { %2927 = vmatprep.subr.bf16.mxu0 %v5869_v27  ;;  %3009 = vmatprep.subr.bf16.mxu1 %v5872_v28  ;;  %v5938_v27 = vld [vmem:[#allocation8 + $0x10c] ss:$12 sps:$4 sm:$0xff]   ;;  %v5936_v28 = vld [vmem:[#allocation8 + $0x108] ss:$12 sps:$4 sm:$0xff]  }
 0x28a   :  { %2928 = vmatpush1.bf16.msra.mxu0 %v5867_v29  ;;  %3010 = vmatpush1.bf16.msra.mxu1 %v5870_v30  ;;  %v5943_v29 = vld [vmem:[#allocation8 + $0x124] ss:$12 sps:$4 sm:$0xff]   ;;  %v5941_v30 = vld [vmem:[#allocation8 + $0x120] ss:$12 sps:$4 sm:$0xff]  }
 0x28b   :  { %2929 = vmatprep.subr.bf16.mxu0 %v5875_v31  ;;  %3011 = vmatprep.subr.bf16.mxu1 %v5878_v32  ;;  %v5948_v31 = vld [vmem:[#allocation8 + $0x13c] ss:$12 sps:$4 sm:$0xff]   ;;  %v5946_v32 = vld [vmem:[#allocation8 + $0x138] ss:$12 sps:$4 sm:$0xff]  }
 0x28e   :  { %2930 = vmatpush1.bf16.msra.mxu0 %v5873_v34  ;;  %3012 = vmatpush1.bf16.msra.mxu1 %v5876_v35  ;;  %v5953_v34 = vld [vmem:[#allocation8 + $0x154] ss:$12 sps:$4 sm:$0xff]   ;;  %v5954_v35 = vld [vmem:[#allocation8 + $0x158] ss:$12 sps:$4 sm:$0xff]  }
 0x28f   :  { %2931 = vmatprep.subr.bf16.mxu0 %v5881_v36  ;;  %3013 = vmatprep.subr.bf16.mxu1 %v5884_v37  ;;  %v5951_v36 = vld [vmem:[#allocation8 + $0x150] ss:$12 sps:$4 sm:$0xff]   ;;  %v5955_v37 = vld [vmem:[#allocation8 + $0x98] ss:$12 sps:$4 sm:$0xff]  }
 0x292   :  { %2932 = vmatpush1.bf16.msra.mxu0 %v5879_v39  ;;  %3014 = vmatpush1.bf16.msra.mxu1 %v5882_v40  ;;  %v5959_v39 = vld [vmem:[#allocation8 + $0x170] ss:$12 sps:$4 sm:$0xff]   ;;  %v5956_v40 = vld [vmem:[#allocation8 + $0x168] ss:$12 sps:$4 sm:$0xff]  }
 0x293   :  { %2933 = vmatprep.subr.bf16.mxu0 %v5887_v41  ;;  %3015 = vmatprep.subr.bf16.mxu1 %v5890_v42  ;;  %v5960_v41 = vld [vmem:[#allocation8 + $0xb0] ss:$12 sps:$4 sm:$0xff]  }
 0x294   :  { %v5963_v42 = vld [vmem:[#allocation8 + $0x184] ss:$12 sps:$4 sm:$0xff]  }
 0x296   :  { %2934 = vmatpush1.bf16.msra.mxu0 %v5885_v44  ;;  %3016 = vmatpush1.bf16.msra.mxu1 %v5888_v45  ;;  %v6546_v44 = vld [vmem:[%s6593_s4] sm:$0xf] }
 0x297   :  { %2935 = vmatprep.subr.bf16.mxu0 %v5893_v46  ;;  %3017 = vmatprep.subr.bf16.mxu1 %v5896_v47  ;;  %v2207_v45 = vrot.slane %v6546_v44, %v6517_v18  ;;  %v2211_v46 = vrot.slane %v6546_v44, %v6525_v20  ;;  %v2219_v47 = vrot.slane %v6546_v44, %v416_v11 }
 0x29a   :  { %2936 = vmatpush1.bf16.msra.mxu0 %v5891_v19  ;;  %3018 = vmatpush1.bf16.msra.mxu1 %v5894_v49 }
 0x29b   :  { %3701 = vmatprep.subr.bf16.mxu0 %v5899_v50  ;;  %5147 = vmatprep.subr.bf16.mxu1 %v5924_v51 }
 0x29d   :  { %2938 = vmatmul.mubr.bf16.vlgmr.msra.gmra.mrb[4].mxu0 %v2072_v56  ;;  %3020 = vmatmul.mubr.bf16.vlgmr.msra.gmra.mrb[4].mxu1 %v2072_v56 }
 0x29e   :  { %3702 = vmatpush1.bf16.msra.mxu0 %v5897_v25  ;;  %5148 = vmatpush3.bf16.msra.mxu1 %v5925_v53 }
 0x29f   :  { %3703 = vmatprep.subr.bf16.mxu0 %v5902_v54  ;;  %5149 = vmatprep.subr.bf16.mxu1 %v5929_v55 }
 0x2a2   :  { %3704 = vmatpush1.bf16.msra.mxu0 %v5900_v57  ;;  %5150 = vmatpush3.bf16.msra.mxu1 %v5930_v58 }
 0x2a3   :  { %3705 = vmatprep.subr.bf16.mxu0 %v5905_v59  ;;  %5151 = vmatprep.subr.bf16.mxu1 %v5934_v60 }
 0x2a6   :  { %3706 = vmatpush1.bf16.msra.mxu0 %v5903_v61  ;;  %5152 = vmatpush3.bf16.msra.mxu1 %v5935_v62  ;;  %v5961_v61 = vld [vmem:[#allocation8 + $0x180] ss:$12 sps:$4 sm:$0xff]   ;;  %v5965_v62 = vld [vmem:[#allocation8 + $0x188] ss:$12 sps:$4 sm:$0xff]  }
 0x2a7   :  { %3707 = vmatprep.subr.bf16.mxu0 %v5908_v63  ;;  %5153 = vmatprep.subr.bf16.mxu1 %v5939_v0 }
 0x2aa   :  { %3708 = vmatpush1.bf16.msra.mxu0 %v5906_v1  ;;  %5154 = vmatpush3.bf16.msra.mxu1 %v5940_v2  ;;  %v5968_v1 = vld [vmem:[#allocation8 + $0x19c] ss:$12 sps:$4 sm:$0xff]   ;;  %v5969_v2 = vld [vmem:[#allocation8 + $0x260] ss:$12 sps:$4 sm:$0xff]  }
 0x2ab   :  { %3709 = vmatprep.subr.bf16.mxu0 %v5911_v3  ;;  %5155 = vmatprep.subr.bf16.mxu1 %v5944_v4  ;;  %v5966_v4 = vld [vmem:[#allocation8 + $0x198] ss:$12 sps:$4 sm:$0xff]  }
 0x2ae   :  { %3710 = vmatpush1.bf16.msra.mxu0 %v5909_v5  ;;  %5156 = vmatpush3.bf16.msra.mxu1 %v5945_v6  ;;  %v5970_v5 = vld [vmem:[#allocation8 + $0x1a0] ss:$12 sps:$4 sm:$0xff]  }
 0x2af   :  { %3711 = vmatprep.subr.bf16.mxu0 %v5914_v7  ;;  %5157 = vmatprep.subr.bf16.mxu1 %v5949_v8  ;;  %v5973_v6 = vld [vmem:[#allocation8 + $0x1b4] ss:$12 sps:$4 sm:$0xff]   ;;  %v5974_v7 = vld [vmem:[#allocation8 + $0x278] ss:$12 sps:$4 sm:$0xff]   ;;  %v5971_v8 = vld [vmem:[#allocation8 + $0x1b0] ss:$12 sps:$4 sm:$0xff]  }
 0x2b2   :  { %3712 = vmatpush1.bf16.msra.mxu0 %v5912_v9  ;;  %5158 = vmatpush3.bf16.msra.mxu1 %v5950_v10  ;;  %v5975_v9 = vld [vmem:[#allocation8 + $0x1b8] ss:$12 sps:$4 sm:$0xff]  }
 0x2b3   :  { %3713 = vmatprep.subr.bf16.mxu0 %v5917_v12  ;;  %5159 = vmatprep.subr.bf16.mxu1 %v5954_v35  ;;  %v5978_v10 = vld [vmem:[#allocation8 + $0x1cc] ss:$12 sps:$4 sm:$0xff]   ;;  %v5979_v12 = vld [vmem:[#allocation8 + $0x290] ss:$12 sps:$4 sm:$0xff]  }
 0x2b4   :  { %v5998_v35 = vld [vmem:[#allocation8 + $0x22c] ss:$12 sps:$4 sm:$0xff]  }
 0x2b6   :  { %3714 = vmatpush1.bf16.msra.mxu0 %v5915_v13  ;;  %5160 = vmatpush3.bf16.msra.mxu1 %v5955_v37  ;;  %v5976_v13 = vld [vmem:[#allocation8 + $0x1c8] ss:$12 sps:$4 sm:$0xff]  }
 0x2b7   :  { %3715 = vmatprep.subr.bf16.mxu0 %v5920_v15  ;;  %5161 = vmatprep.subr.bf16.mxu1 %v5959_v39  ;;  %v5980_v15 = vld [vmem:[#allocation8 + $0x1d0] ss:$12 sps:$4 sm:$0xff]  }
 0x2b8   :  { %v6000_v39 = vld [vmem:[#allocation8 + $0x230] ss:$12 sps:$4 sm:$0xff]  }
 0x2ba   :  { %3716 = vmatpush1.bf16.msra.mxu0 %v5918_v16  ;;  %5162 = vmatpush3.bf16.msra.mxu1 %v5960_v41  ;;  %v5983_v16 = vld [vmem:[#allocation8 + $0x1e4] ss:$12 sps:$4 sm:$0xff]  }
 0x2bb   :  { %3717 = vmatprep.subr.bf16.mxu0 %v5923_v21  ;;  %5169 = vmatprep.subr.bf16.mxu1 %v5964_v43  ;;  %v5984_v21 = vld [vmem:[#allocation8 + $0x2a8] ss:$12 sps:$4 sm:$0xff]  }
 0x2bc   :  { %v6006_v43 = vld [vmem:[#allocation8 + $0x25c] ss:$12 sps:$4 sm:$0xff]  }
 0x2be   :  { %3718 = vmatpush1.bf16.msra.mxu0 %v5921_v22  ;;  %v5981_v22 = vld [vmem:[#allocation8 + $0x1e0] ss:$12 sps:$4 sm:$0xff]  }
 0x2bf   :  { %3719 = vmatprep.subr.bf16.mxu0 %v5928_v23  ;;  %v5985_v23 = vld [vmem:[#allocation8 + $0x1e8] ss:$12 sps:$4 sm:$0xff]  }
 0x2c2   :  { %3720 = vmatpush1.bf16.msra.mxu0 %v5926_v24  ;;  %v5988_v24 = vld [vmem:[#allocation8 + $0x1fc] ss:$12 sps:$4 sm:$0xff]  }
 0x2c3   :  { %3721 = vmatprep.subr.bf16.mxu0 %v5933_v14  ;;  %v5989_v14 = vld [vmem:[#allocation8 + $0x2c0] ss:$12 sps:$4 sm:$0xff]  }
 0x2c6   :  { %3722 = vmatpush1.bf16.msra.mxu0 %v5931_v26  ;;  %v2215_v26 = vrot.slane %v6546_v44, %v6538_v33 }
 0x2c7   :  { %3723 = vmatprep.subr.bf16.mxu0 %v5938_v27  ;;  %v5986_v27 = vld [vmem:[#allocation8 + $0x1f8] ss:$12 sps:$4 sm:$0xff]  }
 0x2ca   :  { %3724 = vmatpush1.bf16.msra.mxu0 %v5936_v28  ;;  %v5990_v28 = vld [vmem:[#allocation8 + $0x200] ss:$12 sps:$4 sm:$0xff]  }
 0x2cb   :  { %3725 = vmatprep.subr.bf16.mxu0 %v5943_v29  ;;  %v5993_v29 = vld [vmem:[#allocation8 + $0x214] ss:$12 sps:$4 sm:$0xff]  }
 0x2ce   :  { %3726 = vmatpush1.bf16.msra.mxu0 %v5941_v30  ;;  %v5994_v30 = vld [vmem:[#allocation8 + $0x2d8] ss:$12 sps:$4 sm:$0xff]  }
 0x2cf   :  { %3727 = vmatprep.subr.bf16.mxu0 %v5948_v31 }
 0x2d2   :  { %3728 = vmatpush1.bf16.msra.mxu0 %v5946_v32  ;;  %v5991_v32 = vld [vmem:[#allocation8 + $0x210] ss:$12 sps:$4 sm:$0xff]  }
 0x2d3   :  { %3729 = vmatprep.subr.bf16.mxu0 %v5953_v34  ;;  %v5995_v34 = vld [vmem:[#allocation8 + $0x218] ss:$12 sps:$4 sm:$0xff]  }
 0x2d6   :  { %3730 = vmatpush1.bf16.msra.mxu0 %v5951_v36  ;;  %v5999_v36 = vld [vmem:[#allocation8 + $0x2f0] ss:$12 sps:$4 sm:$0xff]  }
 0x2d7   :  { %3731 = vmatprep.subr.bf16.mxu0 %v5958_v38  ;;  %v5996_v38 = vld [vmem:[#allocation8 + $0x228] ss:$12 sps:$4 sm:$0xff]  }
 0x2da   :  { %3732 = vmatpush1.bf16.msra.mxu0 %v5956_v40  ;;  %v6003_v40 = vld [vmem:[#allocation8 + $0x244] ss:$12 sps:$4 sm:$0xff]  }
 0x2db   :  { %3742 = vmatprep.subr.bf16.mxu0 %v5963_v42  ;;  %v6001_v42 = vld [vmem:[#allocation8 + $0x240] ss:$12 sps:$4 sm:$0xff]  }
 0x370   :  { %v2939_v48 = vpop.f32.mrb[4].mxu0  ;;  %v6555_v19 = vpop.f32.mrb[4].mxu1 }
 0x371   :  { %v5246_v49 = vadd.f32 %v2939_v48, %v2207_v45  ;;  %v2941_v50 = vpop.f32.mrb[5].mxu0  ;;  %v3023_v51 = vpop.f32.mrb[5].mxu1  ;;  %v5248_v31 = vadd.f32 %v6555_v19, %v2215_v26  ;;  %v6004_v45 = vld [vmem:[#allocation8 + $0x258] ss:$12 sps:$4 sm:$0xff]   ;;  %v6010_v19 = vld [vmem:[#allocation8 + $0x288] ss:$12 sps:$4 sm:$0xff]  }
 0x372   :  { %v5247_v52 = vadd.f32 %v2941_v50, %v2211_v46  ;;  %v5249_v25 = vadd.f32 %v3023_v51, %v2219_v47  ;;  %v2943_v53 = vpop.f32.mrb[6].mxu0  ;;  %v3025_v54 = vpop.f32.mrb[6].mxu1  ;;  %v6009_v46 = vld [vmem:[#allocation8 + $0x274] ss:$12 sps:$4 sm:$0xff]   ;;  %v6007_v47 = vld [vmem:[#allocation8 + $0x270] ss:$12 sps:$4 sm:$0xff]  }
 0x373   :  { %v3028_v55 = vpack.c.bf16 %v5246_v49, %v5246_v49  ;;  %v2944_v56 = vpop.f32.mrb[7].mxu0  ;;  %v3026_v57 = vpop.f32.mrb[7].mxu1  ;;  %v3030_v37 = vpack.c.bf16 %v5248_v31, %v5248_v31  ;;  %v6012_v48 = vld [vmem:[#allocation8 + $0x28c] ss:$12 sps:$4 sm:$0xff]   ;;  %v6015_v49 = vld [vmem:[#allocation8 + $0x2a4] ss:$12 sps:$4 sm:$0xff]  }
 0x374   :  { %v3029_v58 = vpack.c.bf16 %v5247_v52, %v5247_v52  ;;  %v3031_v59 = vpack.c.bf16 %v5249_v25, %v5249_v25  ;;  %v6013_v50 = vld [vmem:[#allocation8 + $0x2a0] ss:$12 sps:$4 sm:$0xff]   ;;  %v6018_v51 = vld [vmem:[#allocation8 + $0x2bc] ss:$12 sps:$4 sm:$0xff]   ;;  %v6016_v52 = vld [vmem:[#allocation8 + $0x2b8] ss:$12 sps:$4 sm:$0xff]  }
 0x375   :  { %v3036_v60 = vmul.bf16 1009007652, %v3028_v55  ;;  %vm3032_vm4 = vcmp.ge.bf16.partialorder %v3028_v55, 0  ;;  %v3038_v41 = vmul.bf16 1009007652, %v3030_v37  ;;  %vm3034_vm7 = vcmp.ge.bf16.partialorder %v3030_v37, 0 }
 0x376   :  { %v3037_v17 = vmul.bf16 1009007652, %v3029_v58  ;;  %vm3033_vm5 = vcmp.ge.bf16.partialorder %v3029_v58, 0  ;;  %v3039_v11 = vmul.bf16 1009007652, %v3031_v59  ;;  %vm3035_vm6 = vcmp.ge.bf16.partialorder %v3031_v59, 0 }
 0x377   :  { %v3040_v0 = vsel %vm3032_vm4, %v3028_v55, %v3036_v60  ;;  %v3042_v44 = vsel %vm3034_vm7, %v3030_v37, %v3038_v41  ;;  %v6021_v25 = vld [vmem:[#allocation8 + $0x2d4] ss:$12 sps:$4 sm:$0xff]   ;;  %v6019_v53 = vld [vmem:[#allocation8 + $0x2d0] ss:$12 sps:$4 sm:$0xff]   ;;  %v6024_v54 = vld [vmem:[#allocation8 + $0x2ec] ss:$12 sps:$4 sm:$0xff]  }
 0x378   :  { %v3041_v63 = vsel %vm3033_vm5, %v3029_v58, %v3037_v17  ;;  %v3043_v3 = vsel %vm3035_vm6, %v3031_v59, %v3039_v11  ;;  %v6022_v55 = vld [vmem:[#allocation8 + $0x2e8] ss:$12 sps:$4 sm:$0xff]   ;;  %v6027_v57 = vld [vmem:[#allocation10 + $0x4] ss:$8 sps:$4 sm:$0xff]   ;;  %v6028_v59 = vld [vmem:[#allocation10 + $0x10] ss:$8 sps:$4 sm:$0xff]  }
 0x379   :  { %3733 = vmatprep.mubr.bf16.mxu0 %v3041_v63  ;;  %3815 = vmatprep.mubr.bf16.mxu1 %v3041_v63  ;;  %v6025_v56 = vld [vmem:[#allocation10] ss:$8 sps:$4 sm:$0xff]   ;;  %v6030_v58 = vld [vmem:[#allocation10 + $0x14] ss:$8 sps:$4 sm:$0xff]   ;;  %v6033_v60 = vld [vmem:[#allocation10 + $0x24] ss:$8 sps:$4 sm:$0xff]  }
 0x37a   :  { %3734 = vmatmul.mubr.bf16.vlgmr.msra.gmra.mrb[8].mxu0 %v3040_v0  ;;  %3816 = vmatmul.mubr.bf16.vlgmr.msra.gmra.mrb[8].mxu1 %v3040_v0  ;;  %v6031_v17 = vld [vmem:[#allocation10 + $0x20] ss:$8 sps:$4 sm:$0xff]   ;;  %v6036_v11 = vld [vmem:[#allocation10 + $0x34] ss:$8 sps:$4 sm:$0xff]  }
 0x37b   :  { %3743 = vmatpush1.bf16.msra.mxu0 %v5961_v61  ;;  %5170 = vmatpush3.bf16.msra.mxu1 %v5965_v62  ;;  %v6034_v61 = vld [vmem:[#allocation10 + $0x30] ss:$8 sps:$4 sm:$0xff]   ;;  %v6039_v62 = vld [vmem:[#allocation10 + $0x44] ss:$8 sps:$4 sm:$0xff]   ;;  %v6037_v63 = vld [vmem:[#allocation10 + $0x40] ss:$8 sps:$4 sm:$0xff]  }
 0x37c   :  { %3774 = vmatprep.mubr.bf16.mxu0 %v3043_v3  ;;  %3855 = vmatprep.mubr.bf16.mxu1 %v3043_v3  ;;  %v6042_v0 = vld [vmem:[#allocation10 + $0x54] ss:$8 sps:$4 sm:$0xff]   ;;  %v6043_v3 = vld [vmem:[#allocation10 + $0x60] ss:$8 sps:$4 sm:$0xff]  }
 0x37d   :  { %3744 = vmatprep.subr.bf16.mxu0 %v5968_v1  ;;  %5171 = vmatprep.subr.bf16.mxu1 %v5969_v2  ;;  %v6040_v1 = vld [vmem:[#allocation10 + $0x50] ss:$8 sps:$4 sm:$0xff]   ;;  %v6045_v2 = vld [vmem:[#allocation10 + $0x64] ss:$8 sps:$4 sm:$0xff]   ;;  %v6072_v26 = vld [vmem:[#allocation10 + $0xf4] ss:$8 sps:$4 sm:$0xff]  }
 0x37e   :  { %v6099_v31 = vld [vmem:[#allocation11 + $0x48] sm:$0xff]   ;;  %v6104_v37 = vld [vmem:[#allocation11 + $0x18] sm:$0xff]  }
 0x37f   :  { %3745 = vmatpush1.bf16.msra.mxu0 %v5966_v4  ;;  %5172 = vmatpush3.bf16.msra.mxu1 %v5970_v5  ;;  %v6048_v4 = vld [vmem:[#allocation10 + $0x74] ss:$8 sps:$4 sm:$0xff]   ;;  %v6046_v5 = vld [vmem:[#allocation10 + $0x70] ss:$8 sps:$4 sm:$0xff]   ;;  %v6108_v41 = vld [vmem:[#allocation11 + $0x28] sm:$0xff]  }
 0x380   :  { %3746 = vmatprep.subr.bf16.mxu0 %v5973_v6  ;;  %5173 = vmatprep.subr.bf16.mxu1 %v5974_v7  ;;  %v6051_v6 = vld [vmem:[#allocation10 + $0x84] ss:$8 sps:$4 sm:$0xff]   ;;  %v6049_v7 = vld [vmem:[#allocation10 + $0x80] ss:$8 sps:$4 sm:$0xff]  }
 0x383   :  { %3747 = vmatpush1.bf16.msra.mxu0 %v5971_v8  ;;  %5174 = vmatpush3.bf16.msra.mxu1 %v5975_v9  ;;  %v6054_v8 = vld [vmem:[#allocation10 + $0x94] ss:$8 sps:$4 sm:$0xff]   ;;  %v6052_v9 = vld [vmem:[#allocation10 + $0x90] ss:$8 sps:$4 sm:$0xff]  }
 0x384   :  { %3748 = vmatprep.subr.bf16.mxu0 %v5978_v10  ;;  %5175 = vmatprep.subr.bf16.mxu1 %v5979_v12  ;;  %v6057_v10 = vld [vmem:[#allocation10 + $0xa4] ss:$8 sps:$4 sm:$0xff]   ;;  %v6055_v12 = vld [vmem:[#allocation10 + $0xa0] ss:$8 sps:$4 sm:$0xff]  }
 0x387   :  { %3749 = vmatpush1.bf16.msra.mxu0 %v5976_v13  ;;  %5176 = vmatpush3.bf16.msra.mxu1 %v5980_v15  ;;  %v6060_v13 = vld [vmem:[#allocation10 + $0xb4] ss:$8 sps:$4 sm:$0xff]   ;;  %v6058_v15 = vld [vmem:[#allocation10 + $0xb0] ss:$8 sps:$4 sm:$0xff]  }
 0x388   :  { %3750 = vmatprep.subr.bf16.mxu0 %v5983_v16  ;;  %5177 = vmatprep.subr.bf16.mxu1 %v5984_v21  ;;  %v6063_v16 = vld [vmem:[#allocation10 + $0xc4] ss:$8 sps:$4 sm:$0xff]   ;;  %v6061_v21 = vld [vmem:[#allocation10 + $0xc0] ss:$8 sps:$4 sm:$0xff]  }
 0x38b   :  { %3751 = vmatpush1.bf16.msra.mxu0 %v5981_v22  ;;  %5178 = vmatpush3.bf16.msra.mxu1 %v5985_v23  ;;  %v6066_v22 = vld [vmem:[#allocation10 + $0xd4] ss:$8 sps:$4 sm:$0xff]   ;;  %v6064_v23 = vld [vmem:[#allocation10 + $0xd0] ss:$8 sps:$4 sm:$0xff]  }
 0x38c   :  { %3752 = vmatprep.subr.bf16.mxu0 %v5988_v24  ;;  %5179 = vmatprep.subr.bf16.mxu1 %v5989_v14  ;;  %v6069_v24 = vld [vmem:[#allocation10 + $0xe4] ss:$8 sps:$4 sm:$0xff]   ;;  %v6067_v14 = vld [vmem:[#allocation10 + $0xe0] ss:$8 sps:$4 sm:$0xff]  }
 0x38f   :  { %3753 = vmatpush1.bf16.msra.mxu0 %v5986_v27  ;;  %5180 = vmatpush3.bf16.msra.mxu1 %v5990_v28  ;;  %v6070_v27 = vld [vmem:[#allocation10 + $0xf0] ss:$8 sps:$4 sm:$0xff]   ;;  %v6075_v28 = vld [vmem:[#allocation10 + $0x104] ss:$8 sps:$4 sm:$0xff]  }
 0x390   :  { %3754 = vmatprep.subr.bf16.mxu0 %v5993_v29  ;;  %5181 = vmatprep.subr.bf16.mxu1 %v5994_v30  ;;  %v6097_v29 = vld [vmem:[#allocation11 + $0x40] sm:$0xff]  }
 0x391   :  { %v6098_v30 = vld [vmem:[#allocation11] sm:$0xff]  }
 0x393   :  { %3755 = vmatpush1.bf16.msra.mxu0 %v5991_v32  ;;  %5182 = vmatpush3.bf16.msra.mxu1 %v5995_v34  ;;  %v6100_v32 = vld [vmem:[#allocation11 + $0x8] sm:$0xff]   ;;  %v6101_v34 = vld [vmem:[#allocation11 + $0x50] sm:$0xff]  }
 0x394   :  { %3756 = vmatprep.subr.bf16.mxu0 %v5998_v35  ;;  %5183 = vmatprep.subr.bf16.mxu1 %v5999_v36  ;;  %v6102_v35 = vld [vmem:[#allocation11 + $0x10] sm:$0xff]   ;;  %v6103_v36 = vld [vmem:[#allocation11 + $0x58] sm:$0xff]  }
 0x397   :  { %3757 = vmatpush1.bf16.msra.mxu0 %v5996_v38  ;;  %5184 = vmatpush3.bf16.msra.mxu1 %v6000_v39  ;;  %v6105_v38 = vld [vmem:[#allocation11 + $0x60] sm:$0xff]  }
 0x398   :  { %3758 = vmatprep.subr.bf16.mxu0 %v6003_v40  ;;  %4175 = vmatprep.subr.bf16.mxu1 %v6027_v57  ;;  %v6106_v39 = vld [vmem:[#allocation11 + $0x20] sm:$0xff]   ;;  %v6107_v40 = vld [vmem:[#allocation11 + $0x68] sm:$0xff]  }
 0x39a   :  { %3856 = vmatmul.mubr.bf16.vlgmr.msra.gmra.mrb[12].mxu1 %v3042_v44 }
 0x39b   :  { %3759 = vmatpush1.bf16.msra.mxu0 %v6001_v42  ;;  %4176 = vmatpush1.bf16.msra.mxu1 %v6025_v56 }
 0x39c   :  { %3760 = vmatprep.subr.bf16.mxu0 %v6006_v43  ;;  %4177 = vmatprep.subr.bf16.mxu1 %v6030_v58 }
 0x39f   :  { %3761 = vmatpush1.bf16.msra.mxu0 %v6004_v45  ;;  %4178 = vmatpush1.bf16.msra.mxu1 %v6028_v59 }
 0x3a0   :  { %3762 = vmatprep.subr.bf16.mxu0 %v6009_v46  ;;  %4179 = vmatprep.subr.bf16.mxu1 %v6033_v60 }
 0x3a3   :  { %3763 = vmatpush1.bf16.msra.mxu0 %v6007_v47  ;;  %4180 = vmatpush1.bf16.msra.mxu1 %v6031_v17  ;;  %v3172_v47 = vld [vmem:[%s6595_s6] sm:$0x7] }
 0x3a4   :  { %3764 = vmatprep.subr.bf16.mxu0 %v6012_v48  ;;  %4181 = vmatprep.subr.bf16.mxu1 %v6036_v11  ;;  %v3185_v48 = vrot.slane %v3172_v47, %v6538_v33 }
 0x3a7   :  { %3765 = vmatpush1.bf16.msra.mxu0 %v6010_v19  ;;  %4182 = vmatpush1.bf16.msra.mxu1 %v6034_v61 }
 0x3a8   :  { %3766 = vmatprep.subr.bf16.mxu0 %v6015_v49  ;;  %4183 = vmatprep.subr.bf16.mxu1 %v6039_v62 }
 0x3ab   :  { %3767 = vmatpush1.bf16.msra.mxu0 %v6013_v50  ;;  %4184 = vmatpush1.bf16.msra.mxu1 %v6037_v63  ;;  %v6073_v63 = vld [vmem:[#allocation10 + $0x100] ss:$8 sps:$4 sm:$0xff]  }
 0x3ac   :  { %3768 = vmatprep.subr.bf16.mxu0 %v6018_v51  ;;  %4185 = vmatprep.subr.bf16.mxu1 %v6042_v0 }
 0x3af   :  { %3769 = vmatpush1.bf16.msra.mxu0 %v6016_v52  ;;  %4186 = vmatpush1.bf16.msra.mxu1 %v6040_v1  ;;  %v6078_v1 = vld [vmem:[#allocation10 + $0x114] ss:$8 sps:$4 sm:$0xff]  }
 0x3b0   :  { %3770 = vmatprep.subr.bf16.mxu0 %v6021_v25  ;;  %4187 = vmatprep.subr.bf16.mxu1 %v6045_v2 }
 0x3b3   :  { %3771 = vmatpush1.bf16.msra.mxu0 %v6019_v53  ;;  %4188 = vmatpush1.bf16.msra.mxu1 %v6043_v3  ;;  %v6076_v3 = vld [vmem:[#allocation10 + $0x110] ss:$8 sps:$4 sm:$0xff]  }
 0x3b4   :  { %3772 = vmatprep.subr.bf16.mxu0 %v6024_v54  ;;  %4189 = vmatprep.subr.bf16.mxu1 %v6048_v4  ;;  %v3177_v54 = vrot.slane %v3172_v47, %v6517_v18  ;;  %v6326_v4 = vmov 0  }
 0x3b7   :  { %3773 = vmatpush1.bf16.msra.mxu0 %v6022_v55  ;;  %4190 = vmatpush1.bf16.msra.mxu1 %v6046_v5  ;;  %v3181_v55 = vrot.slane %v3172_v47, %v6525_v20  ;;  %v6081_v5 = vld [vmem:[#allocation10 + $0x124] ss:$8 sps:$4 sm:$0xff]  }
 0x3b8   :  { %4191 = vmatprep.subr.bf16.mxu1 %v6051_v6  ;;  %5191 = vmatprep.subr.bf16.mxu0 %v6097_v29  ;;  %v6079_v6 = vld [vmem:[#allocation10 + $0x120] ss:$8 sps:$4 sm:$0xff]   ;;  %v6112_v29 = vld [vmem:[#allocation11 + $0x38] sm:$0xff]  }
 0x3ba   :  { %3775 = vmatmul.mubr.bf16.vlgmr.msra.gmra.mrb[8].mxu0 %v3042_v44 }
 0x3bb   :  { %4192 = vmatpush1.bf16.msra.mxu1 %v6049_v7  ;;  %5192 = vmatpush3.bf16.msra.mxu0 %v6098_v30  ;;  %v6084_v7 = vld [vmem:[#allocation10 + $0x134] ss:$8 sps:$4 sm:$0xff]   ;;  %v6327_v30 = vmov 0.0  }
 0x3bc   :  { %4193 = vmatprep.subr.bf16.mxu1 %v6054_v8  ;;  %5193 = vmatprep.subr.bf16.mxu0 %v6099_v31  ;;  %v6082_v8 = vld [vmem:[#allocation10 + $0x130] ss:$8 sps:$4 sm:$0xff]   ;;  %v3923_v31 = vld [vmem:[%s6597_s8] sm:$0x3] }
 0x3bf   :  { %4194 = vmatpush1.bf16.msra.mxu1 %v6052_v9  ;;  %5194 = vmatpush3.bf16.msra.mxu0 %v6100_v32  ;;  %v6087_v9 = vld [vmem:[#allocation10 + $0x144] ss:$8 sps:$4 sm:$0xff]   ;;  %v3928_v32 = vrot.slane %v3923_v31, %v6517_v18 }
 0x3c0   :  { %4195 = vmatprep.subr.bf16.mxu1 %v6057_v10  ;;  %5195 = vmatprep.subr.bf16.mxu0 %v6101_v34  ;;  %v6085_v10 = vld [vmem:[#allocation10 + $0x140] ss:$8 sps:$4 sm:$0xff]   ;;  %v3932_v34 = vrot.slane %v3923_v31, %v6525_v20  ;;  %v6115_v20 = vld [vmem:[#allocation13 + $0x10] sm:$0xff]  }
 0x3c1   :  { %v6114_v18 = vld [vmem:[#allocation13 + $0x8] sm:$0xff]  }
 0x3c3   :  { %4196 = vmatpush1.bf16.msra.mxu1 %v6055_v12  ;;  %5196 = vmatpush3.bf16.msra.mxu0 %v6102_v35  ;;  %v6090_v12 = vld [vmem:[#allocation10 + $0x154] ss:$8 sps:$4 sm:$0xff]  }
 0x3c4   :  { %4197 = vmatprep.subr.bf16.mxu1 %v6060_v13  ;;  %5197 = vmatprep.subr.bf16.mxu0 %v6103_v36  ;;  %v6088_v13 = vld [vmem:[#allocation10 + $0x150] ss:$8 sps:$4 sm:$0xff]  }
 0x3c7   :  { %4198 = vmatpush1.bf16.msra.mxu1 %v6058_v15  ;;  %5198 = vmatpush3.bf16.msra.mxu0 %v6104_v37  ;;  %v6093_v15 = vld [vmem:[#allocation10 + $0x164] ss:$8 sps:$4 sm:$0xff]  }
 0x3c8   :  { %4199 = vmatprep.subr.bf16.mxu1 %v6063_v16  ;;  %5199 = vmatprep.subr.bf16.mxu0 %v6105_v38  ;;  %v6091_v16 = vld [vmem:[#allocation10 + $0x160] ss:$8 sps:$4 sm:$0xff]  }
 0x3cb   :  { %4200 = vmatpush1.bf16.msra.mxu1 %v6061_v21  ;;  %5200 = vmatpush3.bf16.msra.mxu0 %v6106_v39  ;;  %v6096_v21 = vld [vmem:[#allocation10 + $0x174] ss:$8 sps:$4 sm:$0xff]  }
 0x3cc   :  { %4201 = vmatprep.subr.bf16.mxu1 %v6066_v22  ;;  %5201 = vmatprep.subr.bf16.mxu0 %v6107_v40 }
 0x3cf   :  { %4202 = vmatpush1.bf16.msra.mxu1 %v6064_v23  ;;  %5202 = vmatpush3.bf16.msra.mxu0 %v6108_v41  ;;  %v6094_v23 = vld [vmem:[#allocation10 + $0x170] ss:$8 sps:$4 sm:$0xff]  }
 0x3d0   :  { %4203 = vmatprep.subr.bf16.mxu1 %v6069_v24 }
 0x3d3   :  { %4204 = vmatpush1.bf16.msra.mxu1 %v6067_v14 }
 0x3d4   :  { %4205 = vmatprep.subr.bf16.mxu1 %v6072_v26  ;;  %v6109_v26 = vld [vmem:[#allocation11 + $0x70] sm:$0xff]  }
 0x3d5   :  { %5203 = vmatprep.subr.bf16.mxu0 %v6109_v26 }
 0x3d7   :  { %4206 = vmatpush1.bf16.msra.mxu1 %v6070_v27  ;;  %v6110_v27 = vld [vmem:[#allocation11 + $0x30] sm:$0xff]  }
 0x3d8   :  { %4216 = vmatprep.subr.bf16.mxu1 %v6075_v28  ;;  %5204 = vmatpush3.bf16.msra.mxu0 %v6110_v27  ;;  %v6111_v28 = vld [vmem:[#allocation11 + $0x78] sm:$0xff]  }
 0x3d9   :  { %5205 = vmatprep.subr.bf16.mxu0 %v6111_v28 }
 0x3dc   :  { %5206 = vmatpush3.bf16.msra.mxu0 %v6112_v29 }
 0x3dd   :  { %5222 = vmatprep.subr.bf16.mxu0 %v6327_v30 }
 0x44d   :  { %v5163_v42 = vpop.f32.mrb[8].mxu1 }
 0x44e   :  { %v5164_v43 = vpop.f32.mrb[9].mxu1 }
 0x44f   :  { %v5165_v44 = vadd.f32 %v5164_v43, %v5163_v42  ;;  %v5166_v45 = vpop.f32.mrb[10].mxu1 }
 0x450   :  { %v5167_v46 = vpop.f32.mrb[11].mxu1  ;;  %v6113_v45 = vld [vmem:[#allocation13] sm:$0xff]  }
 0x451   :  { %v3818_v50 = vadd.f32 %v5165_v44, %v3185_v48  ;;  %v6116_v48 = vld [vmem:[#allocation13 + $0x18] sm:$0xff]  }
 0x46d   :  { %v5185_v19 = vpop.f32.mrb[12].mxu1 }
 0x46e   :  { %v5186_v49 = vpop.f32.mrb[13].mxu1 }
 0x46f   :  { %v5187_v51 = vadd.f32 %v5186_v49, %v5185_v19  ;;  %v5188_v52 = vpop.f32.mrb[14].mxu1  ;;  %v6117_v19 = vld [vmem:[#allocation13 + $0x20] sm:$0xff]   ;;  %v6118_v49 = vld [vmem:[#allocation13 + $0x28] sm:$0xff]  }
 0x470   :  { %v5189_v25 = vpop.f32.mrb[15].mxu1 }
 0x471   :  { %v3858_v53 = vadd.f32 %v5187_v51, %v3818_v50  ;;  %v6119_v50 = vld [vmem:[#allocation13 + $0x30] sm:$0xff]   ;;  %v6120_v51 = vld [vmem:[#allocation13 + $0x38] sm:$0xff]   ;;  %v5121_v25 = vld [vmem:[%s6599_s10] ss:$0 sm:$0xff]  ;;  %s6329_s10 = smov [#allocation14]  }
 0x472   :  { %s4573_s3 = sshll.u32 %s6329_s10, 4  ;;  %s4574_s3 = int_to_ptr.vmem [resolvable:$true] %s4573_s3 }
 0x473   :  { %v3865_v22 = vpack.c.bf16 %v3858_v53, %v3858_v53  ;;  %p6284_p1 = scmp.lt.s32.totalorder %s4574_s3, %s4574_s3 }
 0x475   :  { %v3871_v24 = vmul.bf16 1009007652, %v3865_v22  ;;  %vm3868_vm10 = vcmp.ge.bf16.partialorder %v3865_v22, 0 }
 0x477   :  { %v3874_v14 = vsel %vm3868_vm10, %v3865_v22, %v3871_v24 }
 0x48d   :  { %v3776_v56 = vpop.f32.mrb[8].mxu0 }
 0x48e   :  { %v5250_v57 = vadd.f32 %v3776_v56, %v3177_v54  ;;  %v3778_v58 = vpop.f32.mrb[9].mxu0 }
 0x48f   :  { %v5251_v59 = vadd.f32 %v3778_v58, %v3181_v55  ;;  %v3780_v60 = vpop.f32.mrb[10].mxu0 }
 0x490   :  { %v3863_v17 = vpack.c.bf16 %v5250_v57, %v5250_v57  ;;  %v3781_v11 = vpop.f32.mrb[11].mxu0 }
 0x491   :  { %v3864_v61 = vpack.c.bf16 %v5251_v59, %v5251_v59 }
 0x492   :  { %v3869_v33 = vmul.bf16 1009007652, %v3863_v17  ;;  %vm3866_vm8 = vcmp.ge.bf16.partialorder %v3863_v17, 0 }
 0x493   :  { %v3870_v62 = vmul.bf16 1009007652, %v3864_v61  ;;  %vm3867_vm9 = vcmp.ge.bf16.partialorder %v3864_v61, 0 }
 0x494   :  { %v3872_v2 = vsel %vm3866_vm8, %v3863_v17, %v3869_v33  ;;  %v5138_v17 = vld [vmem:[%s6601_s12] ss:$0 sm:$0xff]  ;;  %s6279_s12 = scalar_lea.vmem %s4574_s3, 128 }
 0x495   :  { %v3873_v0 = vsel %vm3867_vm9, %v3864_v61, %v3870_v62  ;;  %p6280_p0 = scmp.ne.s32.totalorder %s4574_s3, %s6279_s12  ;;  %p6285_p2 = scmp.lt.s32.totalorder %s6279_s12, %s6279_s12 }
 0x496   :  { %4207 = vmatprep.mubr.bf16.mxu1 %v3873_v0 }
 0x497   :  { %4208 = vmatmul.mubr.bf16.vlgmr.msra.gmra.mrb[16].mxu1 %v3872_v2  ;;  %p6286_p3 = por %p6285_p2, %p6284_p1 }
 0x498   :  { %4217 = vmatpush1.bf16.msra.mxu1 %v6073_v63  ;;  %4248 = vmatprep.mubr.bf16.mxu1 %v6326_v4 }
 0x499   :  { %4218 = vmatprep.subr.bf16.mxu1 %v6078_v1  ;;  %p6287_p4 = pnand %p6286_p3, %p6280_p0 }
 0x49c   :  { %4219 = vmatpush1.bf16.msra.mxu1 %v6076_v3 }
 0x49d   :  { %4220 = vmatprep.subr.bf16.mxu1 %v6081_v5 }
 0x4a0   :  { %4221 = vmatpush1.bf16.msra.mxu1 %v6079_v6 }
 0x4a1   :  { %4222 = vmatprep.subr.bf16.mxu1 %v6084_v7 }
 0x4a4   :  { %4223 = vmatpush1.bf16.msra.mxu1 %v6082_v8 }
 0x4a5   :  { %4224 = vmatprep.subr.bf16.mxu1 %v6087_v9 }
 0x4a8   :  { %4225 = vmatpush1.bf16.msra.mxu1 %v6085_v10 }
 0x4a9   :  { %4226 = vmatprep.subr.bf16.mxu1 %v6090_v12 }
 0x4ac   :  { %4227 = vmatpush1.bf16.msra.mxu1 %v6088_v13 }
 0x4ad   :  { %4228 = vmatprep.subr.bf16.mxu1 %v6093_v15 }
 0x4b0   :  { %4229 = vmatpush1.bf16.msra.mxu1 %v6091_v16 }
 0x4b1   :  { %4230 = vmatprep.subr.bf16.mxu1 %v6096_v21 }
 0x4b4   :  { %4231 = vmatpush1.bf16.msra.mxu1 %v6094_v23 }
 0x4b7   :  { %4249 = vmatmul.mubr.bf16.vlgmr.msra.gmra.mrb[16].mxu1 %v3874_v14 }
 0x58a   :  { %v4250_v35 = vpop.f32.mrb[16].mxu1 }
 0x58b   :  { %v5252_v36 = vadd.f32 %v4250_v35, %v3928_v32  ;;  %v4252_v37 = vpop.f32.mrb[17].mxu1 }
 0x58c   :  { %v5253_v38 = vadd.f32 %v4252_v37, %v3932_v34  ;;  %v4254_v39 = vpop.f32.mrb[18].mxu1 }
 0x58d   :  { %v4257_v40 = vpack.c.bf16 %v5252_v36, %v5252_v36  ;;  %v4255_v41 = vpop.f32.mrb[19].mxu1 }
 0x58e   :  { %v4258_v42 = vpack.c.bf16 %v5253_v38, %v5253_v38 }
 0x58f   :  { %v4261_v43 = vmul.bf16 1009007652, %v4257_v40  ;;  %vm4259_vm11 = vcmp.ge.bf16.partialorder %v4257_v40, 0 }
 0x590   :  { %v4262_v44 = vmul.bf16 1009007652, %v4258_v42  ;;  %vm4260_vm12 = vcmp.ge.bf16.partialorder %v4258_v42, 0 }
 0x591   :  { %v4263_v47 = vsel %vm4259_vm11, %v4257_v40, %v4261_v43 }
 0x592   :  { %v4264_v46 = vsel %vm4260_vm12, %v4258_v42, %v4262_v44 }
 0x593   :  { %4432 = vmatprep.mubr.bf16.mxu0 %v4264_v46 }
 0x594   :  { %4433 = vmatmul.mubr.bf16.vlgmr.msra.gmra.mrb[12].mxu0 %v4263_v47 }
 0x595   :  { %5223 = vmatpush3.bf16.msra.mxu0 %v6113_v45  ;;  %5238 = vmatprep.mubr.msk.bf16.mxu0 %vm6328_vm13, %v6327_v30 }
 0x596   :  { %5224 = vmatprep.subr.bf16.mxu0 %v6327_v30 }
 0x599   :  { %5225 = vmatpush3.bf16.msra.mxu0 %v6114_v18 }
 0x59a   :  { %5226 = vmatprep.subr.bf16.mxu0 %v6327_v30 }
 0x59d   :  { %5227 = vmatpush3.bf16.msra.mxu0 %v6115_v20 }
 0x59e   :  { %5228 = vmatprep.subr.bf16.mxu0 %v6327_v30 }
 0x5a1   :  { %5229 = vmatpush3.bf16.msra.mxu0 %v6116_v48 }
 0x5a2   :  { %5230 = vmatprep.subr.bf16.mxu0 %v6327_v30 }
 0x5a5   :  { %5231 = vmatpush3.bf16.msra.mxu0 %v6117_v19 }
 0x5a6   :  { %5232 = vmatprep.subr.bf16.mxu0 %v6327_v30 }
 0x5a9   :  { %5233 = vmatpush3.bf16.msra.mxu0 %v6118_v49 }
 0x5aa   :  { %5234 = vmatprep.subr.bf16.mxu0 %v6327_v30 }
 0x5ad   :  { %5235 = vmatpush3.bf16.msra.mxu0 %v6119_v50 }
 0x5ae   :  { %5236 = vmatprep.subr.bf16.mxu0 %v6327_v30 }
 0x5b1   :  { %5237 = vmatpush3.bf16.msra.mxu0 %v6120_v51 }
 0x667   :  { %v5207_v52 = vpop.f32.mrb[12].mxu0 }
 0x668   :  { %v5208_v53 = vpop.f32.mrb[13].mxu0 }
 0x669   :  { %v5209_v54 = vadd.f32 %v5208_v53, %v5207_v52  ;;  %v5210_v55 = vpop.f32.mrb[14].mxu0 }
 0x66a   :  { %v5211_v56 = vpop.f32.mrb[15].mxu0 }
 0x66b   :  { %v4435_v57 = vadd.f32 %v5209_v54, %v5121_v25 }
 0x66d   :  { %v4440_v58 = vpack.c.bf16 %v4435_v57, %v4435_v57 }
 0x66f   :  { %v4442_v59 = vmul.bf16 1009007652, %v4440_v58  ;;  %vm4441_vm14 = vcmp.ge.bf16.partialorder %v4440_v58, 0 }
 0x671   :  { %v4443_v60 = vsel %vm4441_vm14, %v4440_v58, %v4442_v59 }
 0x672   :  { %5239 = vmatmul.mubr.bf16.vlgmr.msra.gmra.mrb[16].mxu0 %v4443_v60 }
 0x745   :  { %v4549_v11 = vpop.f32.mrb[16].mxu0 }
 0x746   :  { %v4550_v61 = vadd.f32 %v5138_v17, %v4549_v11  ;;  %v5240_v33 = vpop.f32.mrb[17].mxu0 }
 0x747   :  { %v4552_v62 = vpop.f32.mrb[18].mxu0 }
 0x748   :  { %4555 = vmax.xlane.f32.xlu0 %v4550_v61  ;;  %v5241_v63 = vpop.f32.mrb[19].mxu0 }
 0x7d5   :  { %v4556_v0 = vpop.xlane.xlu0 %4555 }
 0x7d6   :  { %v4557_v1 = vsub.f32 %v4550_v61, %v4556_v0 }
 0x7d8   :  { %v4558_v2 = vmul.f32 1.442695, %v4557_v1 }
 0x7da   :  { %6121 = vpow2.f32 %v4558_v2 }
 0x7e4   :  { %v6122_v3 = vpop.eup %6121 }
 0x7e5   :  { %4560 = vadd.xlane.f32.xlu0 %v6122_v3 }
 0x872   :  { %v4561_v4 = vpop.xlane.xlu0 %4560 }
 0x873   :  { %6123 = vlog2.f32 %v4561_v4 }
 0x87d   :  { %v6124_v5 = vpop.eup %6123 }
 0x87e   :  { %v4563_v6 = vmul.f32 0.6931472, %v6124_v5 }
 0x880   :  { %v4564_v7 = vadd.f32 %v4563_v6, %v4556_v0 }
 0x882   :  { %v4565_v8 = vsub.f32 %v4550_v61, %v4564_v7 }
 0x884   :  { %4566 = vst [vmem:[#allocation14] sm:$0xff] %v4565_v8 }
 0x885   :  { %6290 = shalt.err (!%p6287_p4)
}
 0x886   :  { %s6291_s20 = scalar_lea.hbm %s6602_s13, 128 }
 0x887   :  { %p6292_p5 = scmp.ne.s32.totalorder %s6602_s13, %s6291_s20  ;;  %p6295_p6 = scmp.lt.u32.totalorder %s6291_s20, %s6602_s13 }
 0x889   :  { %p6297_p7 = pnand %p6295_p6, %p6292_p5 }
 0x88b   :  { %6300 = shalt.err (!%p6297_p7)
}
 0x88c   :  { %4576 = dma.vmem_to_hbm [thread:$0]  %s4574_s3, 128, %s6602_s13, [#allocation4]  }
 0x88d   :  { %6309 = dma.done.wait [#allocation4], 128  }
 0x88e   :  { %6310 = vsyncadd [#allocation4], 4294967168 }
 0x88f   :  { %4580 = vsyncpa [#allocation3], 1 }
 0x890   :  { %4581 = vsyncpa [#allocation6], 1 }
 0x891   :  { %4582 = vsyncpa [#allocation9], 1 }
 0x892   :  { %4583 = vsyncpa [#allocation12], 1 }
 0x893   :  { %4584 = vsyncpa [#allocation4], 1 }

</bundles_post_ra>
